<compile_context>
chip_gen: v7x
topology: tpu7x:2x2x1
jax: 0.10.0
libtpu: 0.0.40
codegen_flags: <defaults>
</compile_context>

<pallas_src>
import functools

import jax
import jax.numpy as jnp
from jax.experimental import pallas as pl
from jax.experimental.pallas import tpu as pltpu


# ----------------------------------------------------------------------------
# Static layer configuration (NOT traced — only arrays are traced)
# ----------------------------------------------------------------------------
ENCODER_LAYERS = (
    dict(name="e0", kind="conv", cin=2,  cout=16, k=7, stride=1, pad=3, act="silu"),
    dict(name="e1", kind="conv", cin=16, cout=32, k=4, stride=2, pad=1, act="silu"),
    dict(name="e2", kind="conv", cin=32, cout=32, k=4, stride=2, pad=1, act="silu"),
    dict(name="e3", kind="conv", cin=32, cout=32, k=1, stride=1, pad=0, act="tanh"),  # latent
)
DECODER_LAYERS = (
    dict(name="d0", kind="conv",  cin=32, cout=32, k=3, stride=1, pad=1, act="silu"),
    dict(name="d1", kind="convT", cin=32, cout=32, k=4, stride=2, pad=1, act="silu"),
    dict(name="d2", kind="convT", cin=32, cout=16, k=4, stride=2, pad=1, act="silu"),
    dict(name="d3", kind="conv",  cin=16, cout=2,  k=7, stride=1, pad=3, act="none"),
)

BASE_FACTOR = 4          # product of encoder strides; all signals kept at L/4 resolution
_HEAD_BLOCK = 128        # width of the extra "halo head" block read from the next tile


def _round_up(x, m):
    return ((x + m - 1) // m) * m


def _cdiv(a, b):
    return -(-a // b)


# ----------------------------------------------------------------------------
# Polyphase (phase-as-channels) rewrite of Conv1d / ConvTranspose1d.
# A signal at resolution rho*Lb is stored as (rho*C, Lb):  rep[phi*C + c, n] = x[c, n*rho+phi].
# Every layer then becomes:  Y[:, n] = act(b + sum_t W_t @ X[:, n + dmin + t])  (stride 1).
# ----------------------------------------------------------------------------
def _polyphase_conv(w, b, stride, pad, rho_in):
    """w: (C_out, C_in, K) PyTorch Conv1d layout."""
    c_out, c_in, k_sz = w.shape
    assert rho_in % stride == 0
    rho_out = rho_in // stride
    taps = []
    for phi_o in range(rho_out):
        for k in range(k_sz):
            d = phi_o * stride - pad + k
            taps.append((phi_o, k, d // rho_in, d % rho_in))
    dmin = min(t[2] for t in taps)
    dmax = max(t[2] for t in taps)
    n_taps = dmax - dmin + 1
    w_eff = jnp.zeros((rho_out * c_out, rho_in * c_in, n_taps), jnp.float32)
    for phi_o, k, delta, phi_i in taps:
        w_eff = w_eff.at[phi_o * c_out:(phi_o + 1) * c_out,
                         phi_i * c_in:(phi_i + 1) * c_in,
                         delta - dmin].add(w[:, :, k])
    w_eff = jnp.transpose(w_eff, (0, 2, 1)).reshape(rho_out * c_out, n_taps * rho_in * c_in)
    b_eff = jnp.tile(b, rho_out).reshape(rho_out * c_out, 1)
    return w_eff, b_eff, dmin, n_taps, rho_out


def _polyphase_convT(w, b, stride, pad, rho_in):
    """w: (C_in, C_out, K) PyTorch ConvTranspose1d layout."""
    c_in, c_out, k_sz = w.shape
    rho_out = rho_in * stride
    taps = []
    for phi_o in range(rho_out):
        for k in range(k_sz):
            if (phi_o + pad - k) % stride != 0:
                continue
            q = (phi_o + pad - k) // stride
            taps.append((phi_o, k, q // rho_in, q % rho_in))
    dmin = min(t[2] for t in taps)
    dmax = max(t[2] for t in taps)
    n_taps = dmax - dmin + 1
    w_eff = jnp.zeros((rho_out * c_out, rho_in * c_in, n_taps), jnp.float32)
    for phi_o, k, delta, phi_i in taps:
        w_eff = w_eff.at[phi_o * c_out:(phi_o + 1) * c_out,
                         phi_i * c_in:(phi_i + 1) * c_in,
                         delta - dmin].add(jnp.transpose(w[:, :, k]))
    w_eff = jnp.transpose(w_eff, (0, 2, 1)).reshape(rho_out * c_out, n_taps * rho_in * c_in)
    b_eff = jnp.tile(b, rho_out).reshape(rho_out * c_out, 1)
    return w_eff, b_eff, dmin, n_taps, rho_out


def _build_effective_layers(params):
    layers = []
    rho = BASE_FACTOR
    for cfg in ENCODER_LAYERS + DECODER_LAYERS:
        p = params[cfg["name"]]
        if cfg["kind"] == "conv":
            w_eff, b_eff, dmin, n_taps, rho = _polyphase_conv(
                p["w"], p["b"], cfg["stride"], cfg["pad"], rho)
        else:
            w_eff, b_eff, dmin, n_taps, rho = _polyphase_convT(
                p["w"], p["b"], cfg["stride"], cfg["pad"], rho)
        layers.append(dict(
            w=w_eff.astype(jnp.bfloat16),
            b=b_eff.astype(jnp.float32),
            dmin=dmin, n_taps=n_taps,
            cin_eff=w_eff.shape[1] // n_taps,
            cout_eff=w_eff.shape[0],
            act=cfg["act"]))
    assert rho == BASE_FACTOR  # net resamples back to the input rate
    return layers


# ----------------------------------------------------------------------------
# Fused whole-network Pallas kernel
# ----------------------------------------------------------------------------
def _silu(x):
    # numerically stable sigmoid: exp of a non-positive argument only (no overflow),
    # reciprocal on the EUP slot.
    e = jnp.exp(-jnp.abs(x))
    sig = jnp.where(x >= 0, 1.0, e) * pl.reciprocal(1.0 + e, approx=True)
    return x * sig


def _apply_act(x, act):
    if act == "silu":
        return _silu(x)
    if act == "tanh":
        return jnp.tanh(x)
    return x


def _fused_net_kernel(*refs, meta, tl_b, halo_l, halo_tot, lb):
    n_layers = len(meta)
    xm_ref, xh_ref = refs[0], refs[1]
    wb_refs = refs[2:2 + 2 * n_layers]
    o_ref = refs[-2]
    xwin = refs[-1]

    i = pl.program_id(1)
    pos0 = i * tl_b - halo_l          # absolute base position of window column 0

    # Assemble the haloed input window in VMEM (aligned main block + head of next block).
    xwin[:, :tl_b] = xm_ref[...]
    xwin[:, tl_b:] = xh_ref[:, :halo_tot]

    h = xwin[...]                     # (8, tl_b + halo_tot) bf16
    off = 0
    for l, m in enumerate(meta):
        w_ref, b_ref = wb_refs[2 * l], wb_refs[2 * l + 1]
        n_taps, cin = m["n_taps"], m["cin_eff"]
        w_full = w_ref[...]           # (cout_eff, n_taps * cin_eff) bf16, VMEM resident
        w_cur = h.shape[1]
        w_len = w_cur - (n_taps - 1)

        # K shifted matmuls accumulating in f32 (in-kernel "im2col").
        acc = jnp.zeros((m["cout_eff"], w_len), jnp.float32)
        for t in range(n_taps):
            acc = acc + jnp.dot(w_full[:, t * cin:(t + 1) * cin],
                                h[:, t:t + w_len],
                                preferred_element_type=jnp.float32)
        acc = acc + b_ref[...]
        acc = _apply_act(acc, m["act"])

        off = off - m["dmin"]
        if l + 1 < n_layers:
            # Columns outside [0, Lb) are the next layer's zero padding (per PyTorch).
            pos = pos0 + off + jax.lax.broadcasted_iota(jnp.int32, (1, w_len), 1)
            mask = jnp.logical_and(pos >= 0, pos < lb)
            acc = jnp.where(mask, acc, 0.0)
            h = acc.astype(jnp.bfloat16)
        else:
            o_ref[...] = acc.astype(o_ref.dtype)


def _fused_forward(params, x):
    """x: (B, 2, L) float32 -> (B, 2, L) float32 with ONE fused pallas_call."""
    B, C, L = x.shape
    assert C == ENCODER_LAYERS[0]["cin"], "expects stereo (2-channel) input"
    assert L % BASE_FACTOR == 0, "input length must be a multiple of 4"
    lb = L // BASE_FACTOR

    layers = _build_effective_layers(params)
    halo_l = sum(max(0, -m["dmin"]) for m in layers)
    halo_r = sum(max(0, m["dmin"] + m["n_taps"] - 1) for m in layers)
    halo_tot = halo_l + halo_r
    assert halo_tot <= _HEAD_BLOCK

    cin0 = layers[0]["cin_eff"]       # = 8  (2 channels x 4 phases)
    cout_last = layers[-1]["cout_eff"]  # = 8

    # Tile the base-resolution axis: big lane-dense tiles, multiple of 128.
    tl_b = max(128, min(1024, _round_up(lb, 128)))
    num_tiles = _cdiv(lb, tl_b)
    l_pad = num_tiles * tl_b + _HEAD_BLOCK

    # Phase-decompose input: (B, 2, L) -> (B, 8, Lb), channel = phase*2 + c, then halo-pad.
    xr = x.astype(jnp.float32).reshape(B, C, lb, BASE_FACTOR)
    xr = jnp.transpose(xr, (0, 3, 1, 2)).reshape(B, BASE_FACTOR * C, lb)
    xr = jnp.pad(xr.astype(jnp.bfloat16),
                 ((0, 0), (0, 0), (halo_l, l_pad - halo_l - lb)))

    meta = tuple(dict(n_taps=m["n_taps"], cin_eff=m["cin_eff"], cout_eff=m["cout_eff"],
                      dmin=m["dmin"], act=m["act"]) for m in layers)
    kernel = functools.partial(_fused_net_kernel, meta=meta, tl_b=tl_b,
                               halo_l=halo_l, halo_tot=halo_tot, lb=lb)

    in_specs = [
        pl.BlockSpec((None, cin0, tl_b), lambda b, i: (b, 0, i)),
        pl.BlockSpec((None, cin0, _HEAD_BLOCK),
                     lambda b, i: (b, 0, (i + 1) * (tl_b // _HEAD_BLOCK))),
    ]
    args = [xr, xr]
    for m in layers:
        args += [m["w"], m["b"]]
        in_specs += [pl.BlockSpec(m["w"].shape, lambda b, i: (0, 0)),
                     pl.BlockSpec(m["b"].shape, lambda b, i: (0, 0))]

    out_shape = jax.ShapeDtypeStruct((B, cout_last, num_tiles * tl_b), jnp.float32)
    out_spec = pl.BlockSpec((None, cout_last, tl_b), lambda b, i: (b, 0, i))

    # VMEM budget derived from actual per-step footprint (headroom for v7x's 64 MiB VMEM).
    wbytes = sum(int(m["w"].size) * 2 + int(m["b"].size) * 4 for m in layers)
    blk_bytes = 2 * (cin0 * tl_b * 2 + cin0 * _HEAD_BLOCK * 2 + cout_last * tl_b * 4)
    work_bytes = 8 * 64 * (tl_b + halo_tot) * 4
    vmem_limit = int(min(max(4 * (wbytes + blk_bytes + work_bytes), 32 * 2**20), 48 * 2**20))

    y = pl.pallas_call(
        kernel,
        out_shape=out_shape,
        grid=(B, num_tiles),
        in_specs=in_specs,
        out_specs=out_spec,
        scratch_shapes=[pltpu.VMEM((cin0, tl_b + halo_tot), jnp.bfloat16)],
        compiler_params=pltpu.CompilerParams(
            dimension_semantics=("parallel", "parallel"),
            vmem_limit_bytes=vmem_limit),
    )(*args)

    # Crop padding and phase-recompose: (B, 8, Lb) -> (B, 2, L).
    y = y[:, :, :lb].reshape(B, BASE_FACTOR, C, lb)
    y = jnp.transpose(y, (0, 2, 3, 1)).reshape(B, C, L)
    return y


# ----------------------------------------------------------------------------
# Parameters (deterministic synthetic init, PyTorch-style uniform +-1/sqrt(fan_in))
# ----------------------------------------------------------------------------
def _uniform(key, shape, fan_in):
    bound = 1.0 / jnp.sqrt(float(fan_in))
    return jax.random.uniform(key, shape, jnp.float32, -bound, bound)


def init_params(key):
    params = {}
    for cfg in ENCODER_LAYERS + DECODER_LAYERS:
        key, kw, kb = jax.random.split(key, 3)
        cin, cout, k = cfg["cin"], cfg["cout"], cfg["k"]
        if cfg["kind"] == "conv":
            fan_in = cin * k
            w = _uniform(kw, (cout, cin, k), fan_in)
        else:  # ConvTranspose1d: weight (C_in, C_out, K)
            fan_in = cout * k
            w = _uniform(kw, (cin, cout, k), fan_in)
        b = _uniform(kb, (cout,), fan_in)
        params[cfg["name"]] = {"w": w, "b": b}
    return params


# ----------------------------------------------------------------------------
# Forward pass (encoder -> decoder -> optional mono mean), like the nn.Module
# ----------------------------------------------------------------------------
@functools.partial(jax.jit, static_argnames=("mono_output", "keep_channel_dim"))
def audio_autoencoder_forward(params, input_tensor, mono_output=False, keep_channel_dim=True):
    if not mono_output and not keep_channel_dim:
        raise RuntimeError("Channel dimension can only be discarded if output is set to mono.")
    decoded = _fused_forward(params, input_tensor)
    if mono_output:
        return jnp.mean(decoded, axis=1, keepdims=keep_channel_dim)
    return decoded


# ----------------------------------------------------------------------------
# Pure-JAX reference (zero-stuffing convT, f32 everywhere) for correctness check
# ----------------------------------------------------------------------------
def _ref_conv1d(x, w, b, stride, pad):
    B, C, L = x.shape
    C_out, _, K = w.shape
    xp = jnp.pad(x, ((0, 0), (0, 0), (pad, pad)))
    L_out = (L + 2 * pad - K) // stride + 1
    out = jnp.zeros((B, C_out, L_out), jnp.float32)
    for k in range(K):
        xs = xp[:, :, k: k + stride * (L_out - 1) + 1: stride]
        out = out + jnp.einsum("bcl,oc->bol", xs, w[:, :, k])
    return out + b[None, :, None]


def _ref_convT1d(x, w, b, stride, pad):
    B, C_in, L = x.shape
    _, C_out, K = w.shape
    xz = jnp.zeros((B, C_in, (L - 1) * stride + 1), x.dtype).at[:, :, ::stride].set(x)
    w_eff = jnp.flip(jnp.transpose(w, (1, 0, 2)), axis=-1)
    return _ref_conv1d(xz, w_eff, b, stride=1, pad=K - 1 - pad)


def reference_forward(params, x):
    h = x.astype(jnp.float32)
    for cfg in ENCODER_LAYERS + DECODER_LAYERS:
        p = params[cfg["name"]]
        if cfg["kind"] == "conv":
            h = _ref_conv1d(h, p["w"], p["b"], cfg["stride"], cfg["pad"])
        else:
            h = _ref_convT1d(h, p["w"], p["b"], cfg["stride"], cfg["pad"])
        if cfg["act"] == "silu":
            h = h * jax.nn.sigmoid(h)
        elif cfg["act"] == "tanh":
            h = jnp.tanh(h)
    return h


if __name__ == "__main__":
    key = jax.random.PRNGKey(0)
    kp, kx = jax.random.split(key)
    params = init_params(kp)

    # small stereo waveform batch: (batch=2, channels=2, length=64)
    x = jax.random.normal(kx, (2, 2, 64), jnp.float32)

    out = audio_autoencoder_forward(params, x, mono_output=False, keep_channel_dim=True)
    out = jax.block_until_ready(out)
    assert out.shape == (2, 2, 64), out.shape

    # correctness check against the pure-JAX f32 reference (bf16 MXU path -> loose tol)
    ref = jax.block_until_ready(reference_forward(params, x))
    denom = float(jnp.max(jnp.abs(ref))) + 1e-6
    rel_err = float(jnp.max(jnp.abs(out - ref))) / denom
    assert rel_err < 5e-2, f"mismatch vs reference: rel_err={rel_err}"

    # mono path (mean over channel dim, keepdim True / False)
    out_mono = audio_autoencoder_forward(params, x, mono_output=True, keep_channel_dim=True)
    out_mono = jax.block_until_ready(out_mono)
    assert out_mono.shape == (2, 1, 64), out_mono.shape

    out_flat = audio_autoencoder_forward(params, x, mono_output=True, keep_channel_dim=False)
    out_flat = jax.block_until_ready(out_flat)
    assert out_flat.shape == (2, 64), out_flat.shape

    print("KERNEL_OK")
</pallas_src>

<mosaic_0001>
module attributes {stable_mosaic.version = 11 : i64} {
  func.func @_fused_net_kernel(%arg0: i32, %arg1: i32, %arg2: memref<1x8x128xbf16, #tpu.memory_space<vmem>>, %arg3: memref<1x8x128xbf16, #tpu.memory_space<vmem>>, %arg4: memref<64x24xbf16, #tpu.memory_space<vmem>>, %arg5: memref<64x1xf32, #tpu.memory_space<vmem>>, %arg6: memref<64x192xbf16, #tpu.memory_space<vmem>>, %arg7: memref<64x1xf32, #tpu.memory_space<vmem>>, %arg8: memref<32x192xbf16, #tpu.memory_space<vmem>>, %arg9: memref<32x1xf32, #tpu.memory_space<vmem>>, %arg10: memref<32x32xbf16, #tpu.memory_space<vmem>>, %arg11: memref<32x1xf32, #tpu.memory_space<vmem>>, %arg12: memref<32x96xbf16, #tpu.memory_space<vmem>>, %arg13: memref<32x1xf32, #tpu.memory_space<vmem>>, %arg14: memref<64x96xbf16, #tpu.memory_space<vmem>>, %arg15: memref<64x1xf32, #tpu.memory_space<vmem>>, %arg16: memref<64x192xbf16, #tpu.memory_space<vmem>>, %arg17: memref<64x1xf32, #tpu.memory_space<vmem>>, %arg18: memref<8x192xbf16, #tpu.memory_space<vmem>>, %arg19: memref<8x1xf32, #tpu.memory_space<vmem>>, %arg20: memref<1x8x128xf32, #tpu.memory_space<vmem>>, %arg21: memref<8x142xbf16, #tpu.memory_space<vmem>>) attributes {dimension_semantics = [#tpu.dimension_semantics<parallel>, #tpu.dimension_semantics<parallel>], iteration_bounds = array<i64: 2, 1>, scalar_prefetch = 0 : i64, scratch_operands = 1 : i64, tpu.core_type = #tpu.core_type<tc>, window_params = [{transform_indices = @transform_0, window_bounds = array<i64: 1, 8, 128>}, {transform_indices = @transform_1, window_bounds = array<i64: 1, 8, 128>}, {pipeline_mode = #tpu.pipeline_mode<synchronous>, transform_indices = @transform_2, window_bounds = array<i64: 64, 24>}, {pipeline_mode = #tpu.pipeline_mode<synchronous>, transform_indices = @transform_3, window_bounds = array<i64: 64, 1>}, {pipeline_mode = #tpu.pipeline_mode<synchronous>, transform_indices = @transform_4, window_bounds = array<i64: 64, 192>}, {pipeline_mode = #tpu.pipeline_mode<synchronous>, transform_indices = @transform_5, window_bounds = array<i64: 64, 1>}, {pipeline_mode = #tpu.pipeline_mode<synchronous>, transform_indices = @transform_6, window_bounds = array<i64: 32, 192>}, {pipeline_mode = #tpu.pipeline_mode<synchronous>, transform_indices = @transform_7, window_bounds = array<i64: 32, 1>}, {pipeline_mode = #tpu.pipeline_mode<synchronous>, transform_indices = @transform_8, window_bounds = array<i64: 32, 32>}, {pipeline_mode = #tpu.pipeline_mode<synchronous>, transform_indices = @transform_9, window_bounds = array<i64: 32, 1>}, {pipeline_mode = #tpu.pipeline_mode<synchronous>, transform_indices = @transform_10, window_bounds = array<i64: 32, 96>}, {pipeline_mode = #tpu.pipeline_mode<synchronous>, transform_indices = @transform_11, window_bounds = array<i64: 32, 1>}, {pipeline_mode = #tpu.pipeline_mode<synchronous>, transform_indices = @transform_12, window_bounds = array<i64: 64, 96>}, {pipeline_mode = #tpu.pipeline_mode<synchronous>, transform_indices = @transform_13, window_bounds = array<i64: 64, 1>}, {pipeline_mode = #tpu.pipeline_mode<synchronous>, transform_indices = @transform_14, window_bounds = array<i64: 64, 192>}, {pipeline_mode = #tpu.pipeline_mode<synchronous>, transform_indices = @transform_15, window_bounds = array<i64: 64, 1>}, {pipeline_mode = #tpu.pipeline_mode<synchronous>, transform_indices = @transform_16, window_bounds = array<i64: 8, 192>}, {pipeline_mode = #tpu.pipeline_mode<synchronous>, transform_indices = @transform_17, window_bounds = array<i64: 8, 1>}, {transform_indices = @transform_18, window_bounds = array<i64: 1, 8, 128>}]} {
    %c128_i32 = arith.constant 128 : i32
    %0 = arith.muli %arg1, %c128_i32 : i32
    %c7_i32 = arith.constant 7 : i32
    %1 = arith.subi %0, %c7_i32 : i32
    %c0 = arith.constant 0 : index
    %c0_0 = arith.constant 0 : index
    %c0_1 = arith.constant 0 : index
    %2 = vector.load %arg2[%c0, %c0_0, %c0_1] : memref<1x8x128xbf16, #tpu.memory_space<vmem>>, vector<1x8x128xbf16>
    %3 = vector.shape_cast %2 : vector<1x8x128xbf16> to vector<8x128xbf16>
    %c0_2 = arith.constant 0 : index
    %c0_3 = arith.constant 0 : index
    %4 = vector.load %arg21[%c0_2, %c0_3] : memref<8x142xbf16, #tpu.memory_space<vmem>>, vector<8x128xbf16>
    tpu.vector_store %arg21[%c0_2, %c0_3], %3 {strides = array<i32>} : memref<8x142xbf16, #tpu.memory_space<vmem>>, vector<8x128xbf16>,
    %c0_4 = arith.constant 0 : index
    %c0_5 = arith.constant 0 : index
    %c0_6 = arith.constant 0 : index
    %5 = vector.load %arg3[%c0_4, %c0_5, %c0_6] : memref<1x8x128xbf16, #tpu.memory_space<vmem>>, vector<1x8x14xbf16>
    %6 = vector.shape_cast %5 : vector<1x8x14xbf16> to vector<8x14xbf16>
    %c0_7 = arith.constant 0 : index
    %c128 = arith.constant 128 : index
    %7 = vector.load %arg21[%c0_7, %c128] : memref<8x142xbf16, #tpu.memory_space<vmem>>, vector<8x14xbf16>
    tpu.vector_store %arg21[%c0_7, %c128], %6 {strides = array<i32>} : memref<8x142xbf16, #tpu.memory_space<vmem>>, vector<8x14xbf16>,
    %c0_8 = arith.constant 0 : index
    %c0_9 = arith.constant 0 : index
    %8 = vector.load %arg21[%c0_8, %c0_9] : memref<8x142xbf16, #tpu.memory_space<vmem>>, vector<8x142xbf16>
    %c0_10 = arith.constant 0 : index
    %c0_11 = arith.constant 0 : index
    %9 = vector.load %arg4[%c0_10, %c0_11] : memref<64x24xbf16, #tpu.memory_space<vmem>>, vector<64x24xbf16>
    %cst = arith.constant 0.000000e+00 : f32
    %10 = vector.broadcast %cst : f32 to vector<64x140xf32>
    %11 = vector.extract_strided_slice %9 {offsets = [0, 0], sizes = [64, 8], strides = [1, 1]} : vector<64x24xbf16> to vector<64x8xbf16>
    %12 = vector.extract_strided_slice %8 {offsets = [0, 0], sizes = [8, 140], strides = [1, 1]} : vector<8x142xbf16> to vector<8x140xbf16>
    %cst_12 = arith.constant dense<0.000000e+00> : vector<64x140xf32>
    %13 = tpu.matmul %11, %12, %cst_12 {dimension_numbers = #tpu.dot_dimension_numbers<[1], [0], [0], [1], [0, 0, 1, 1], [], []>} : vector<64x8xbf16>, vector<8x140xbf16>, vector<64x140xf32> -> vector<64x140xf32>
    %14 = arith.addf %10, %13 : vector<64x140xf32>
    %15 = vector.extract_strided_slice %9 {offsets = [0, 8], sizes = [64, 8], strides = [1, 1]} : vector<64x24xbf16> to vector<64x8xbf16>
    %16 = vector.extract_strided_slice %8 {offsets = [0, 1], sizes = [8, 140], strides = [1, 1]} : vector<8x142xbf16> to vector<8x140xbf16>
    %cst_13 = arith.constant dense<0.000000e+00> : vector<64x140xf32>
    %17 = tpu.matmul %15, %16, %cst_13 {dimension_numbers = #tpu.dot_dimension_numbers<[1], [0], [0], [1], [0, 0, 1, 1], [], []>} : vector<64x8xbf16>, vector<8x140xbf16>, vector<64x140xf32> -> vector<64x140xf32>
    %18 = arith.addf %14, %17 : vector<64x140xf32>
    %19 = vector.extract_strided_slice %9 {offsets = [0, 16], sizes = [64, 8], strides = [1, 1]} : vector<64x24xbf16> to vector<64x8xbf16>
    %20 = vector.extract_strided_slice %8 {offsets = [0, 2], sizes = [8, 140], strides = [1, 1]} : vector<8x142xbf16> to vector<8x140xbf16>
    %cst_14 = arith.constant dense<0.000000e+00> : vector<64x140xf32>
    %21 = tpu.matmul %19, %20, %cst_14 {dimension_numbers = #tpu.dot_dimension_numbers<[1], [0], [0], [1], [0, 0, 1, 1], [], []>} : vector<64x8xbf16>, vector<8x140xbf16>, vector<64x140xf32> -> vector<64x140xf32>
    %22 = arith.addf %18, %21 : vector<64x140xf32>
    %c0_15 = arith.constant 0 : index
    %c0_16 = arith.constant 0 : index
    %23 = vector.load %arg5[%c0_15, %c0_16] : memref<64x1xf32, #tpu.memory_space<vmem>>, vector<64x1xf32>
    %24 = vector.broadcast %23 : vector<64x1xf32> to vector<64x140xf32>
    %25 = arith.addf %22, %24 : vector<64x140xf32>
    %26 = math.absf %25 : vector<64x140xf32>
    %cst_17 = arith.constant 0.000000e+00 : f32
    %27 = vector.broadcast %cst_17 : f32 to vector<64x140xf32>
    %28 = arith.subf %27, %26 : vector<64x140xf32>
    %29 = math.exp %28 : vector<64x140xf32>
    %cst_18 = arith.constant 0.000000e+00 : f32
    %30 = vector.broadcast %cst_18 : f32 to vector<64x140xf32>
    %31 = arith.cmpf oge, %25, %30 : vector<64x140xf32>
    %cst_19 = arith.constant 1.000000e+00 : f32
    %32 = vector.broadcast %cst_19 : f32 to vector<64x140xf32>
    %33 = arith.select %31, %32, %29 : vector<64x140xi1>, vector<64x140xf32>
    %cst_20 = arith.constant 1.000000e+00 : f32
    %34 = vector.broadcast %cst_20 : f32 to vector<64x140xf32>
    %35 = arith.addf %34, %29 : vector<64x140xf32>
    %36 = tpu.reciprocal %35 {approx = true} : vector<64x140xf32> -> vector<64x140xf32>
    %37 = arith.mulf %33, %36 : vector<64x140xf32>
    %38 = arith.mulf %25, %37 : vector<64x140xf32>
    %c1_i32 = arith.constant 1 : i32
    %39 = arith.addi %1, %c1_i32 : i32
    %40 = tpu.iota {dimensions = array<i32: 1>} : vector<1x140xi32>
    %41 = vector.broadcast %39 : i32 to vector<1x140xi32>
    %42 = arith.addi %41, %40 : vector<1x140xi32>
    %c0_i32 = arith.constant 0 : i32
    %43 = vector.broadcast %c0_i32 : i32 to vector<1x140xi32>
    %44 = arith.cmpi sge, %42, %43 : vector<1x140xi32>
    %c16_i32 = arith.constant 16 : i32
    %45 = vector.broadcast %c16_i32 : i32 to vector<1x140xi32>
    %46 = arith.cmpi slt, %42, %45 : vector<1x140xi32>
    %47 = arith.andi %44, %46 : vector<1x140xi1>
    %cst_21 = arith.constant 0.000000e+00 : f32
    %48 = vector.shape_cast %47 : vector<1x140xi1> to vector<1x140xi1>
    %49 = vector.broadcast %48 : vector<1x140xi1> to vector<64x140xi1>
    %50 = vector.broadcast %cst_21 : f32 to vector<64x140xf32>
    %51 = arith.select %49, %38, %50 : vector<64x140xi1>, vector<64x140xf32>
    %52 = arith.truncf %51 : vector<64x140xf32> to vector<64x140xbf16>
    %c0_22 = arith.constant 0 : index
    %c0_23 = arith.constant 0 : index
    %53 = vector.load %arg6[%c0_22, %c0_23] : memref<64x192xbf16, #tpu.memory_space<vmem>>, vector<64x192xbf16>
    %cst_24 = arith.constant 0.000000e+00 : f32
    %54 = vector.broadcast %cst_24 : f32 to vector<64x138xf32>
    %55 = vector.extract_strided_slice %53 {offsets = [0, 0], sizes = [64, 64], strides = [1, 1]} : vector<64x192xbf16> to vector<64x64xbf16>
    %56 = vector.extract_strided_slice %52 {offsets = [0, 0], sizes = [64, 138], strides = [1, 1]} : vector<64x140xbf16> to vector<64x138xbf16>
    %cst_25 = arith.constant dense<0.000000e+00> : vector<64x138xf32>
    %57 = tpu.matmul %55, %56, %cst_25 {dimension_numbers = #tpu.dot_dimension_numbers<[1], [0], [0], [1], [0, 0, 1, 1], [], []>} : vector<64x64xbf16>, vector<64x138xbf16>, vector<64x138xf32> -> vector<64x138xf32>
    %58 = arith.addf %54, %57 : vector<64x138xf32>
    %59 = vector.extract_strided_slice %53 {offsets = [0, 64], sizes = [64, 64], strides = [1, 1]} : vector<64x192xbf16> to vector<64x64xbf16>
    %60 = vector.extract_strided_slice %52 {offsets = [0, 1], sizes = [64, 138], strides = [1, 1]} : vector<64x140xbf16> to vector<64x138xbf16>
    %cst_26 = arith.constant dense<0.000000e+00> : vector<64x138xf32>
    %61 = tpu.matmul %59, %60, %cst_26 {dimension_numbers = #tpu.dot_dimension_numbers<[1], [0], [0], [1], [0, 0, 1, 1], [], []>} : vector<64x64xbf16>, vector<64x138xbf16>, vector<64x138xf32> -> vector<64x138xf32>
    %62 = arith.addf %58, %61 : vector<64x138xf32>
    %63 = vector.extract_strided_slice %53 {offsets = [0, 128], sizes = [64, 64], strides = [1, 1]} : vector<64x192xbf16> to vector<64x64xbf16>
    %64 = vector.extract_strided_slice %52 {offsets = [0, 2], sizes = [64, 138], strides = [1, 1]} : vector<64x140xbf16> to vector<64x138xbf16>
    %cst_27 = arith.constant dense<0.000000e+00> : vector<64x138xf32>
    %65 = tpu.matmul %63, %64, %cst_27 {dimension_numbers = #tpu.dot_dimension_numbers<[1], [0], [0], [1], [0, 0, 1, 1], [], []>} : vector<64x64xbf16>, vector<64x138xbf16>, vector<64x138xf32> -> vector<64x138xf32>
    %66 = arith.addf %62, %65 : vector<64x138xf32>
    %c0_28 = arith.constant 0 : index
    %c0_29 = arith.constant 0 : index
    %67 = vector.load %arg7[%c0_28, %c0_29] : memref<64x1xf32, #tpu.memory_space<vmem>>, vector<64x1xf32>
    %68 = vector.broadcast %67 : vector<64x1xf32> to vector<64x138xf32>
    %69 = arith.addf %66, %68 : vector<64x138xf32>
    %70 = math.absf %69 : vector<64x138xf32>
    %cst_30 = arith.constant 0.000000e+00 : f32
    %71 = vector.broadcast %cst_30 : f32 to vector<64x138xf32>
    %72 = arith.subf %71, %70 : vector<64x138xf32>
    %73 = math.exp %72 : vector<64x138xf32>
    %cst_31 = arith.constant 0.000000e+00 : f32
    %74 = vector.broadcast %cst_31 : f32 to vector<64x138xf32>
    %75 = arith.cmpf oge, %69, %74 : vector<64x138xf32>
    %cst_32 = arith.constant 1.000000e+00 : f32
    %76 = vector.broadcast %cst_32 : f32 to vector<64x138xf32>
    %77 = arith.select %75, %76, %73 : vector<64x138xi1>, vector<64x138xf32>
    %cst_33 = arith.constant 1.000000e+00 : f32
    %78 = vector.broadcast %cst_33 : f32 to vector<64x138xf32>
    %79 = arith.addf %78, %73 : vector<64x138xf32>
    %80 = tpu.reciprocal %79 {approx = true} : vector<64x138xf32> -> vector<64x138xf32>
    %81 = arith.mulf %77, %80 : vector<64x138xf32>
    %82 = arith.mulf %69, %81 : vector<64x138xf32>
    %c2_i32 = arith.constant 2 : i32
    %83 = arith.addi %1, %c2_i32 : i32
    %84 = tpu.iota {dimensions = array<i32: 1>} : vector<1x138xi32>
    %85 = vector.broadcast %83 : i32 to vector<1x138xi32>
    %86 = arith.addi %85, %84 : vector<1x138xi32>
    %c0_i32_34 = arith.constant 0 : i32
    %87 = vector.broadcast %c0_i32_34 : i32 to vector<1x138xi32>
    %88 = arith.cmpi sge, %86, %87 : vector<1x138xi32>
    %c16_i32_35 = arith.constant 16 : i32
    %89 = vector.broadcast %c16_i32_35 : i32 to vector<1x138xi32>
    %90 = arith.cmpi slt, %86, %89 : vector<1x138xi32>
    %91 = arith.andi %88, %90 : vector<1x138xi1>
    %cst_36 = arith.constant 0.000000e+00 : f32
    %92 = vector.shape_cast %91 : vector<1x138xi1> to vector<1x138xi1>
    %93 = vector.broadcast %92 : vector<1x138xi1> to vector<64x138xi1>
    %94 = vector.broadcast %cst_36 : f32 to vector<64x138xf32>
    %95 = arith.select %93, %82, %94 : vector<64x138xi1>, vector<64x138xf32>
    %96 = arith.truncf %95 : vector<64x138xf32> to vector<64x138xbf16>
    %c0_37 = arith.constant 0 : index
    %c0_38 = arith.constant 0 : index
    %97 = vector.load %arg8[%c0_37, %c0_38] : memref<32x192xbf16, #tpu.memory_space<vmem>>, vector<32x192xbf16>
    %cst_39 = arith.constant 0.000000e+00 : f32
    %98 = vector.broadcast %cst_39 : f32 to vector<32x136xf32>
    %99 = vector.extract_strided_slice %97 {offsets = [0, 0], sizes = [32, 64], strides = [1, 1]} : vector<32x192xbf16> to vector<32x64xbf16>
    %100 = vector.extract_strided_slice %96 {offsets = [0, 0], sizes = [64, 136], strides = [1, 1]} : vector<64x138xbf16> to vector<64x136xbf16>
    %cst_40 = arith.constant dense<0.000000e+00> : vector<32x136xf32>
    %101 = tpu.matmul %99, %100, %cst_40 {dimension_numbers = #tpu.dot_dimension_numbers<[1], [0], [0], [1], [0, 0, 1, 1], [], []>} : vector<32x64xbf16>, vector<64x136xbf16>, vector<32x136xf32> -> vector<32x136xf32>
    %102 = arith.addf %98, %101 : vector<32x136xf32>
    %103 = vector.extract_strided_slice %97 {offsets = [0, 64], sizes = [32, 64], strides = [1, 1]} : vector<32x192xbf16> to vector<32x64xbf16>
    %104 = vector.extract_strided_slice %96 {offsets = [0, 1], sizes = [64, 136], strides = [1, 1]} : vector<64x138xbf16> to vector<64x136xbf16>
    %cst_41 = arith.constant dense<0.000000e+00> : vector<32x136xf32>
    %105 = tpu.matmul %103, %104, %cst_41 {dimension_numbers = #tpu.dot_dimension_numbers<[1], [0], [0], [1], [0, 0, 1, 1], [], []>} : vector<32x64xbf16>, vector<64x136xbf16>, vector<32x136xf32> -> vector<32x136xf32>
    %106 = arith.addf %102, %105 : vector<32x136xf32>
    %107 = vector.extract_strided_slice %97 {offsets = [0, 128], sizes = [32, 64], strides = [1, 1]} : vector<32x192xbf16> to vector<32x64xbf16>
    %108 = vector.extract_strided_slice %96 {offsets = [0, 2], sizes = [64, 136], strides = [1, 1]} : vector<64x138xbf16> to vector<64x136xbf16>
    %cst_42 = arith.constant dense<0.000000e+00> : vector<32x136xf32>
    %109 = tpu.matmul %107, %108, %cst_42 {dimension_numbers = #tpu.dot_dimension_numbers<[1], [0], [0], [1], [0, 0, 1, 1], [], []>} : vector<32x64xbf16>, vector<64x136xbf16>, vector<32x136xf32> -> vector<32x136xf32>
    %110 = arith.addf %106, %109 : vector<32x136xf32>
    %c0_43 = arith.constant 0 : index
    %c0_44 = arith.constant 0 : index
    %111 = vector.load %arg9[%c0_43, %c0_44] : memref<32x1xf32, #tpu.memory_space<vmem>>, vector<32x1xf32>
    %112 = vector.broadcast %111 : vector<32x1xf32> to vector<32x136xf32>
    %113 = arith.addf %110, %112 : vector<32x136xf32>
    %114 = math.absf %113 : vector<32x136xf32>
    %cst_45 = arith.constant 0.000000e+00 : f32
    %115 = vector.broadcast %cst_45 : f32 to vector<32x136xf32>
    %116 = arith.subf %115, %114 : vector<32x136xf32>
    %117 = math.exp %116 : vector<32x136xf32>
    %cst_46 = arith.constant 0.000000e+00 : f32
    %118 = vector.broadcast %cst_46 : f32 to vector<32x136xf32>
    %119 = arith.cmpf oge, %113, %118 : vector<32x136xf32>
    %cst_47 = arith.constant 1.000000e+00 : f32
    %120 = vector.broadcast %cst_47 : f32 to vector<32x136xf32>
    %121 = arith.select %119, %120, %117 : vector<32x136xi1>, vector<32x136xf32>
    %cst_48 = arith.constant 1.000000e+00 : f32
    %122 = vector.broadcast %cst_48 : f32 to vector<32x136xf32>
    %123 = arith.addf %122, %117 : vector<32x136xf32>
    %124 = tpu.reciprocal %123 {approx = true} : vector<32x136xf32> -> vector<32x136xf32>
    %125 = arith.mulf %121, %124 : vector<32x136xf32>
    %126 = arith.mulf %113, %125 : vector<32x136xf32>
    %c3_i32 = arith.constant 3 : i32
    %127 = arith.addi %1, %c3_i32 : i32
    %128 = tpu.iota {dimensions = array<i32: 1>} : vector<1x136xi32>
    %129 = vector.broadcast %127 : i32 to vector<1x136xi32>
    %130 = arith.addi %129, %128 : vector<1x136xi32>
    %c0_i32_49 = arith.constant 0 : i32
    %131 = vector.broadcast %c0_i32_49 : i32 to vector<1x136xi32>
    %132 = arith.cmpi sge, %130, %131 : vector<1x136xi32>
    %c16_i32_50 = arith.constant 16 : i32
    %133 = vector.broadcast %c16_i32_50 : i32 to vector<1x136xi32>
    %134 = arith.cmpi slt, %130, %133 : vector<1x136xi32>
    %135 = arith.andi %132, %134 : vector<1x136xi1>
    %cst_51 = arith.constant 0.000000e+00 : f32
    %136 = vector.shape_cast %135 : vector<1x136xi1> to vector<1x136xi1>
    %137 = vector.broadcast %136 : vector<1x136xi1> to vector<32x136xi1>
    %138 = vector.broadcast %cst_51 : f32 to vector<32x136xf32>
    %139 = arith.select %137, %126, %138 : vector<32x136xi1>, vector<32x136xf32>
    %140 = arith.truncf %139 : vector<32x136xf32> to vector<32x136xbf16>
    %c0_52 = arith.constant 0 : index
    %c0_53 = arith.constant 0 : index
    %141 = vector.load %arg10[%c0_52, %c0_53] : memref<32x32xbf16, #tpu.memory_space<vmem>>, vector<32x32xbf16>
    %cst_54 = arith.constant 0.000000e+00 : f32
    %142 = vector.broadcast %cst_54 : f32 to vector<32x136xf32>
    %cst_55 = arith.constant dense<0.000000e+00> : vector<32x136xf32>
    %143 = tpu.matmul %141, %140, %cst_55 {dimension_numbers = #tpu.dot_dimension_numbers<[1], [0], [0], [1], [0, 0, 1, 1], [], []>} : vector<32x32xbf16>, vector<32x136xbf16>, vector<32x136xf32> -> vector<32x136xf32>
    %144 = arith.addf %142, %143 : vector<32x136xf32>
    %c0_56 = arith.constant 0 : index
    %c0_57 = arith.constant 0 : index
    %145 = vector.load %arg11[%c0_56, %c0_57] : memref<32x1xf32, #tpu.memory_space<vmem>>, vector<32x1xf32>
    %146 = vector.broadcast %145 : vector<32x1xf32> to vector<32x136xf32>
    %147 = arith.addf %144, %146 : vector<32x136xf32>
    %148 = math.tanh %147 : vector<32x136xf32>
    %c3_i32_58 = arith.constant 3 : i32
    %149 = arith.addi %1, %c3_i32_58 : i32
    %150 = tpu.iota {dimensions = array<i32: 1>} : vector<1x136xi32>
    %151 = vector.broadcast %149 : i32 to vector<1x136xi32>
    %152 = arith.addi %151, %150 : vector<1x136xi32>
    %c0_i32_59 = arith.constant 0 : i32
    %153 = vector.broadcast %c0_i32_59 : i32 to vector<1x136xi32>
    %154 = arith.cmpi sge, %152, %153 : vector<1x136xi32>
    %c16_i32_60 = arith.constant 16 : i32
    %155 = vector.broadcast %c16_i32_60 : i32 to vector<1x136xi32>
    %156 = arith.cmpi slt, %152, %155 : vector<1x136xi32>
    %157 = arith.andi %154, %156 : vector<1x136xi1>
    %cst_61 = arith.constant 0.000000e+00 : f32
    %158 = vector.shape_cast %157 : vector<1x136xi1> to vector<1x136xi1>
    %159 = vector.broadcast %158 : vector<1x136xi1> to vector<32x136xi1>
    %160 = vector.broadcast %cst_61 : f32 to vector<32x136xf32>
    %161 = arith.select %159, %148, %160 : vector<32x136xi1>, vector<32x136xf32>
    %162 = arith.truncf %161 : vector<32x136xf32> to vector<32x136xbf16>
    %c0_62 = arith.constant 0 : index
    %c0_63 = arith.constant 0 : index
    %163 = vector.load %arg12[%c0_62, %c0_63] : memref<32x96xbf16, #tpu.memory_space<vmem>>, vector<32x96xbf16>
    %cst_64 = arith.constant 0.000000e+00 : f32
    %164 = vector.broadcast %cst_64 : f32 to vector<32x134xf32>
    %165 = vector.extract_strided_slice %163 {offsets = [0, 0], sizes = [32, 32], strides = [1, 1]} : vector<32x96xbf16> to vector<32x32xbf16>
    %166 = vector.extract_strided_slice %162 {offsets = [0, 0], sizes = [32, 134], strides = [1, 1]} : vector<32x136xbf16> to vector<32x134xbf16>
    %cst_65 = arith.constant dense<0.000000e+00> : vector<32x134xf32>
    %167 = tpu.matmul %165, %166, %cst_65 {dimension_numbers = #tpu.dot_dimension_numbers<[1], [0], [0], [1], [0, 0, 1, 1], [], []>} : vector<32x32xbf16>, vector<32x134xbf16>, vector<32x134xf32> -> vector<32x134xf32>
    %168 = arith.addf %164, %167 : vector<32x134xf32>
    %169 = vector.extract_strided_slice %163 {offsets = [0, 32], sizes = [32, 32], strides = [1, 1]} : vector<32x96xbf16> to vector<32x32xbf16>
    %170 = vector.extract_strided_slice %162 {offsets = [0, 1], sizes = [32, 134], strides = [1, 1]} : vector<32x136xbf16> to vector<32x134xbf16>
    %cst_66 = arith.constant dense<0.000000e+00> : vector<32x134xf32>
    %171 = tpu.matmul %169, %170, %cst_66 {dimension_numbers = #tpu.dot_dimension_numbers<[1], [0], [0], [1], [0, 0, 1, 1], [], []>} : vector<32x32xbf16>, vector<32x134xbf16>, vector<32x134xf32> -> vector<32x134xf32>
    %172 = arith.addf %168, %171 : vector<32x134xf32>
    %173 = vector.extract_strided_slice %163 {offsets = [0, 64], sizes = [32, 32], strides = [1, 1]} : vector<32x96xbf16> to vector<32x32xbf16>
    %174 = vector.extract_strided_slice %162 {offsets = [0, 2], sizes = [32, 134], strides = [1, 1]} : vector<32x136xbf16> to vector<32x134xbf16>
    %cst_67 = arith.constant dense<0.000000e+00> : vector<32x134xf32>
    %175 = tpu.matmul %173, %174, %cst_67 {dimension_numbers = #tpu.dot_dimension_numbers<[1], [0], [0], [1], [0, 0, 1, 1], [], []>} : vector<32x32xbf16>, vector<32x134xbf16>, vector<32x134xf32> -> vector<32x134xf32>
    %176 = arith.addf %172, %175 : vector<32x134xf32>
    %c0_68 = arith.constant 0 : index
    %c0_69 = arith.constant 0 : index
    %177 = vector.load %arg13[%c0_68, %c0_69] : memref<32x1xf32, #tpu.memory_space<vmem>>, vector<32x1xf32>
    %178 = vector.broadcast %177 : vector<32x1xf32> to vector<32x134xf32>
    %179 = arith.addf %176, %178 : vector<32x134xf32>
    %180 = math.absf %179 : vector<32x134xf32>
    %cst_70 = arith.constant 0.000000e+00 : f32
    %181 = vector.broadcast %cst_70 : f32 to vector<32x134xf32>
    %182 = arith.subf %181, %180 : vector<32x134xf32>
    %183 = math.exp %182 : vector<32x134xf32>
    %cst_71 = arith.constant 0.000000e+00 : f32
    %184 = vector.broadcast %cst_71 : f32 to vector<32x134xf32>
    %185 = arith.cmpf oge, %179, %184 : vector<32x134xf32>
    %cst_72 = arith.constant 1.000000e+00 : f32
    %186 = vector.broadcast %cst_72 : f32 to vector<32x134xf32>
    %187 = arith.select %185, %186, %183 : vector<32x134xi1>, vector<32x134xf32>
    %cst_73 = arith.constant 1.000000e+00 : f32
    %188 = vector.broadcast %cst_73 : f32 to vector<32x134xf32>
    %189 = arith.addf %188, %183 : vector<32x134xf32>
    %190 = tpu.reciprocal %189 {approx = true} : vector<32x134xf32> -> vector<32x134xf32>
    %191 = arith.mulf %187, %190 : vector<32x134xf32>
    %192 = arith.mulf %179, %191 : vector<32x134xf32>
    %c4_i32 = arith.constant 4 : i32
    %193 = arith.addi %1, %c4_i32 : i32
    %194 = tpu.iota {dimensions = array<i32: 1>} : vector<1x134xi32>
    %195 = vector.broadcast %193 : i32 to vector<1x134xi32>
    %196 = arith.addi %195, %194 : vector<1x134xi32>
    %c0_i32_74 = arith.constant 0 : i32
    %197 = vector.broadcast %c0_i32_74 : i32 to vector<1x134xi32>
    %198 = arith.cmpi sge, %196, %197 : vector<1x134xi32>
    %c16_i32_75 = arith.constant 16 : i32
    %199 = vector.broadcast %c16_i32_75 : i32 to vector<1x134xi32>
    %200 = arith.cmpi slt, %196, %199 : vector<1x134xi32>
    %201 = arith.andi %198, %200 : vector<1x134xi1>
    %cst_76 = arith.constant 0.000000e+00 : f32
    %202 = vector.shape_cast %201 : vector<1x134xi1> to vector<1x134xi1>
    %203 = vector.broadcast %202 : vector<1x134xi1> to vector<32x134xi1>
    %204 = vector.broadcast %cst_76 : f32 to vector<32x134xf32>
    %205 = arith.select %203, %192, %204 : vector<32x134xi1>, vector<32x134xf32>
    %206 = arith.truncf %205 : vector<32x134xf32> to vector<32x134xbf16>
    %c0_77 = arith.constant 0 : index
    %c0_78 = arith.constant 0 : index
    %207 = vector.load %arg14[%c0_77, %c0_78] : memref<64x96xbf16, #tpu.memory_space<vmem>>, vector<64x96xbf16>
    %cst_79 = arith.constant 0.000000e+00 : f32
    %208 = vector.broadcast %cst_79 : f32 to vector<64x132xf32>
    %209 = vector.extract_strided_slice %207 {offsets = [0, 0], sizes = [64, 32], strides = [1, 1]} : vector<64x96xbf16> to vector<64x32xbf16>
    %210 = vector.extract_strided_slice %206 {offsets = [0, 0], sizes = [32, 132], strides = [1, 1]} : vector<32x134xbf16> to vector<32x132xbf16>
    %cst_80 = arith.constant dense<0.000000e+00> : vector<64x132xf32>
    %211 = tpu.matmul %209, %210, %cst_80 {dimension_numbers = #tpu.dot_dimension_numbers<[1], [0], [0], [1], [0, 0, 1, 1], [], []>} : vector<64x32xbf16>, vector<32x132xbf16>, vector<64x132xf32> -> vector<64x132xf32>
    %212 = arith.addf %208, %211 : vector<64x132xf32>
    %213 = vector.extract_strided_slice %207 {offsets = [0, 32], sizes = [64, 32], strides = [1, 1]} : vector<64x96xbf16> to vector<64x32xbf16>
    %214 = vector.extract_strided_slice %206 {offsets = [0, 1], sizes = [32, 132], strides = [1, 1]} : vector<32x134xbf16> to vector<32x132xbf16>
    %cst_81 = arith.constant dense<0.000000e+00> : vector<64x132xf32>
    %215 = tpu.matmul %213, %214, %cst_81 {dimension_numbers = #tpu.dot_dimension_numbers<[1], [0], [0], [1], [0, 0, 1, 1], [], []>} : vector<64x32xbf16>, vector<32x132xbf16>, vector<64x132xf32> -> vector<64x132xf32>
    %216 = arith.addf %212, %215 : vector<64x132xf32>
    %217 = vector.extract_strided_slice %207 {offsets = [0, 64], sizes = [64, 32], strides = [1, 1]} : vector<64x96xbf16> to vector<64x32xbf16>
    %218 = vector.extract_strided_slice %206 {offsets = [0, 2], sizes = [32, 132], strides = [1, 1]} : vector<32x134xbf16> to vector<32x132xbf16>
    %cst_82 = arith.constant dense<0.000000e+00> : vector<64x132xf32>
    %219 = tpu.matmul %217, %218, %cst_82 {dimension_numbers = #tpu.dot_dimension_numbers<[1], [0], [0], [1], [0, 0, 1, 1], [], []>} : vector<64x32xbf16>, vector<32x132xbf16>, vector<64x132xf32> -> vector<64x132xf32>
    %220 = arith.addf %216, %219 : vector<64x132xf32>
    %c0_83 = arith.constant 0 : index
    %c0_84 = arith.constant 0 : index
    %221 = vector.load %arg15[%c0_83, %c0_84] : memref<64x1xf32, #tpu.memory_space<vmem>>, vector<64x1xf32>
    %222 = vector.broadcast %221 : vector<64x1xf32> to vector<64x132xf32>
    %223 = arith.addf %220, %222 : vector<64x132xf32>
    %224 = math.absf %223 : vector<64x132xf32>
    %cst_85 = arith.constant 0.000000e+00 : f32
    %225 = vector.broadcast %cst_85 : f32 to vector<64x132xf32>
    %226 = arith.subf %225, %224 : vector<64x132xf32>
    %227 = math.exp %226 : vector<64x132xf32>
    %cst_86 = arith.constant 0.000000e+00 : f32
    %228 = vector.broadcast %cst_86 : f32 to vector<64x132xf32>
    %229 = arith.cmpf oge, %223, %228 : vector<64x132xf32>
    %cst_87 = arith.constant 1.000000e+00 : f32
    %230 = vector.broadcast %cst_87 : f32 to vector<64x132xf32>
    %231 = arith.select %229, %230, %227 : vector<64x132xi1>, vector<64x132xf32>
    %cst_88 = arith.constant 1.000000e+00 : f32
    %232 = vector.broadcast %cst_88 : f32 to vector<64x132xf32>
    %233 = arith.addf %232, %227 : vector<64x132xf32>
    %234 = tpu.reciprocal %233 {approx = true} : vector<64x132xf32> -> vector<64x132xf32>
    %235 = arith.mulf %231, %234 : vector<64x132xf32>
    %236 = arith.mulf %223, %235 : vector<64x132xf32>
    %c5_i32 = arith.constant 5 : i32
    %237 = arith.addi %1, %c5_i32 : i32
    %238 = tpu.iota {dimensions = array<i32: 1>} : vector<1x132xi32>
    %239 = vector.broadcast %237 : i32 to vector<1x132xi32>
    %240 = arith.addi %239, %238 : vector<1x132xi32>
    %c0_i32_89 = arith.constant 0 : i32
    %241 = vector.broadcast %c0_i32_89 : i32 to vector<1x132xi32>
    %242 = arith.cmpi sge, %240, %241 : vector<1x132xi32>
    %c16_i32_90 = arith.constant 16 : i32
    %243 = vector.broadcast %c16_i32_90 : i32 to vector<1x132xi32>
    %244 = arith.cmpi slt, %240, %243 : vector<1x132xi32>
    %245 = arith.andi %242, %244 : vector<1x132xi1>
    %cst_91 = arith.constant 0.000000e+00 : f32
    %246 = vector.shape_cast %245 : vector<1x132xi1> to vector<1x132xi1>
    %247 = vector.broadcast %246 : vector<1x132xi1> to vector<64x132xi1>
    %248 = vector.broadcast %cst_91 : f32 to vector<64x132xf32>
    %249 = arith.select %247, %236, %248 : vector<64x132xi1>, vector<64x132xf32>
    %250 = arith.truncf %249 : vector<64x132xf32> to vector<64x132xbf16>
    %c0_92 = arith.constant 0 : index
    %c0_93 = arith.constant 0 : index
    %251 = vector.load %arg16[%c0_92, %c0_93] : memref<64x192xbf16, #tpu.memory_space<vmem>>, vector<64x192xbf16>
    %cst_94 = arith.constant 0.000000e+00 : f32
    %252 = vector.broadcast %cst_94 : f32 to vector<64x130xf32>
    %253 = vector.extract_strided_slice %251 {offsets = [0, 0], sizes = [64, 64], strides = [1, 1]} : vector<64x192xbf16> to vector<64x64xbf16>
    %254 = vector.extract_strided_slice %250 {offsets = [0, 0], sizes = [64, 130], strides = [1, 1]} : vector<64x132xbf16> to vector<64x130xbf16>
    %cst_95 = arith.constant dense<0.000000e+00> : vector<64x130xf32>
    %255 = tpu.matmul %253, %254, %cst_95 {dimension_numbers = #tpu.dot_dimension_numbers<[1], [0], [0], [1], [0, 0, 1, 1], [], []>} : vector<64x64xbf16>, vector<64x130xbf16>, vector<64x130xf32> -> vector<64x130xf32>
    %256 = arith.addf %252, %255 : vector<64x130xf32>
    %257 = vector.extract_strided_slice %251 {offsets = [0, 64], sizes = [64, 64], strides = [1, 1]} : vector<64x192xbf16> to vector<64x64xbf16>
    %258 = vector.extract_strided_slice %250 {offsets = [0, 1], sizes = [64, 130], strides = [1, 1]} : vector<64x132xbf16> to vector<64x130xbf16>
    %cst_96 = arith.constant dense<0.000000e+00> : vector<64x130xf32>
    %259 = tpu.matmul %257, %258, %cst_96 {dimension_numbers = #tpu.dot_dimension_numbers<[1], [0], [0], [1], [0, 0, 1, 1], [], []>} : vector<64x64xbf16>, vector<64x130xbf16>, vector<64x130xf32> -> vector<64x130xf32>
    %260 = arith.addf %256, %259 : vector<64x130xf32>
    %261 = vector.extract_strided_slice %251 {offsets = [0, 128], sizes = [64, 64], strides = [1, 1]} : vector<64x192xbf16> to vector<64x64xbf16>
    %262 = vector.extract_strided_slice %250 {offsets = [0, 2], sizes = [64, 130], strides = [1, 1]} : vector<64x132xbf16> to vector<64x130xbf16>
    %cst_97 = arith.constant dense<0.000000e+00> : vector<64x130xf32>
    %263 = tpu.matmul %261, %262, %cst_97 {dimension_numbers = #tpu.dot_dimension_numbers<[1], [0], [0], [1], [0, 0, 1, 1], [], []>} : vector<64x64xbf16>, vector<64x130xbf16>, vector<64x130xf32> -> vector<64x130xf32>
    %264 = arith.addf %260, %263 : vector<64x130xf32>
    %c0_98 = arith.constant 0 : index
    %c0_99 = arith.constant 0 : index
    %265 = vector.load %arg17[%c0_98, %c0_99] : memref<64x1xf32, #tpu.memory_space<vmem>>, vector<64x1xf32>
    %266 = vector.broadcast %265 : vector<64x1xf32> to vector<64x130xf32>
    %267 = arith.addf %264, %266 : vector<64x130xf32>
    %268 = math.absf %267 : vector<64x130xf32>
    %cst_100 = arith.constant 0.000000e+00 : f32
    %269 = vector.broadcast %cst_100 : f32 to vector<64x130xf32>
    %270 = arith.subf %269, %268 : vector<64x130xf32>
    %271 = math.exp %270 : vector<64x130xf32>
    %cst_101 = arith.constant 0.000000e+00 : f32
    %272 = vector.broadcast %cst_101 : f32 to vector<64x130xf32>
    %273 = arith.cmpf oge, %267, %272 : vector<64x130xf32>
    %cst_102 = arith.constant 1.000000e+00 : f32
    %274 = vector.broadcast %cst_102 : f32 to vector<64x130xf32>
    %275 = arith.select %273, %274, %271 : vector<64x130xi1>, vector<64x130xf32>
    %cst_103 = arith.constant 1.000000e+00 : f32
    %276 = vector.broadcast %cst_103 : f32 to vector<64x130xf32>
    %277 = arith.addf %276, %271 : vector<64x130xf32>
    %278 = tpu.reciprocal %277 {approx = true} : vector<64x130xf32> -> vector<64x130xf32>
    %279 = arith.mulf %275, %278 : vector<64x130xf32>
    %280 = arith.mulf %267, %279 : vector<64x130xf32>
    %c6_i32 = arith.constant 6 : i32
    %281 = arith.addi %1, %c6_i32 : i32
    %282 = tpu.iota {dimensions = array<i32: 1>} : vector<1x130xi32>
    %283 = vector.broadcast %281 : i32 to vector<1x130xi32>
    %284 = arith.addi %283, %282 : vector<1x130xi32>
    %c0_i32_104 = arith.constant 0 : i32
    %285 = vector.broadcast %c0_i32_104 : i32 to vector<1x130xi32>
    %286 = arith.cmpi sge, %284, %285 : vector<1x130xi32>
    %c16_i32_105 = arith.constant 16 : i32
    %287 = vector.broadcast %c16_i32_105 : i32 to vector<1x130xi32>
    %288 = arith.cmpi slt, %284, %287 : vector<1x130xi32>
    %289 = arith.andi %286, %288 : vector<1x130xi1>
    %cst_106 = arith.constant 0.000000e+00 : f32
    %290 = vector.shape_cast %289 : vector<1x130xi1> to vector<1x130xi1>
    %291 = vector.broadcast %290 : vector<1x130xi1> to vector<64x130xi1>
    %292 = vector.broadcast %cst_106 : f32 to vector<64x130xf32>
    %293 = arith.select %291, %280, %292 : vector<64x130xi1>, vector<64x130xf32>
    %294 = arith.truncf %293 : vector<64x130xf32> to vector<64x130xbf16>
    %c0_107 = arith.constant 0 : index
    %c0_108 = arith.constant 0 : index
    %295 = vector.load %arg18[%c0_107, %c0_108] : memref<8x192xbf16, #tpu.memory_space<vmem>>, vector<8x192xbf16>
    %cst_109 = arith.constant 0.000000e+00 : f32
    %296 = vector.broadcast %cst_109 : f32 to vector<8x128xf32>
    %297 = vector.extract_strided_slice %295 {offsets = [0, 0], sizes = [8, 64], strides = [1, 1]} : vector<8x192xbf16> to vector<8x64xbf16>
    %298 = vector.extract_strided_slice %294 {offsets = [0, 0], sizes = [64, 128], strides = [1, 1]} : vector<64x130xbf16> to vector<64x128xbf16>
    %cst_110 = arith.constant dense<0.000000e+00> : vector<8x128xf32>
    %299 = tpu.matmul %297, %298, %cst_110 {dimension_numbers = #tpu.dot_dimension_numbers<[1], [0], [0], [1], [0, 0, 1, 1], [], []>} : vector<8x64xbf16>, vector<64x128xbf16>, vector<8x128xf32> -> vector<8x128xf32>
    %300 = arith.addf %296, %299 : vector<8x128xf32>
    %301 = vector.extract_strided_slice %295 {offsets = [0, 64], sizes = [8, 64], strides = [1, 1]} : vector<8x192xbf16> to vector<8x64xbf16>
    %302 = vector.extract_strided_slice %294 {offsets = [0, 1], sizes = [64, 128], strides = [1, 1]} : vector<64x130xbf16> to vector<64x128xbf16>
    %cst_111 = arith.constant dense<0.000000e+00> : vector<8x128xf32>
    %303 = tpu.matmul %301, %302, %cst_111 {dimension_numbers = #tpu.dot_dimension_numbers<[1], [0], [0], [1], [0, 0, 1, 1], [], []>} : vector<8x64xbf16>, vector<64x128xbf16>, vector<8x128xf32> -> vector<8x128xf32>
    %304 = arith.addf %300, %303 : vector<8x128xf32>
    %305 = vector.extract_strided_slice %295 {offsets = [0, 128], sizes = [8, 64], strides = [1, 1]} : vector<8x192xbf16> to vector<8x64xbf16>
    %306 = vector.extract_strided_slice %294 {offsets = [0, 2], sizes = [64, 128], strides = [1, 1]} : vector<64x130xbf16> to vector<64x128xbf16>
    %cst_112 = arith.constant dense<0.000000e+00> : vector<8x128xf32>
    %307 = tpu.matmul %305, %306, %cst_112 {dimension_numbers = #tpu.dot_dimension_numbers<[1], [0], [0], [1], [0, 0, 1, 1], [], []>} : vector<8x64xbf16>, vector<64x128xbf16>, vector<8x128xf32> -> vector<8x128xf32>
    %308 = arith.addf %304, %307 : vector<8x128xf32>
    %c0_113 = arith.constant 0 : index
    %c0_114 = arith.constant 0 : index
    %309 = vector.load %arg19[%c0_113, %c0_114] : memref<8x1xf32, #tpu.memory_space<vmem>>, vector<8x1xf32>
    %310 = vector.broadcast %309 : vector<8x1xf32> to vector<8x128xf32>
    %311 = arith.addf %308, %310 : vector<8x128xf32>
    %c0_115 = arith.constant 0 : index
    %c0_116 = arith.constant 0 : index
    %c0_117 = arith.constant 0 : index
    %312 = vector.load %arg20[%c0_115, %c0_116, %c0_117] : memref<1x8x128xf32, #tpu.memory_space<vmem>>, vector<1x8x128xf32>
    %313 = vector.shape_cast %312 : vector<1x8x128xf32> to vector<8x128xf32>
    %314 = vector.shape_cast %311 : vector<8x128xf32> to vector<1x8x128xf32>
    tpu.vector_store %arg20[%c0_115, %c0_116, %c0_117], %314 {strides = array<i32>} : memref<1x8x128xf32, #tpu.memory_space<vmem>>, vector<1x8x128xf32>,
    return
  }
  func.func @transform_0(%arg0: i32, %arg1: i32) -> (i32, i32, i32) {
    %c0_i32 = arith.constant 0 : i32
    %c0_i32_0 = arith.constant 0 : i32
    return %arg0, %c0_i32, %arg1 : i32, i32, i32
  }
  func.func @transform_1(%arg0: i32, %arg1: i32) -> (i32, i32, i32) {
    %c1_i32 = arith.constant 1 : i32
    %0 = arith.addi %arg1, %c1_i32 : i32
    %c1_i32_0 = arith.constant 1 : i32
    %1 = arith.muli %0, %c1_i32_0 : i32
    %c0_i32 = arith.constant 0 : i32
    %c0_i32_1 = arith.constant 0 : i32
    return %arg0, %c0_i32, %1 : i32, i32, i32
  }
  func.func @transform_2(%arg0: i32, %arg1: i32) -> (i32, i32) {
    %c0_i32 = arith.constant 0 : i32
    %c0_i32_0 = arith.constant 0 : i32
    %c0_i32_1 = arith.constant 0 : i32
    return %c0_i32, %c0_i32_0 : i32, i32
  }
  func.func @transform_3(%arg0: i32, %arg1: i32) -> (i32, i32) {
    %c0_i32 = arith.constant 0 : i32
    %c0_i32_0 = arith.constant 0 : i32
    %c0_i32_1 = arith.constant 0 : i32
    return %c0_i32, %c0_i32_0 : i32, i32
  }
  func.func @transform_4(%arg0: i32, %arg1: i32) -> (i32, i32) {
    %c0_i32 = arith.constant 0 : i32
    %c0_i32_0 = arith.constant 0 : i32
    %c0_i32_1 = arith.constant 0 : i32
    return %c0_i32, %c0_i32_0 : i32, i32
  }
  func.func @transform_5(%arg0: i32, %arg1: i32) -> (i32, i32) {
    %c0_i32 = arith.constant 0 : i32
    %c0_i32_0 = arith.constant 0 : i32
    %c0_i32_1 = arith.constant 0 : i32
    return %c0_i32, %c0_i32_0 : i32, i32
  }
  func.func @transform_6(%arg0: i32, %arg1: i32) -> (i32, i32) {
    %c0_i32 = arith.constant 0 : i32
    %c0_i32_0 = arith.constant 0 : i32
    %c0_i32_1 = arith.constant 0 : i32
    return %c0_i32, %c0_i32_0 : i32, i32
  }
  func.func @transform_7(%arg0: i32, %arg1: i32) -> (i32, i32) {
    %c0_i32 = arith.constant 0 : i32
    %c0_i32_0 = arith.constant 0 : i32
    %c0_i32_1 = arith.constant 0 : i32
    return %c0_i32, %c0_i32_0 : i32, i32
  }
  func.func @transform_8(%arg0: i32, %arg1: i32) -> (i32, i32) {
    %c0_i32 = arith.constant 0 : i32
    %c0_i32_0 = arith.constant 0 : i32
    %c0_i32_1 = arith.constant 0 : i32
    return %c0_i32, %c0_i32_0 : i32, i32
  }
  func.func @transform_9(%arg0: i32, %arg1: i32) -> (i32, i32) {
    %c0_i32 = arith.constant 0 : i32
    %c0_i32_0 = arith.constant 0 : i32
    %c0_i32_1 = arith.constant 0 : i32
    return %c0_i32, %c0_i32_0 : i32, i32
  }
  func.func @transform_10(%arg0: i32, %arg1: i32) -> (i32, i32) {
    %c0_i32 = arith.constant 0 : i32
    %c0_i32_0 = arith.constant 0 : i32
    %c0_i32_1 = arith.constant 0 : i32
    return %c0_i32, %c0_i32_0 : i32, i32
  }
  func.func @transform_11(%arg0: i32, %arg1: i32) -> (i32, i32) {
    %c0_i32 = arith.constant 0 : i32
    %c0_i32_0 = arith.constant 0 : i32
    %c0_i32_1 = arith.constant 0 : i32
    return %c0_i32, %c0_i32_0 : i32, i32
  }
  func.func @transform_12(%arg0: i32, %arg1: i32) -> (i32, i32) {
    %c0_i32 = arith.constant 0 : i32
    %c0_i32_0 = arith.constant 0 : i32
    %c0_i32_1 = arith.constant 0 : i32
    return %c0_i32, %c0_i32_0 : i32, i32
  }
  func.func @transform_13(%arg0: i32, %arg1: i32) -> (i32, i32) {
    %c0_i32 = arith.constant 0 : i32
    %c0_i32_0 = arith.constant 0 : i32
    %c0_i32_1 = arith.constant 0 : i32
    return %c0_i32, %c0_i32_0 : i32, i32
  }
  func.func @transform_14(%arg0: i32, %arg1: i32) -> (i32, i32) {
    %c0_i32 = arith.constant 0 : i32
    %c0_i32_0 = arith.constant 0 : i32
    %c0_i32_1 = arith.constant 0 : i32
    return %c0_i32, %c0_i32_0 : i32, i32
  }
  func.func @transform_15(%arg0: i32, %arg1: i32) -> (i32, i32) {
    %c0_i32 = arith.constant 0 : i32
    %c0_i32_0 = arith.constant 0 : i32
    %c0_i32_1 = arith.constant 0 : i32
    return %c0_i32, %c0_i32_0 : i32, i32
  }
  func.func @transform_16(%arg0: i32, %arg1: i32) -> (i32, i32) {
    %c0_i32 = arith.constant 0 : i32
    %c0_i32_0 = arith.constant 0 : i32
    %c0_i32_1 = arith.constant 0 : i32
    return %c0_i32, %c0_i32_0 : i32, i32
  }
  func.func @transform_17(%arg0: i32, %arg1: i32) -> (i32, i32) {
    %c0_i32 = arith.constant 0 : i32
    %c0_i32_0 = arith.constant 0 : i32
    %c0_i32_1 = arith.constant 0 : i32
    return %c0_i32, %c0_i32_0 : i32, i32
  }
  func.func @transform_18(%arg0: i32, %arg1: i32) -> (i32, i32, i32) {
    %c0_i32 = arith.constant 0 : i32
    %c0_i32_0 = arith.constant 0 : i32
    return %arg0, %c0_i32, %arg1 : i32, i32, i32
  }
}

</mosaic_0001>

<bundles_post_ra>
// kernel: tile.31
= control target key start
LH: loop header
LB: loop body
LE: loop exit
PB: predicated region body
PF: predicated region fallthrough
CT: control target
= control target key end

     0   :  { %s22_s0 = inlined_call_operand.vmem [shape: f32[16], index: 0, kind: input, shape index: {}]   ;;  %s23_s1 = inlined_call_operand.vmem [shape: f32[4,16], index: 1, kind: output, shape index: {}]  }
   0x1   :  { %v4_v0 = vld [vmem:[%s22_s0] ss:$0 sm:$0xff] }
   0x2   :  { %5 = vst [vmem:[%s23_s1] sm:$0xf] %v4_v0 }

// kernel: tile.0
= control target key start
LH: loop header
LB: loop body
LE: loop exit
PB: predicated region body
PF: predicated region fallthrough
CT: control target
= control target key end

     0   :  { %s176_s8 = smov 125   ;;  %s177_s9 = smov 126   ;;  %vm7_vm0 = vcmask 7168   ;;  %s331_s0 = inlined_call_operand.vmem [shape: f32[4,16], index: 0, kind: input, shape index: {}]   ;;  %s332_s1 = inlined_call_operand.vmem [shape: f32[64,1], index: 1, kind: output, shape index: {}]  }
   0x1   :  { %v4_v0 = vld [vmem:[%s331_s0] sm:$0xf]  ;;  %s175_s0 = smov 127   ;;  %s178_s10 = smov 124  }
   0x2   :  { %5 = vst [vmem:[#allocation0] sm:$0xf] %v4_v0  ;;  %s179_s11 = smov 123   ;;  %s180_s12 = smov 122  }
   0x3   :  { %s181_s13 = smov 121   ;;  %s182_s14 = smov 120  }
   0x4   :  { %s183_s19 = smov 119   ;;  %s184_s20 = smov 118  }
   0x5   :  { %s185_s21 = smov 117   ;;  %s186_s22 = smov 116  }
   0x6   :  { %s187_s23 = smov 115   ;;  %s188_s24 = smov 114  }
   0x7   :  { %s189_s25 = smov 113  }
   0x9   :  { %v10_v1 = vld [vmem:[#allocation0] sm:$0xf]  }
   0xa   :  { %v26_v2 = vld [vmem:[#allocation0] sm:$0xf]   ;;  %11 = vrot.lane.b32.xlu0 %v10_v1, %s175_s0 }
   0xb   :  { %27 = vrot.lane.b32.xlu1 %v26_v2, %s176_s8  ;;  %v18_v3 = vld [vmem:[#allocation0] sm:$0xf]  }
   0xc   :  { %v34_v4 = vld [vmem:[#allocation0] sm:$0xf]  }
   0xd   :  { %v42_v5 = vld [vmem:[#allocation0] sm:$0xf]  }
   0xe   :  { %19 = vrot.lane.b32.xlu0 %v18_v3, %s177_s9  ;;  %v50_v6 = vld [vmem:[#allocation0] sm:$0xf]  }
   0xf   :  { %35 = vrot.lane.b32.xlu1 %v34_v4, %s178_s10  ;;  %v58_v7 = vld [vmem:[#allocation0] sm:$0xf]  }
  0x10   :  { %v66_v8 = vld [vmem:[#allocation0] sm:$0xf]  }
  0x11   :  { %v74_v9 = vld [vmem:[#allocation0] sm:$0xf]  }
  0x12   :  { %43 = vrot.lane.b32.xlu0 %v42_v5, %s179_s11  ;;  %v82_v10 = vld [vmem:[#allocation0] sm:$0xf]  }
  0x13   :  { %51 = vrot.lane.b32.xlu1 %v50_v6, %s180_s12  ;;  %v6_v11 = vld [vmem:[#allocation0] sm:$0xf]  }
  0x14   :  { %8 = vst.msk [vmem:[%s332_s1] ss:$16 sm:$0x3] %vm7_vm0, %v6_v11   ;;  %9 = vst.msk [vmem:[%s332_s1] ss:$16 sm:$0xc] %vm7_vm0, %v6_v11  }
  0x15   :  { %v90_v12 = vld [vmem:[#allocation0] sm:$0xf]  }
  0x16   :  { %59 = vrot.lane.b32.xlu0 %v58_v7, %s181_s13  ;;  %v98_v13 = vld [vmem:[#allocation0] sm:$0xf]  }
  0x17   :  { %67 = vrot.lane.b32.xlu1 %v66_v8, %s182_s14  ;;  %v106_v14 = vld [vmem:[#allocation0] sm:$0xf]  }
  0x18   :  { %v114_v15 = vld [vmem:[#allocation0] sm:$0xf]  }
  0x19   :  { %v122_v16 = vld [vmem:[#allocation0] sm:$0xf]  }
  0x1a   :  { %75 = vrot.lane.b32.xlu0 %v74_v9, %s183_s19 }
  0x1b   :  { %83 = vrot.lane.b32.xlu1 %v82_v10, %s184_s20 }
  0x1e   :  { %91 = vrot.lane.b32.xlu0 %v90_v12, %s185_s21 }
  0x1f   :  { %99 = vrot.lane.b32.xlu1 %v98_v13, %s186_s22 }
  0x22   :  { %107 = vrot.lane.b32.xlu0 %v106_v14, %s187_s23 }
  0x23   :  { %115 = vrot.lane.b32.xlu1 %v114_v15, %s188_s24 }
  0x26   :  { %123 = vrot.lane.b32.xlu0 %v122_v16, %s189_s25 }
  0x7c   :  { %v12_v17 = vpop.permute.xlu0 %11  }
  0x7d   :  { %v28_v18 = vpop.permute.xlu1 %27   ;;  %130 = vst.msk [vmem:[%s332_s1 + $0x1] ss:$16 sm:$0x3] %vm7_vm0, %v12_v17   ;;  %131 = vst.msk [vmem:[%s332_s1 + $0x1] ss:$16 sm:$0xc] %vm7_vm0, %v12_v17  }
  0x7e   :  { %134 = vst.msk [vmem:[%s332_s1 + $0x3] ss:$16 sm:$0x3] %vm7_vm0, %v28_v18   ;;  %135 = vst.msk [vmem:[%s332_s1 + $0x3] ss:$16 sm:$0xc] %vm7_vm0, %v28_v18  }
  0x80   :  { %v20_v19 = vpop.permute.xlu0 %19  }
  0x81   :  { %v36_v20 = vpop.permute.xlu1 %35   ;;  %132 = vst.msk [vmem:[%s332_s1 + $0x2] ss:$16 sm:$0x3] %vm7_vm0, %v20_v19   ;;  %133 = vst.msk [vmem:[%s332_s1 + $0x2] ss:$16 sm:$0xc] %vm7_vm0, %v20_v19  }
  0x82   :  { %136 = vst.msk [vmem:[%s332_s1 + $0x4] ss:$16 sm:$0x3] %vm7_vm0, %v36_v20   ;;  %137 = vst.msk [vmem:[%s332_s1 + $0x4] ss:$16 sm:$0xc] %vm7_vm0, %v36_v20  }
  0x84   :  { %v44_v21 = vpop.permute.xlu0 %43  }
  0x85   :  { %v52_v22 = vpop.permute.xlu1 %51   ;;  %138 = vst.msk [vmem:[%s332_s1 + $0x5] ss:$16 sm:$0x3] %vm7_vm0, %v44_v21   ;;  %139 = vst.msk [vmem:[%s332_s1 + $0x5] ss:$16 sm:$0xc] %vm7_vm0, %v44_v21  }
  0x86   :  { %140 = vst.msk [vmem:[%s332_s1 + $0x6] ss:$16 sm:$0x3] %vm7_vm0, %v52_v22   ;;  %141 = vst.msk [vmem:[%s332_s1 + $0x6] ss:$16 sm:$0xc] %vm7_vm0, %v52_v22  }
  0x88   :  { %v60_v23 = vpop.permute.xlu0 %59  }
  0x89   :  { %v68_v24 = vpop.permute.xlu1 %67   ;;  %142 = vst.msk [vmem:[%s332_s1 + $0x7] ss:$16 sm:$0x3] %vm7_vm0, %v60_v23   ;;  %143 = vst.msk [vmem:[%s332_s1 + $0x7] ss:$16 sm:$0xc] %vm7_vm0, %v60_v23  }
  0x8a   :  { %144 = vst.msk [vmem:[%s332_s1 + $0x8] ss:$16 sm:$0x3] %vm7_vm0, %v68_v24   ;;  %145 = vst.msk [vmem:[%s332_s1 + $0x8] ss:$16 sm:$0xc] %vm7_vm0, %v68_v24  }
  0x8c   :  { %v76_v25 = vpop.permute.xlu0 %75  }
  0x8d   :  { %v84_v26 = vpop.permute.xlu1 %83   ;;  %146 = vst.msk [vmem:[%s332_s1 + $0x9] ss:$16 sm:$0x3] %vm7_vm0, %v76_v25   ;;  %147 = vst.msk [vmem:[%s332_s1 + $0x9] ss:$16 sm:$0xc] %vm7_vm0, %v76_v25  }
  0x8e   :  { %148 = vst.msk [vmem:[%s332_s1 + $0xa] ss:$16 sm:$0x3] %vm7_vm0, %v84_v26   ;;  %149 = vst.msk [vmem:[%s332_s1 + $0xa] ss:$16 sm:$0xc] %vm7_vm0, %v84_v26  }
  0x90   :  { %v92_v27 = vpop.permute.xlu0 %91  }
  0x91   :  { %v100_v28 = vpop.permute.xlu1 %99   ;;  %150 = vst.msk [vmem:[%s332_s1 + $0xb] ss:$16 sm:$0x3] %vm7_vm0, %v92_v27   ;;  %151 = vst.msk [vmem:[%s332_s1 + $0xb] ss:$16 sm:$0xc] %vm7_vm0, %v92_v27  }
  0x92   :  { %152 = vst.msk [vmem:[%s332_s1 + $0xc] ss:$16 sm:$0x3] %vm7_vm0, %v100_v28   ;;  %153 = vst.msk [vmem:[%s332_s1 + $0xc] ss:$16 sm:$0xc] %vm7_vm0, %v100_v28  }
  0x94   :  { %v108_v29 = vpop.permute.xlu0 %107  }
  0x95   :  { %v116_v30 = vpop.permute.xlu1 %115   ;;  %154 = vst.msk [vmem:[%s332_s1 + $0xd] ss:$16 sm:$0x3] %vm7_vm0, %v108_v29   ;;  %155 = vst.msk [vmem:[%s332_s1 + $0xd] ss:$16 sm:$0xc] %vm7_vm0, %v108_v29  }
  0x96   :  { %156 = vst.msk [vmem:[%s332_s1 + $0xe] ss:$16 sm:$0x3] %vm7_vm0, %v116_v30   ;;  %157 = vst.msk [vmem:[%s332_s1 + $0xe] ss:$16 sm:$0xc] %vm7_vm0, %v116_v30  }
  0x98   :  { %v124_v31 = vpop.permute.xlu0 %123  }
  0x99   :  { %158 = vst.msk [vmem:[%s332_s1 + $0xf] ss:$16 sm:$0x3] %vm7_vm0, %v124_v31   ;;  %159 = vst.msk [vmem:[%s332_s1 + $0xf] ss:$16 sm:$0xc] %vm7_vm0, %v124_v31  }

// kernel: tile.36
= control target key start
LH: loop header
LB: loop body
LE: loop exit
PB: predicated region body
PF: predicated region fallthrough
CT: control target
= control target key end

     0   :  { %s22_s0 = inlined_call_operand.vmem [shape: f32[32], index: 0, kind: input, shape index: {}]   ;;  %s23_s1 = inlined_call_operand.vmem [shape: f32[2,32], index: 1, kind: output, shape index: {}]  }
   0x1   :  { %v4_v0 = vld [vmem:[%s22_s0] ss:$0 sm:$0xff] }
   0x2   :  { %5 = vst [vmem:[%s23_s1] sm:$0x3] %v4_v0 }

// kernel: tile.1
= control target key start
LH: loop header
LB: loop body
LE: loop exit
PB: predicated region body
PF: predicated region fallthrough
CT: control target
= control target key end

     0   :  { %s354_s8 = smov 125   ;;  %s355_s9 = smov 126   ;;  %vm7_vm0 = vcmask 7168   ;;  %s653_s0 = inlined_call_operand.vmem [shape: f32[2,32], index: 0, kind: input, shape index: {}]   ;;  %s654_s1 = inlined_call_operand.vmem [shape: f32[64,1], index: 1, kind: output, shape index: {}]  }
   0x1   :  { %v4_v0 = vld [vmem:[%s653_s0] sm:$0x3]  ;;  %s353_s0 = smov 127   ;;  %s356_s10 = smov 124  }
   0x2   :  { %5 = vst [vmem:[#allocation0] sm:$0x3] %v4_v0  ;;  %s357_s11 = smov 123   ;;  %s358_s12 = smov 122  }
   0x3   :  { %s359_s13 = smov 121   ;;  %s360_s14 = smov 120  }
   0x4   :  { %s361_s15 = smov 119   ;;  %s362_s16 = smov 118  }
   0x5   :  { %s363_s17 = smov 117   ;;  %s364_s18 = smov 116  }
   0x6   :  { %s365_s19 = smov 115   ;;  %s366_s20 = smov 114  }
   0x7   :  { %s367_s21 = smov 113   ;;  %s368_s22 = smov 112  }
   0x8   :  { %s369_s23 = smov 111   ;;  %s370_s24 = smov 110  }
   0x9   :  { %v11_v1 = vld [vmem:[#allocation0] sm:$0x3]   ;;  %s371_s25 = smov 109   ;;  %s372_s26 = smov 108  }
   0xa   :  { %v27_v2 = vld [vmem:[#allocation0] sm:$0x3]   ;;  %12 = vrot.lane.b32.xlu0 %v11_v1, %s353_s0  ;;  %s373_s27 = smov 107   ;;  %s374_s28 = smov 106  }
   0xb   :  { %28 = vrot.lane.b32.xlu1 %v27_v2, %s354_s8  ;;  %v19_v3 = vld [vmem:[#allocation0] sm:$0x3]   ;;  %s375_s29 = smov 105   ;;  %s376_s30 = smov 104  }
   0xc   :  { %v35_v4 = vld [vmem:[#allocation0] sm:$0x3]   ;;  %s377_s6 = smov 103   ;;  %s378_s7 = smov 102  }
   0xd   :  { %v43_v5 = vld [vmem:[#allocation0] sm:$0x3]   ;;  %s379_s0 = smov 101   ;;  %s380_s8 = smov 100  }
   0xe   :  { %20 = vrot.lane.b32.xlu0 %v19_v3, %s355_s9  ;;  %v51_v6 = vld [vmem:[#allocation0] sm:$0x3]   ;;  %s381_s9 = smov 99  }
   0xf   :  { %36 = vrot.lane.b32.xlu1 %v35_v4, %s356_s10  ;;  %v59_v7 = vld [vmem:[#allocation0] sm:$0x3]   ;;  %s382_s10 = smov 98  }
  0x10   :  { %v67_v8 = vld [vmem:[#allocation0] sm:$0x3]  }
  0x11   :  { %v75_v9 = vld [vmem:[#allocation0] sm:$0x3]  }
  0x12   :  { %44 = vrot.lane.b32.xlu0 %v43_v5, %s357_s11  ;;  %v83_v10 = vld [vmem:[#allocation0] sm:$0x3]   ;;  %s383_s11 = smov 97  }
  0x13   :  { %52 = vrot.lane.b32.xlu1 %v51_v6, %s358_s12  ;;  %v91_v11 = vld [vmem:[#allocation0] sm:$0x3]  }
  0x14   :  { %v99_v12 = vld [vmem:[#allocation0] sm:$0x3]  }
  0x15   :  { %v107_v13 = vld [vmem:[#allocation0] sm:$0x3]  }
  0x16   :  { %60 = vrot.lane.b32.xlu0 %v59_v7, %s359_s13  ;;  %v115_v14 = vld [vmem:[#allocation0] sm:$0x3]  }
  0x17   :  { %68 = vrot.lane.b32.xlu1 %v67_v8, %s360_s14  ;;  %v123_v15 = vld [vmem:[#allocation0] sm:$0x3]  }
  0x18   :  { %v131_v16 = vld [vmem:[#allocation0] sm:$0x3]  }
  0x19   :  { %v139_v17 = vld [vmem:[#allocation0] sm:$0x3]  }
  0x1a   :  { %76 = vrot.lane.b32.xlu0 %v75_v9, %s361_s15  ;;  %v147_v18 = vld [vmem:[#allocation0] sm:$0x3]  }
  0x1b   :  { %84 = vrot.lane.b32.xlu1 %v83_v10, %s362_s16  ;;  %v155_v19 = vld [vmem:[#allocation0] sm:$0x3]  }
  0x1c   :  { %v163_v20 = vld [vmem:[#allocation0] sm:$0x3]  }
  0x1d   :  { %v171_v21 = vld [vmem:[#allocation0] sm:$0x3]  }
  0x1e   :  { %92 = vrot.lane.b32.xlu0 %v91_v11, %s363_s17  ;;  %v179_v22 = vld [vmem:[#allocation0] sm:$0x3]  }
  0x1f   :  { %100 = vrot.lane.b32.xlu1 %v99_v12, %s364_s18  ;;  %v187_v23 = vld [vmem:[#allocation0] sm:$0x3]  }
  0x20   :  { %v195_v24 = vld [vmem:[#allocation0] sm:$0x3]  }
  0x21   :  { %v203_v25 = vld [vmem:[#allocation0] sm:$0x3]  }
  0x22   :  { %108 = vrot.lane.b32.xlu0 %v107_v13, %s365_s19  ;;  %v211_v26 = vld [vmem:[#allocation0] sm:$0x3]  }
  0x23   :  { %116 = vrot.lane.b32.xlu1 %v115_v14, %s366_s20  ;;  %v6_v27 = vld [vmem:[#allocation0] sm:$0x3]  }
  0x24   :  { %8 = vst.msk [vmem:[%s654_s1] sm:$0x1] %vm7_vm0, %v6_v27   ;;  %259 = vst.msk [vmem:[%s654_s1 + $0x1f] sm:$0x2] %vm7_vm0, %v6_v27   ;;  %v219_v28 = vld [vmem:[#allocation0] sm:$0x3]  }
  0x25   :  { %v227_v29 = vld [vmem:[#allocation0] sm:$0x3]  }
  0x26   :  { %124 = vrot.lane.b32.xlu0 %v123_v15, %s367_s21  ;;  %v235_v30 = vld [vmem:[#allocation0] sm:$0x3]  }
  0x27   :  { %132 = vrot.lane.b32.xlu1 %v131_v16, %s368_s22  ;;  %v243_v31 = vld [vmem:[#allocation0] sm:$0x3]  }
  0x28   :  { %v251_v32 = vld [vmem:[#allocation0] sm:$0x3]  }
  0x2a   :  { %140 = vrot.lane.b32.xlu0 %v139_v17, %s369_s23 }
  0x2b   :  { %148 = vrot.lane.b32.xlu1 %v147_v18, %s370_s24 }
  0x2e   :  { %156 = vrot.lane.b32.xlu0 %v155_v19, %s371_s25 }
  0x2f   :  { %164 = vrot.lane.b32.xlu1 %v163_v20, %s372_s26 }
  0x32   :  { %172 = vrot.lane.b32.xlu0 %v171_v21, %s373_s27 }
  0x33   :  { %180 = vrot.lane.b32.xlu1 %v179_v22, %s374_s28 }
  0x36   :  { %188 = vrot.lane.b32.xlu0 %v187_v23, %s375_s29 }
  0x37   :  { %196 = vrot.lane.b32.xlu1 %v195_v24, %s376_s30 }
  0x3a   :  { %204 = vrot.lane.b32.xlu0 %v203_v25, %s377_s6 }
  0x3b   :  { %212 = vrot.lane.b32.xlu1 %v211_v26, %s378_s7 }
  0x3e   :  { %220 = vrot.lane.b32.xlu0 %v219_v28, %s379_s0 }
  0x3f   :  { %228 = vrot.lane.b32.xlu1 %v227_v29, %s380_s8 }
  0x42   :  { %236 = vrot.lane.b32.xlu0 %v235_v30, %s381_s9 }
  0x43   :  { %244 = vrot.lane.b32.xlu1 %v243_v31, %s382_s10 }
  0x46   :  { %252 = vrot.lane.b32.xlu0 %v251_v32, %s383_s11 }
  0x7c   :  { %v13_v33 = vpop.permute.xlu0 %12  }
  0x7d   :  { %v29_v34 = vpop.permute.xlu1 %28   ;;  %260 = vst.msk [vmem:[%s654_s1 + $0x1] sm:$0x1] %vm7_vm0, %v13_v33   ;;  %261 = vst.msk [vmem:[%s654_s1 + $0x20] sm:$0x2] %vm7_vm0, %v13_v33  }
  0x7e   :  { %264 = vst.msk [vmem:[%s654_s1 + $0x3] sm:$0x1] %vm7_vm0, %v29_v34   ;;  %265 = vst.msk [vmem:[%s654_s1 + $0x22] sm:$0x2] %vm7_vm0, %v29_v34  }
  0x80   :  { %v21_v35 = vpop.permute.xlu0 %20  }
  0x81   :  { %v37_v36 = vpop.permute.xlu1 %36   ;;  %262 = vst.msk [vmem:[%s654_s1 + $0x2] sm:$0x1] %vm7_vm0, %v21_v35   ;;  %263 = vst.msk [vmem:[%s654_s1 + $0x21] sm:$0x2] %vm7_vm0, %v21_v35  }
  0x82   :  { %266 = vst.msk [vmem:[%s654_s1 + $0x4] sm:$0x1] %vm7_vm0, %v37_v36   ;;  %267 = vst.msk [vmem:[%s654_s1 + $0x23] sm:$0x2] %vm7_vm0, %v37_v36  }
  0x84   :  { %v45_v37 = vpop.permute.xlu0 %44  }
  0x85   :  { %v53_v38 = vpop.permute.xlu1 %52   ;;  %268 = vst.msk [vmem:[%s654_s1 + $0x5] sm:$0x1] %vm7_vm0, %v45_v37   ;;  %269 = vst.msk [vmem:[%s654_s1 + $0x24] sm:$0x2] %vm7_vm0, %v45_v37  }
  0x86   :  { %270 = vst.msk [vmem:[%s654_s1 + $0x6] sm:$0x1] %vm7_vm0, %v53_v38   ;;  %271 = vst.msk [vmem:[%s654_s1 + $0x25] sm:$0x2] %vm7_vm0, %v53_v38  }
  0x88   :  { %v61_v39 = vpop.permute.xlu0 %60  }
  0x89   :  { %v69_v40 = vpop.permute.xlu1 %68   ;;  %272 = vst.msk [vmem:[%s654_s1 + $0x7] sm:$0x1] %vm7_vm0, %v61_v39   ;;  %273 = vst.msk [vmem:[%s654_s1 + $0x26] sm:$0x2] %vm7_vm0, %v61_v39  }
  0x8a   :  { %274 = vst.msk [vmem:[%s654_s1 + $0x8] sm:$0x1] %vm7_vm0, %v69_v40   ;;  %275 = vst.msk [vmem:[%s654_s1 + $0x27] sm:$0x2] %vm7_vm0, %v69_v40  }
  0x8c   :  { %v77_v41 = vpop.permute.xlu0 %76  }
  0x8d   :  { %v85_v42 = vpop.permute.xlu1 %84   ;;  %276 = vst.msk [vmem:[%s654_s1 + $0x9] sm:$0x1] %vm7_vm0, %v77_v41   ;;  %277 = vst.msk [vmem:[%s654_s1 + $0x28] sm:$0x2] %vm7_vm0, %v77_v41  }
  0x8e   :  { %278 = vst.msk [vmem:[%s654_s1 + $0xa] sm:$0x1] %vm7_vm0, %v85_v42   ;;  %279 = vst.msk [vmem:[%s654_s1 + $0x29] sm:$0x2] %vm7_vm0, %v85_v42  }
  0x90   :  { %v93_v43 = vpop.permute.xlu0 %92  }
  0x91   :  { %v101_v44 = vpop.permute.xlu1 %100   ;;  %280 = vst.msk [vmem:[%s654_s1 + $0xb] sm:$0x1] %vm7_vm0, %v93_v43   ;;  %281 = vst.msk [vmem:[%s654_s1 + $0x2a] sm:$0x2] %vm7_vm0, %v93_v43  }
  0x92   :  { %282 = vst.msk [vmem:[%s654_s1 + $0xc] sm:$0x1] %vm7_vm0, %v101_v44   ;;  %283 = vst.msk [vmem:[%s654_s1 + $0x2b] sm:$0x2] %vm7_vm0, %v101_v44  }
  0x94   :  { %v109_v45 = vpop.permute.xlu0 %108  }
  0x95   :  { %v117_v46 = vpop.permute.xlu1 %116   ;;  %284 = vst.msk [vmem:[%s654_s1 + $0xd] sm:$0x1] %vm7_vm0, %v109_v45   ;;  %285 = vst.msk [vmem:[%s654_s1 + $0x2c] sm:$0x2] %vm7_vm0, %v109_v45  }
  0x96   :  { %286 = vst.msk [vmem:[%s654_s1 + $0xe] sm:$0x1] %vm7_vm0, %v117_v46   ;;  %287 = vst.msk [vmem:[%s654_s1 + $0x2d] sm:$0x2] %vm7_vm0, %v117_v46  }
  0x98   :  { %v125_v47 = vpop.permute.xlu0 %124  }
  0x99   :  { %v133_v48 = vpop.permute.xlu1 %132   ;;  %288 = vst.msk [vmem:[%s654_s1 + $0xf] sm:$0x1] %vm7_vm0, %v125_v47   ;;  %289 = vst.msk [vmem:[%s654_s1 + $0x2e] sm:$0x2] %vm7_vm0, %v125_v47  }
  0x9a   :  { %290 = vst.msk [vmem:[%s654_s1 + $0x10] sm:$0x1] %vm7_vm0, %v133_v48   ;;  %291 = vst.msk [vmem:[%s654_s1 + $0x2f] sm:$0x2] %vm7_vm0, %v133_v48  }
  0x9c   :  { %v141_v49 = vpop.permute.xlu0 %140  }
  0x9d   :  { %v149_v50 = vpop.permute.xlu1 %148   ;;  %292 = vst.msk [vmem:[%s654_s1 + $0x11] sm:$0x1] %vm7_vm0, %v141_v49   ;;  %293 = vst.msk [vmem:[%s654_s1 + $0x30] sm:$0x2] %vm7_vm0, %v141_v49  }
  0x9e   :  { %294 = vst.msk [vmem:[%s654_s1 + $0x12] sm:$0x1] %vm7_vm0, %v149_v50   ;;  %295 = vst.msk [vmem:[%s654_s1 + $0x31] sm:$0x2] %vm7_vm0, %v149_v50  }
  0xa0   :  { %v157_v51 = vpop.permute.xlu0 %156  }
  0xa1   :  { %v165_v52 = vpop.permute.xlu1 %164   ;;  %296 = vst.msk [vmem:[%s654_s1 + $0x13] sm:$0x1] %vm7_vm0, %v157_v51   ;;  %297 = vst.msk [vmem:[%s654_s1 + $0x32] sm:$0x2] %vm7_vm0, %v157_v51  }
  0xa2   :  { %298 = vst.msk [vmem:[%s654_s1 + $0x14] sm:$0x1] %vm7_vm0, %v165_v52   ;;  %299 = vst.msk [vmem:[%s654_s1 + $0x33] sm:$0x2] %vm7_vm0, %v165_v52  }
  0xa4   :  { %v173_v53 = vpop.permute.xlu0 %172  }
  0xa5   :  { %v181_v54 = vpop.permute.xlu1 %180   ;;  %300 = vst.msk [vmem:[%s654_s1 + $0x15] sm:$0x1] %vm7_vm0, %v173_v53   ;;  %301 = vst.msk [vmem:[%s654_s1 + $0x34] sm:$0x2] %vm7_vm0, %v173_v53  }
  0xa6   :  { %302 = vst.msk [vmem:[%s654_s1 + $0x16] sm:$0x1] %vm7_vm0, %v181_v54   ;;  %303 = vst.msk [vmem:[%s654_s1 + $0x35] sm:$0x2] %vm7_vm0, %v181_v54  }
  0xa8   :  { %v189_v55 = vpop.permute.xlu0 %188  }
  0xa9   :  { %v197_v56 = vpop.permute.xlu1 %196   ;;  %304 = vst.msk [vmem:[%s654_s1 + $0x17] sm:$0x1] %vm7_vm0, %v189_v55   ;;  %305 = vst.msk [vmem:[%s654_s1 + $0x36] sm:$0x2] %vm7_vm0, %v189_v55  }
  0xaa   :  { %306 = vst.msk [vmem:[%s654_s1 + $0x18] sm:$0x1] %vm7_vm0, %v197_v56   ;;  %307 = vst.msk [vmem:[%s654_s1 + $0x37] sm:$0x2] %vm7_vm0, %v197_v56  }
  0xac   :  { %v205_v57 = vpop.permute.xlu0 %204  }
  0xad   :  { %v213_v58 = vpop.permute.xlu1 %212   ;;  %308 = vst.msk [vmem:[%s654_s1 + $0x19] sm:$0x1] %vm7_vm0, %v205_v57   ;;  %309 = vst.msk [vmem:[%s654_s1 + $0x38] sm:$0x2] %vm7_vm0, %v205_v57  }
  0xae   :  { %310 = vst.msk [vmem:[%s654_s1 + $0x1a] sm:$0x1] %vm7_vm0, %v213_v58   ;;  %311 = vst.msk [vmem:[%s654_s1 + $0x39] sm:$0x2] %vm7_vm0, %v213_v58  }
  0xb0   :  { %v221_v59 = vpop.permute.xlu0 %220  }
  0xb1   :  { %v229_v60 = vpop.permute.xlu1 %228   ;;  %312 = vst.msk [vmem:[%s654_s1 + $0x1b] sm:$0x1] %vm7_vm0, %v221_v59   ;;  %313 = vst.msk [vmem:[%s654_s1 + $0x3a] sm:$0x2] %vm7_vm0, %v221_v59  }
  0xb2   :  { %314 = vst.msk [vmem:[%s654_s1 + $0x1c] sm:$0x1] %vm7_vm0, %v229_v60   ;;  %315 = vst.msk [vmem:[%s654_s1 + $0x3b] sm:$0x2] %vm7_vm0, %v229_v60  }
  0xb4   :  { %v237_v61 = vpop.permute.xlu0 %236  }
  0xb5   :  { %v245_v62 = vpop.permute.xlu1 %244   ;;  %316 = vst.msk [vmem:[%s654_s1 + $0x1d] sm:$0x1] %vm7_vm0, %v237_v61   ;;  %317 = vst.msk [vmem:[%s654_s1 + $0x3c] sm:$0x2] %vm7_vm0, %v237_v61  }
  0xb6   :  { %318 = vst.msk [vmem:[%s654_s1 + $0x1e] sm:$0x1] %vm7_vm0, %v245_v62   ;;  %319 = vst.msk [vmem:[%s654_s1 + $0x3d] sm:$0x2] %vm7_vm0, %v245_v62  }
  0xb8   :  { %v253_v63 = vpop.permute.xlu0 %252  }
  0xb9   :  { %320 = vst.msk [vmem:[%s654_s1 + $0x1f] sm:$0x1] %vm7_vm0, %v253_v63   ;;  %321 = vst.msk [vmem:[%s654_s1 + $0x3e] sm:$0x2] %vm7_vm0, %v253_v63  }

// kernel: tile.54
= control target key start
LH: loop header
LB: loop body
LE: loop exit
PB: predicated region body
PF: predicated region fallthrough
CT: control target
= control target key end

     0   :  { %s22_s0 = inlined_call_operand.vmem [shape: f32[2], index: 0, kind: input, shape index: {}]   ;;  %s23_s1 = inlined_call_operand.vmem [shape: f32[4,2], index: 1, kind: output, shape index: {}]  }
   0x1   :  { %v4_v0 = vld [vmem:[%s22_s0] ss:$0 sm:$0xff] }
   0x2   :  { %5 = vst [vmem:[%s23_s1] sm:$0xf] %v4_v0 }

// kernel: tile.4
= control target key start
LH: loop header
LB: loop body
LE: loop exit
PB: predicated region body
PF: predicated region fallthrough
CT: control target
= control target key end

     0   :  { %vm7_vm0 = vcmask 7168   ;;  %s37_s0 = inlined_call_operand.vmem [shape: f32[4,2], index: 0, kind: input, shape index: {}]   ;;  %s38_s1 = inlined_call_operand.vmem [shape: f32[8,1], index: 1, kind: output, shape index: {}]  }
   0x1   :  { %v4_v0 = vld [vmem:[%s37_s0] sm:$0xf]  ;;  %s17_s0 = smov 127  }
   0x2   :  { %5 = vst [vmem:[#allocation0] sm:$0xf] %v4_v0 }
   0x9   :  { %v9_v1 = vld [vmem:[#allocation0] sm:$0xf]  }
   0xa   :  { %v6_v2 = vld [vmem:[#allocation0] sm:$0xf]   ;;  %10 = vrot.lane.b32.xlu0 %v9_v1, %s17_s0 }
   0xb   :  { %8 = vst.msk [vmem:[%s38_s1] ss:$2 sm:$0xf] %vm7_vm0, %v6_v2  }
  0x7c   :  { %v11_v3 = vpop.permute.xlu0 %10  }
  0x7d   :  { %15 = vst.msk [vmem:[%s38_s1 + $0x1] ss:$2 sm:$0xf] %vm7_vm0, %v11_v3  }

// kernel: audio_autoencoder_forward.1
= control target key start
LH: loop header
LB: loop body
LE: loop exit
PB: predicated region body
PF: predicated region fallthrough
CT: control target
= control target key end

     0   :  { %s5095_s27 = smov 0   ;;  %s5097_s28 = smov 0   ;;  %s6260_s0 = inlined_call_operand.vmem [shape: bf16[2,8,256], index: 0, kind: input, shape index: {}, may-alias: {0,1}]   ;;  %s6261_s1 = inlined_call_operand.vmem [shape: bf16[2,8,256], index: 1, kind: input, shape index: {}, may-alias: {0,1}]   ;;  %s6262_s2 = inlined_call_operand.vmem [shape: bf16[64,24], index: 2, kind: input, shape index: {}]   ;;  %s6263_s3 = inlined_call_operand.vmem [shape: f32[64,1], index: 3, kind: input, shape index: {}]   ;;  %s6264_s4 = inlined_call_operand.vmem [shape: bf16[64,192], index: 4, kind: input, shape index: {}]   ;;  %s6265_s5 = inlined_call_operand.vmem [shape: f32[64,1], index: 5, kind: input, shape index: {}]   ;;  %s6266_s6 = inlined_call_operand.vmem [shape: bf16[32,192], index: 6, kind: input, shape index: {}]   ;;  %s6267_s7 = inlined_call_operand.vmem [shape: f32[32,1], index: 7, kind: input, shape index: {}]   ;;  %s6268_s8 = inlined_call_operand.vmem [shape: bf16[32,32], index: 8, kind: input, shape index: {}]   ;;  %s6269_s9 = inlined_call_operand.vmem [shape: f32[32,1], index: 9, kind: input, shape index: {}]   ;;  %s6270_s10 = inlined_call_operand.vmem [shape: bf16[32,96], index: 10, kind: input, shape index: {}]   ;;  %s6271_s11 = inlined_call_operand.vmem [shape: f32[32,1], index: 11, kind: input, shape index: {}]   ;;  %s6272_s12 = inlined_call_operand.vmem [shape: bf16[64,96], index: 12, kind: input, shape index: {}]   ;;  %s6273_s13 = inlined_call_operand.vmem [shape: f32[64,1], index: 13, kind: input, shape index: {}]   ;;  %s6274_s14 = inlined_call_operand.vmem [shape: bf16[64,192], index: 14, kind: input, shape index: {}]   ;;  %s6275_s15 = inlined_call_operand.vmem [shape: f32[64,1], index: 15, kind: input, shape index: {}]   ;;  %s6276_s16 = inlined_call_operand.vmem [shape: bf16[8,192], index: 16, kind: input, shape index: {}]   ;;  %s6277_s17 = inlined_call_operand.vmem [shape: f32[8,1], index: 17, kind: input, shape index: {}]   ;;  %s6278_s18 = inlined_call_operand.vmem [shape: f32[2,8,128], index: 18, kind: output, shape index: {}]  }
   0x1   :  { %6284 = sst [smem:[#allocation6_spill]] %s6260_s0  ;;  %s5099_s29 = smov 0  }
   0x2   :  { %6285 = sst [smem:[#allocation7_spill]] %s6261_s1 }
   0x3   :  { %6286 = sst [smem:[#allocation8_spill]] %s6262_s2 }
   0x4   :  { %6287 = sst [smem:[#allocation9_spill]] %s6278_s18 }
   0x5 LB: > { %6288 = sst [smem:[#allocation3_spill]] %s4984_s28  ;;  %s40_s30 = sadd.s32 1, %s4984_s28  ;;  %s4988_s29 = sphi %s5099_s29, %s28_s29   ;;  %s4984_s28 = sphi %s5097_s28, %s6322_s28   ;;  %s4980_s27 = sphi %s5095_s27, %s6321_s27  }
   0x6   : > { %6289 = sst [smem:[#allocation4_spill]] %s4988_s29  ;;  %p4375_p0 = scmp.ge.s32.totalorder %s4988_s29, 1 }
   0x7   : > { %p42_p1 = scmp.ge.s32.totalorder %s40_s30, 2  ;;  %p550_p2 = scmp.lt.s32.totalorder %s4988_s29, 3 }
   0x9   : > { %s6324_s30 = smov (%p42_p1, %s40_s30), 0  ;;  %p551_p3 = pnand %p4375_p0, %p550_p2 }
   0xa   : > { %6290 = sst [smem:[#allocation5_spill]] %s6324_s30  ;;  %p618_p4 = scmp.lt.s32.totalorder (!%p551_p3), %s4980_s27, 1  ;;  %vm648_vm0 = vcmask (!%p551_p3), 109568   ;;  %v4991_v5 = vmov (!%p551_p3), 0   ;;  %vm711_vm1 = vcmask (!%p551_p3), 1043456   ;;  %vm698_vm2 = vcmask (!%p551_p3), 64512  }
   0xb   : > { %554 = sbr.rel (%p551_p3) target bundleno = 3117 (0xc2d), region = 92  ;;  %s6291_s1 = sld [smem:[#allocation8_spill]] (!%p551_p3)  ;;  %750 = vmatprep.mubr.bf16.mxu0 (!%p551_p3), %v4991_v5  ;;  %841 = vmatprep.mubr.bf16.mxu1 (!%p551_p3), %v4991_v5  ;;  %v1003_v11 = vld [vmem:[%s6263_s3] sm:$0xff] (!%p551_p3)  ;;  %v1004_v12 = vld [vmem:[%s6263_s3 + $0x8] sm:$0xff] (!%p551_p3)  ;;  %v1005_v13 = vld [vmem:[%s6263_s3 + $0x10] sm:$0xff] (!%p551_p3)  ;;  %vm696_vm3 = vcmask (!%p551_p3), 1039360  }
   0xc   : > { %s6281_s20 = smov (!%p551_p3), 120   ;;  %s6292_s0 = sld [smem:[#allocation6_spill]] (!%p551_p3)  ;;  %4750 = vset.pattern.permute.xlu0 (!%p551_p3), %v4991_v5  ;;  %4751 = vset.pattern.permute.xlu1 (!%p551_p3), %v4991_v5  ;;  %v1006_v14 = vld [vmem:[%s6263_s3 + $0x18] sm:$0xff] (!%p551_p3)  ;;  %v1007_v15 = vld [vmem:[%s6263_s3 + $0x20] sm:$0xff] (!%p551_p3)  ;;  %v1008_v16 = vld [vmem:[%s6263_s3 + $0x28] sm:$0xff] (!%p551_p3)  ;;  %vm894_vm4 = vcmask (!%p551_p3), 1031168  }
   0xd   : > { %s6293_s29 = sld [smem:[#allocation7_spill]] (!%p551_p3)  ;;  %s6294_s21 = smov (!%p551_p3), 120   ;;  %v1009_v17 = vld [vmem:[%s6263_s3 + $0x30] sm:$0xff] (!%p551_p3)  ;;  %v1010_v18 = vld [vmem:[%s6263_s3 + $0x38] sm:$0xff] (!%p551_p3)  ;;  %v4995_v51 = vmov (!%p551_p3), 0.0|0.0  }
   0xe   : > { %v5213_v52 = vld [vmem:[%s6264_s4 + $0x10] ss:$8 sps:$4 sm:$0xff] (!%p551_p3)  }
  0x11   : > { %v4754_v0 = vld [vmem:[%s6291_s1] sm:$0xff] (!%p551_p3)   ;;  %v4755_v1 = vld [vmem:[%s6291_s1 + $0x8] sm:$0xff] (!%p551_p3)   ;;  %v4756_v2 = vld [vmem:[%s6291_s1 + $0x18] sm:$0xff] (!%p551_p3)  }
  0x12   : > { %s6326_s27 = smov (!%p618_p4, %s4980_s27), 1  ;;  %679 = vrot.lane.b32.xlu1 %v4754_v0, %s6281_s20  ;;  %v4757_v10 = vld [vmem:[%s6291_s1 + $0x10] sm:$0xff]   ;;  %s4997_s20 = smov 96  }
  0x13   : > { %s5120_s2 = sshll.u32 %s6326_s27, 3  ;;  %s4992_s27 = smov 127  }
  0x14   : > { %s625_s19 = scalar_lea.vmem %s6292_s0, %s5120_s2  ;;  %s4555_s30 = sadd.s32 4, %s5120_s2 }
  0x15   : > { %s634_s18 = scalar_lea.vmem %s6293_s29, %s4555_s30  ;;  %v645_v3 = vld [vmem:[%s625_s19] sm:$0xf]  ;;  %s4994_s30 = smov 112  }
  0x16   : > { %681 = vrot.lane.b32.xlu1 %v4755_v1, %s6294_s21  ;;  %646 = vst [vmem:[#allocation2] sm:$0xf] %v645_v3  ;;  %v647_v4 = vld [vmem:[%s634_s18] sm:$0xf]  ;;  %s4993_s18 = smov 126   ;;  %s4996_s0 = smov 64  }
  0x17   : > { %649 = vst.msk [vmem:[#allocation2 + $0x4] sm:$0xf] %vm648_vm0, %v647_v4  ;;  %vm1340_vm0 = vcmask 523264  }
  0x1a   : > { %685 = vrot.lane.b32.xlu1 %v4756_v2, %s6294_s21 }
  0x1e   : > { %v650_v6 = vld [vmem:[#allocation2] sm:$0xff] }
  0x1f   : > { %v4385_v7 = vcombine.low %v650_v6, %v650_v6  ;;  %v4386_v8 = vcombine.high %v650_v6, %v650_v6 }
  0x21   : > { %692 = vrot.lane.b32.xlu0 %v4385_v7, %s4992_s27  ;;  %892 = vrot.lane.b32.xlu1 %v4386_v8, %s4993_s18  ;;  %v804_v9 = vsel %vm711_vm1, %v4385_v7, 0 }
  0x22   : > { %4392 = vmatprep.subr.msk.bf16.mxu1 %vm711_vm1, %v4386_v8 }
  0x23   : > { %810 = vmatpush1.bf16.msra.mxu1 %v804_v9 }
  0x25   : > { %694 = vrot.lane.b32.xlu0 %v4386_v8, %s4992_s27  ;;  %884 = vrot.lane.b32.xlu1 %v4755_v1, %s4994_s30 }
  0x26   : > { %4393 = vmatmul.mubr.msk.bf16.vlgmr.msra.gmra.mrb[0].mxu1 %vm698_vm2, %v4754_v0 }
  0x27   : > { %851 = vmatprep.mubr.bf16.mxu1 %v4991_v5 }
  0x29   : > { %683 = vrot.lane.b32.xlu0 %v4757_v10, %s6294_s21  ;;  %888 = vrot.lane.b32.xlu1 %v4756_v2, %s4994_s30 }
  0x2d   : > { %890 = vrot.lane.b32.xlu0 %v4385_v7, %s4993_s18  ;;  %1018 = vperm.xlu1 %4751, %v1004_v12  }
  0x2e   : > { %4394 = vmatmul.mubr.msk.bf16.gmra.mrb[4].mxu1 %vm698_vm2, %v4755_v1 }
  0x2f   : > { %861 = vmatprep.mubr.bf16.mxu1 %v4991_v5 }
  0x31   : > { %882 = vrot.lane.b32.xlu0 %v4754_v0, %s4994_s30  ;;  %1023 = vperm.xlu1 %4751, %v1005_v13  }
  0x35   : > { %886 = vrot.lane.b32.xlu0 %v4757_v10, %s4994_s30  ;;  %1033 = vperm.xlu1 %4751, %v1007_v15  }
  0x36   : > { %4395 = vmatmul.mubr.msk.bf16.gmra.mrb[8].mxu1 %vm698_vm2, %v4757_v10 }
  0x37   : > { %871 = vmatprep.mubr.bf16.mxu1 %v4991_v5 }
  0x39   : > { %1013 = vperm.xlu0 %4750, %v1003_v11   ;;  %1043 = vperm.xlu1 %4751, %v1009_v17  }
  0x3d   : > { %1028 = vperm.xlu0 %4750, %v1006_v14  }
  0x3e   : > { %4396 = vmatmul.mubr.msk.bf16.gmra.mrb[12].mxu1 %vm698_vm2, %v4756_v2 }
  0x3f   : > { %1385 = vmatprep.mubr.bf16.mxu1 %v4991_v5 }
  0x41   : > { %1038 = vperm.xlu0 %4750, %v1008_v16  }
  0x45   : > { %1048 = vperm.xlu0 %4750, %v1010_v18  }
  0x49   : > { %1314 = vrot.lane.b32.xlu0 %v4995_v51, %s4992_s27 }
  0x4d   : > { %1318 = vrot.lane.b32.xlu0 %v4995_v51, %s4992_s27 }
  0x51   : > { %1322 = vrot.lane.b32.xlu0 %v4995_v51, %s4992_s27 }
  0x55   : > { %1326 = vrot.lane.b32.xlu0 %v4995_v51, %s4992_s27 }
  0x59   : > { %1298 = vrot.lane.b32.xlu0 %v5213_v52, %s4996_s0 }
  0x84   : > { %v680_v19 = vpop.permute.xlu1 %679 }
  0x88   : > { %v682_v20 = vpop.permute.xlu1 %681 }
  0x8c   : > { %v686_v21 = vpop.permute.xlu1 %685 }
  0x93   : > { %v693_v22 = vpop.permute.xlu0 %692  ;;  %v893_v25 = vpop.permute.xlu1 %892 }
  0x97   : > { %v695_v23 = vpop.permute.xlu0 %694  ;;  %v885_v32 = vpop.permute.xlu1 %884 }
  0x98   : > { %4387 = vmatprep.subr.msk.bf16.mxu0 %vm711_vm1, %v695_v23  ;;  %v697_v24 = vsel %vm696_vm3, %v693_v22, %v695_v23 }
  0x99   : > { %v713_v26 = vsel %vm711_vm1, %v697_v24, 0 }
  0x9a   : > { %719 = vmatpush1.bf16.msra.mxu0 %v713_v26 }
  0x9b   : > { %v684_v27 = vpop.permute.xlu0 %683  ;;  %4397 = vmatprep.subr.msk.bf16.mxu0 %vm711_vm1, %v893_v25  ;;  %v889_v34 = vpop.permute.xlu1 %888 }
  0x9d   : > { %4388 = vmatmul.mubr.msk.bf16.vlgmr.msra.gmra.mrb[0].mxu0 %vm698_vm2, %v680_v19 }
  0x9e   : > { %760 = vmatprep.mubr.bf16.mxu0 %v4991_v5 }
  0x9f   : > { %v891_v28 = vpop.permute.xlu0 %890 }
  0xa0   : > { %v895_v29 = vsel %vm894_vm4, %v891_v28, %v893_v25 }
  0xa1   : > { %v909_v30 = vsel %vm711_vm1, %v895_v29, 0 }
  0xa2   : > { %915 = vmatpush1.bf16.msra.mxu0 %v909_v30 }
  0xa3   : > { %v883_v31 = vpop.permute.xlu0 %882 }
  0xa5   : > { %4389 = vmatmul.mubr.msk.bf16.gmra.mrb[4].mxu0 %vm698_vm2, %v682_v20 }
  0xa6   : > { %770 = vmatprep.mubr.bf16.mxu0 %v4991_v5 }
  0xa7   : > { %v887_v33 = vpop.permute.xlu0 %886 }
  0xad   : > { %4390 = vmatmul.mubr.msk.bf16.gmra.mrb[8].mxu0 %vm698_vm2, %v684_v27 }
  0xae   : > { %780 = vmatprep.mubr.bf16.mxu0 %v4991_v5 }
  0xb5   : > { %4391 = vmatmul.mubr.msk.bf16.gmra.mrb[12].mxu0 %vm698_vm2, %v686_v21  ;;  %v1019_v21 = vpop.permute.xlu1 %1018 }
  0xb6   : > { %946 = vmatprep.mubr.bf16.mxu0 %v4991_v5 }
  0xb8   : > { %v1014_v8 = vpop.permute.xlu0 %1013 }
  0xbc   : > { %v1029_v13 = vpop.permute.xlu0 %1028 }
  0xbd   : > { %4398 = vmatmul.mubr.msk.bf16.vlgmr.msra.gmra.mrb[16].mxu0 %vm698_vm2, %v883_v31 }
  0xbe   : > { %956 = vmatprep.mubr.bf16.mxu0 %v4991_v5 }
  0xc0   : > { %v1039_v17 = vpop.permute.xlu0 %1038 }
  0xc4   : > { %v1049_v27 = vpop.permute.xlu0 %1048 }
  0xc5   : > { %4399 = vmatmul.mubr.msk.bf16.gmra.mrb[20].mxu0 %vm698_vm2, %v885_v32 }
  0xc6   : > { %966 = vmatprep.mubr.bf16.mxu0 %v4991_v5 }
  0xcd   : > { %4400 = vmatmul.mubr.msk.bf16.gmra.mrb[24].mxu0 %vm698_vm2, %v887_v33  ;;  %v1024_v33 = vpop.permute.xlu1 %1023 }
  0xce   : > { %976 = vmatprep.mubr.bf16.mxu0 %v4991_v5 }
  0xd5   : > { %4401 = vmatmul.mubr.msk.bf16.gmra.mrb[28].mxu0 %vm698_vm2, %v889_v34 }
  0xf9   : > { %v843_v35 = vpop.f32.mrb[0].mxu1 }
  0xfa   : > { %v845_v36 = vpop.f32.mrb[1].mxu1 }
  0xfb   : > { %v847_v37 = vpop.f32.mrb[2].mxu1 }
  0xfc   : > { %v849_v38 = vpop.f32.mrb[3].mxu1 }
 0x101   : > { %v853_v39 = vpop.f32.mrb[4].mxu1 }
 0x102   : > { %v855_v40 = vpop.f32.mrb[5].mxu1 }
 0x103   : > { %v857_v41 = vpop.f32.mrb[6].mxu1 }
 0x104   : > { %v859_v42 = vpop.f32.mrb[7].mxu1 }
 0x109   : > { %v863_v43 = vpop.f32.mrb[8].mxu1 }
 0x10a   : > { %v865_v44 = vpop.f32.mrb[9].mxu1 }
 0x10b   : > { %v867_v45 = vpop.f32.mrb[10].mxu1 }
 0x10c   : > { %v869_v46 = vpop.f32.mrb[11].mxu1 }
 0x111   : > { %v873_v47 = vpop.f32.mrb[12].mxu1 }
 0x112   : > { %v875_v48 = vpop.f32.mrb[13].mxu1 }
 0x113   : > { %v877_v49 = vpop.f32.mrb[14].mxu1 }
 0x114   : > { %v879_v50 = vpop.f32.mrb[15].mxu1 }
 0x170   : > { %v752_v53 = vpop.f32.mrb[0].mxu0 }
 0x171   : > { %v844_v54 = vadd.f32 %v843_v35, %v752_v53  ;;  %v754_v55 = vpop.f32.mrb[1].mxu0  ;;  %v1034_v53 = vpop.permute.xlu1 %1033 }
 0x172   : > { %v756_v56 = vpop.f32.mrb[2].mxu0 }
 0x173   : > { %v848_v57 = vadd.f32 %v847_v37, %v756_v56  ;;  %v758_v58 = vpop.f32.mrb[3].mxu0  ;;  %v5227_v37 = vpop.permute.xlu0 %1314 }
 0x174   : > { %1353 = vmatprep.subr.bf16.mxu1 %v5227_v37 }
 0x178   : > { %v762_v59 = vpop.f32.mrb[4].mxu0 }
 0x179   : > { %v854_v60 = vadd.f32 %v853_v39, %v762_v59  ;;  %v764_v61 = vpop.f32.mrb[5].mxu0 }
 0x17a   : > { %v766_v62 = vpop.f32.mrb[6].mxu0 }
 0x17b   : > { %v858_v63 = vadd.f32 %v857_v41, %v766_v62  ;;  %v768_v0 = vpop.f32.mrb[7].mxu0 }
 0x180   : > { %v772_v1 = vpop.f32.mrb[8].mxu0 }
 0x181   : > { %v864_v2 = vadd.f32 %v863_v43, %v772_v1  ;;  %v774_v3 = vpop.f32.mrb[9].mxu0 }
 0x182   : > { %v776_v4 = vpop.f32.mrb[10].mxu0 }
 0x183   : > { %v868_v6 = vadd.f32 %v867_v45, %v776_v4  ;;  %v778_v7 = vpop.f32.mrb[11].mxu0 }
 0x188   : > { %v782_v9 = vpop.f32.mrb[12].mxu0 }
 0x189   : > { %v5217_v10 = vadd.f32 %v873_v47, %v782_v9  ;;  %v784_v11 = vpop.f32.mrb[13].mxu0 }
 0x18a   : > { %v786_v12 = vpop.f32.mrb[14].mxu0  ;;  %v1044_v11 = vpop.permute.xlu1 %1043 }
 0x18b   : > { %v5219_v14 = vadd.f32 %v877_v49, %v786_v12  ;;  %v788_v15 = vpop.f32.mrb[15].mxu0 }
 0x190   : > { %v948_v16 = vpop.f32.mrb[16].mxu0 }
 0x191   : > { %v987_v18 = vadd.f32 %v948_v16, %v844_v54  ;;  %v950_v19 = vpop.f32.mrb[17].mxu0 }
 0x192   : > { %v952_v20 = vpop.f32.mrb[18].mxu0 }
 0x193   : > { %v989_v22 = vadd.f32 %v952_v20, %v848_v57  ;;  %v5221_v23 = vadd.f32 %v1014_v8, %v987_v18  ;;  %v954_v24 = vpop.f32.mrb[19].mxu0 }
 0x195   : > { %v1067_v25 = vand.u32 2147483647, %v5221_v23  ;;  %v5224_v26 = vadd.f32 %v1019_v21, %v989_v22  ;;  %vm1131_vm5 = vcmp.ge.f32.partialorder %v5221_v23, 0.0 }
 0x197   : > { %v1083_v28 = vsub.f32 0.0, %v1067_v25  ;;  %v1069_v29 = vand.u32 2147483647, %v5224_v26  ;;  %vm1133_vm8 = vcmp.ge.f32.partialorder %v5224_v26, 0.0 }
 0x198   : > { %v958_v30 = vpop.f32.mrb[20].mxu0 }
 0x199   : > { %v1099_v31 = vmul.f32 1.442695, %v1083_v28  ;;  %v1085_v32 = vsub.f32 0.0, %v1069_v29  ;;  %v991_v34 = vadd.f32 %v958_v30, %v854_v60  ;;  %v960_v35 = vpop.f32.mrb[21].mxu0 }
 0x19a   : > { %v962_v36 = vpop.f32.mrb[22].mxu0 }
 0x19b   : > { %4798 = vpow2.f32 %v1099_v31  ;;  %v1103_v38 = vmul.f32 1.442695, %v1085_v32  ;;  %v5229_v39 = vadd.f32 %v1024_v33, %v991_v34  ;;  %v993_v40 = vadd.f32 %v962_v36, %v858_v63  ;;  %v964_v41 = vpop.f32.mrb[23].mxu0 }
 0x19c   : > { %v1228_v63 = vlaneseq }
 0x19d   : > { %4800 = vpow2.f32 %v1103_v38  ;;  %v1071_v42 = vand.u32 2147483647, %v5229_v39  ;;  %v5233_v43 = vadd.f32 %v1029_v13, %v993_v40  ;;  %vm1135_vm11 = vcmp.ge.f32.partialorder %v5229_v39, 0.0 }
 0x19e   : > { %v5243_v13 = vand.u32 127, %v1228_v63 }
 0x19f   : > { %v1087_v44 = vsub.f32 0.0, %v1071_v42  ;;  %v1073_v45 = vand.u32 2147483647, %v5233_v43  ;;  %vm1137_vm12 = vcmp.ge.f32.partialorder %v5233_v43, 0.0 }
 0x1a0   : > { %v968_v46 = vpop.f32.mrb[24].mxu0  ;;  %v1232_v22 = vadd.s32 4294967290, %v5243_v13 }
 0x1a1   : > { %v1107_v47 = vmul.f32 1.442695, %v1087_v44  ;;  %v1089_v48 = vsub.f32 0.0, %v1073_v45  ;;  %v995_v49 = vadd.f32 %v968_v46, %v864_v2  ;;  %v970_v50 = vpop.f32.mrb[25].mxu0 }
 0x1a2   : > { %v972_v54 = vpop.f32.mrb[26].mxu0  ;;  %vm1234_vm6 = vcmp.ge.s32.totalorder %v1232_v22, 0  ;;  %vm1236_vm7 = vcmp.lt.s32.totalorder %v1232_v22, 16 }
 0x1a3   : > { %4802 = vpow2.f32 %v1107_v47  ;;  %v1111_v55 = vmul.f32 1.442695, %v1089_v48  ;;  %v5236_v56 = vadd.f32 %v1034_v53, %v995_v49  ;;  %v997_v57 = vadd.f32 %v972_v54, %v868_v6  ;;  %v974_v58 = vpop.f32.mrb[27].mxu0  ;;  %vm5256_vm9 = vmand %vm1234_vm6, %vm1236_vm7 }
 0x1a4   : > { %vm5264_vm10 = vmpackc.low %vm5256_vm9, %vm5256_vm9 }
 0x1a5   : > { %v4799_v59 = vpop.eup %4798  ;;  %4804 = vpow2.f32 %v1111_v55  ;;  %v1075_v60 = vand.u32 2147483647, %v5236_v56  ;;  %v5239_v61 = vadd.f32 %v1039_v17, %v997_v57  ;;  %vm1139_vm13 = vcmp.ge.f32.partialorder %v5236_v56, 0.0 }
 0x1a6   : > { %v1163_v62 = vadd.f32 1.0, %v4799_v59  ;;  %v1147_v32 = vsel %vm1131_vm5, 1.0, %v4799_v59 }
 0x1a7   : > { %v4801_v0 = vpop.eup %4800  ;;  %v1091_v1 = vsub.f32 0.0, %v1075_v60  ;;  %v1077_v2 = vand.u32 2147483647, %v5239_v61  ;;  %vm1141_vm14 = vcmp.ge.f32.partialorder %v5239_v61, 0.0 }
 0x1a8   : > { %4806 = vrcp.f32 %v1163_v62  ;;  %v1165_v3 = vadd.f32 1.0, %v4801_v0  ;;  %v978_v4 = vpop.f32.mrb[28].mxu0  ;;  %v1149_v35 = vsel %vm1133_vm8, 1.0, %v4801_v0 }
 0x1a9   : > { %v1115_v7 = vmul.f32 1.442695, %v1091_v1  ;;  %v1093_v8 = vsub.f32 0.0, %v1077_v2  ;;  %v999_v6 = vadd.f32 %v978_v4, %v5217_v10  ;;  %v980_v9 = vpop.f32.mrb[29].mxu0 }
 0x1aa   : > { %4808 = vrcp.f32 %v1165_v3  ;;  %v982_v12 = vpop.f32.mrb[30].mxu0 }
 0x1ab   : > { %4810 = vpow2.f32 %v1115_v7  ;;  %v1119_v15 = vmul.f32 1.442695, %v1093_v8  ;;  %v5245_v16 = vadd.f32 %v1044_v11, %v999_v6  ;;  %v1001_v17 = vadd.f32 %v982_v12, %v5219_v14  ;;  %v984_v18 = vpop.f32.mrb[31].mxu0  ;;  %v4761_v11 = vld [vmem:[%s6264_s4 + $0x30] ss:$8 sps:$4 sm:$0xff]  }
 0x1ac   : > { %v4764_v18 = vld [vmem:[%s6264_s4] ss:$8 sps:$4 sm:$0xff]  }
 0x1ad   : > { %v4803_v19 = vpop.eup %4802  ;;  %4812 = vpow2.f32 %v1119_v15  ;;  %v1079_v20 = vand.u32 2147483647, %v5245_v16  ;;  %v5249_v21 = vadd.f32 %v1049_v27, %v1001_v17  ;;  %vm1143_vm15 = vcmp.ge.f32.partialorder %v5245_v16, 0.0  ;;  %4616 = vmatprep.mubr.msk.bf16.mxu0 %vm1340_vm0, %v4764_v18 }
 0x1ae   : > { %v1167_v10 = vadd.f32 1.0, %v4803_v19 }
 0x1af   : > { %v4805_v24 = vpop.eup %4804  ;;  %v1095_v25 = vsub.f32 0.0, %v1079_v20  ;;  %v1081_v28 = vand.u32 2147483647, %v5249_v21  ;;  %vm1145_vm1 = vcmp.ge.f32.partialorder %v5249_v21, 0.0 }
 0x1b0   : > { %4814 = vrcp.f32 %v1167_v10  ;;  %v1169_v29 = vadd.f32 1.0, %v4805_v24  ;;  %v1153_v57 = vsel %vm1137_vm12, 1.0, %v4805_v24 }
 0x1b1   : > { %v1123_v30 = vmul.f32 1.442695, %v1095_v25  ;;  %v1097_v14 = vsub.f32 0.0, %v1081_v28 }
 0x1b2   : > { %v4807_v31 = vpop.eup %4806  ;;  %4816 = vrcp.f32 %v1169_v29 }
 0x1b3   : > { %v1195_v27 = vmul.f32 %v4807_v31, %v1147_v32  ;;  %4818 = vpow2.f32 %v1123_v30  ;;  %v1127_v33 = vmul.f32 1.442695, %v1097_v14  ;;  %v1653_v32 = vld [vmem:[%s6265_s5 + $0x8] sm:$0xff] }
 0x1b4   : > { %v4809_v34 = vpop.eup %4808 }
 0x1b5   : > { %v4811_v36 = vpop.eup %4810  ;;  %v1211_v38 = vmul.f32 %v1195_v27, %v5221_v23  ;;  %v1197_v40 = vmul.f32 %v4809_v34, %v1149_v35  ;;  %4820 = vpow2.f32 %v1127_v33  ;;  %v4767_v34 = vld [vmem:[%s6264_s4 + $0x20] ss:$8 sps:$4 sm:$0xff]  }
 0x1b6   : > { %v1171_v41 = vadd.f32 1.0, %v4811_v36  ;;  %v1657_v35 = vld [vmem:[%s6265_s5 + $0x28] sm:$0xff] }
 0x1b7   : > { %v4813_v44 = vpop.eup %4812  ;;  %v1213_v45 = vmul.f32 %v1197_v40, %v5224_v26  ;;  %v1244_v48 = vsel %vm5256_vm9, %v1211_v38, 0.0  ;;  %v1151_v26 = vsel %vm1135_vm11, 1.0, %v4803_v19  ;;  %v1656_v40 = vld [vmem:[%s6265_s5 + $0x20] sm:$0xff] }
 0x1b8   : > { %4822 = vrcp.f32 %v1171_v41  ;;  %v1173_v46 = vadd.f32 1.0, %v4813_v44  ;;  %v1157_v9 = vsel %vm1141_vm14, 1.0, %v4813_v44  ;;  %v1658_v41 = vld [vmem:[%s6265_s5 + $0x30] sm:$0xff] }
 0x1b9   : > { %v4411_v23 = vpack.c.bf16 %v1213_v45, %v1211_v38  ;;  %v1246_v49 = vsel %vm5256_vm9, %v1213_v45, 0.0  ;;  %v1654_v38 = vld [vmem:[%s6265_s5 + $0x10] sm:$0xff]  ;;  %v1319_v45 = vpop.permute.xlu0 %1318 }
 0x1ba   : > { %v4815_v50 = vpop.eup %4814  ;;  %4824 = vrcp.f32 %v1173_v46  ;;  %v1260_v53 = vpack.c.bf16 %v1246_v49, %v1244_v48 }
 0x1bb   : > { %v1199_v54 = vmul.f32 %v4815_v50, %v1151_v26  ;;  %4608 = vmatprep.subr.msk.bf16.mxu0 %vm5264_vm10, %v4411_v23 }
 0x1bc   : > { %v4817_v55 = vpop.eup %4816  ;;  %4609 = vmatpush3.bf16.msk.msra.mxu0 %vm5264_vm10, %v4411_v23  ;;  %1523 = vrot.lane.b32.xlu0 %v1260_v53, %s4993_s18 }
 0x1bd   : > { %v4819_v58 = vpop.eup %4818  ;;  %v1215_v59 = vmul.f32 %v1199_v54, %v5229_v39  ;;  %v1201_v60 = vmul.f32 %v4817_v55, %v1153_v57  ;;  %1312 = vrot.lane.b32.xlu1 %v1260_v53, %s4992_s27  ;;  %v1155_v39 = vsel %vm1139_vm13, 1.0, %v4811_v36  ;;  %v1659_v36 = vld [vmem:[%s6265_s5 + $0x38] sm:$0xff]  ;;  %v1323_v46 = vpop.permute.xlu0 %1322 }
 0x1be   : > { %v1175_v62 = vadd.f32 1.0, %v4819_v58  ;;  %v1159_v22 = vsel %vm1143_vm15, 1.0, %v4819_v58 }
 0x1bf   : > { %v4821_v63 = vpop.eup %4820  ;;  %v1217_v0 = vmul.f32 %v1201_v60, %v5233_v43  ;;  %v1248_v3 = vsel %vm5256_vm9, %v1215_v59, 0.0 }
 0x1c0   : > { %4826 = vrcp.f32 %v1175_v62  ;;  %v1177_v1 = vadd.f32 1.0, %v4821_v63  ;;  %v1161_v28 = vsel %vm1145_vm1, 1.0, %v4821_v63  ;;  %vm2363_vm1 = vcmask 261120  }
 0x1c1   : > { %v4414_v2 = vpack.c.bf16 %v1217_v0, %v1215_v59  ;;  %v1250_v4 = vsel %vm5256_vm9, %v1217_v0, 0.0  ;;  %v1327_v48 = vpop.permute.xlu0 %1326 }
 0x1c2   : > { %v4823_v7 = vpop.eup %4822  ;;  %4828 = vrcp.f32 %v1177_v1  ;;  %v1262_v8 = vpack.c.bf16 %v1250_v4, %v1248_v3 }
 0x1c3   : > { %v1203_v6 = vmul.f32 %v4823_v7, %v1155_v39  ;;  %4610 = vmatprep.subr.msk.bf16.mxu0 %vm5264_vm10, %v4414_v2 }
 0x1c4   : > { %v4825_v43 = vpop.eup %4824  ;;  %4611 = vmatpush3.bf16.msk.msra.mxu0 %vm5264_vm10, %v4414_v2  ;;  %1527 = vrot.lane.b32.xlu0 %v1262_v8, %s4993_s18 }
 0x1c5   : > { %v1219_v12 = vmul.f32 %v1203_v6, %v5236_v56  ;;  %v1205_v15 = vmul.f32 %v4825_v43, %v1157_v9  ;;  %1316 = vrot.lane.b32.xlu1 %v1262_v8, %s4992_s27  ;;  %v1299_v26 = vpop.permute.xlu0 %1298  ;;  %v4766_v8 = vld [vmem:[%s6264_s4 + $0x4] ss:$8 sps:$4 sm:$0xff]   ;;  %v4760_v6 = vld [vmem:[%s6264_s4 + $0x14] ss:$8 sps:$4 sm:$0xff]  }
 0x1c6   : > { %v4769_v43 = vld [vmem:[%s6264_s4 + $0x24] ss:$8 sps:$4 sm:$0xff]   ;;  %v4763_v9 = vld [vmem:[%s6264_s4 + $0x34] ss:$8 sps:$4 sm:$0xff]  }
 0x1c7   : > { %v1221_v17 = vmul.f32 %v1205_v15, %v5239_v61  ;;  %v1252_v20 = vsel %vm5256_vm9, %v1219_v12, 0.0 }
 0x1c8   : > { %1302 = vrot.lane.b32.xlu0 %v4761_v11, %s4996_s0 }
 0x1c9   : > { %v4417_v19 = vpack.c.bf16 %v1221_v17, %v1219_v12  ;;  %v1254_v56 = vsel %vm5256_vm9, %v1221_v17, 0.0 }
 0x1ca   : > { %v4827_v10 = vpop.eup %4826  ;;  %v1264_v24 = vpack.c.bf16 %v1254_v56, %v1252_v20 }
 0x1cb   : > { %v1207_v61 = vmul.f32 %v4827_v10, %v1159_v22  ;;  %4612 = vmatprep.subr.msk.bf16.mxu0 %vm5264_vm10, %v4417_v19 }
 0x1cc   : > { %v4829_v25 = vpop.eup %4828  ;;  %4613 = vmatpush3.bf16.msk.msra.mxu0 %vm5264_vm10, %v4417_v19  ;;  %1533 = vrot.lane.b32.xlu0 %v4995_v51, %s4993_s18 }
 0x1cd   : > { %v1223_v29 = vmul.f32 %v1207_v61, %v5245_v16  ;;  %v1209_v30 = vmul.f32 %v4829_v25, %v1161_v28  ;;  %1320 = vrot.lane.b32.xlu1 %v1264_v24, %s4992_s27 }
 0x1cf   : > { %v1225_v14 = vmul.f32 %v1209_v30, %v5249_v21  ;;  %v1256_v27 = vsel %vm5256_vm9, %v1223_v29, 0.0  ;;  %v1655_v21 = vld [vmem:[%s6265_s5 + $0x18] sm:$0xff] }
 0x1d0   : > { %1537 = vrot.lane.b32.xlu0 %v4995_v51, %s4993_s18 }
 0x1d1   : > { %v4420_v31 = vpack.c.bf16 %v1225_v14, %v1223_v29  ;;  %v1258_v33 = vsel %vm5256_vm9, %v1225_v14, 0.0 }
 0x1d2   : > { %v1266_v16 = vpack.c.bf16 %v1258_v33, %v1256_v27 }
 0x1d3   : > { %4614 = vmatprep.subr.msk.bf16.mxu0 %vm5264_vm10, %v4420_v31 }
 0x1d4   : > { %4615 = vmatpush3.bf16.msk.msra.mxu0 %vm5264_vm10, %v4420_v31  ;;  %1667 = vperm.xlu0 %4750, %v1653_v32  }
 0x1d5   : > { %1324 = vrot.lane.b32.xlu1 %v1266_v16, %s4992_s27 }
 0x1d7   : > { %4617 = vmatmul.mubr.msk.bf16.vlgmr.msra.gmra.mrb[32].mxu0 %vm1340_vm0, %v5213_v52  ;;  %v1652_v52 = vld [vmem:[%s6265_s5] sm:$0xff] }
 0x1d8   : > { %1677 = vperm.xlu0 %4750, %v1655_v21   ;;  %4620 = vmatprep.mubr.msk.bf16.mxu0 %vm1340_vm0, %v4767_v34 }
 0x1d9   : > { %1296 = vrot.lane.b32.xlu1 %v4764_v18, %s4996_s0 }
 0x1dc   : > { %1687 = vperm.xlu0 %4750, %v1657_v35  }
 0x1dd   : > { %1300 = vrot.lane.b32.xlu1 %v4767_v34, %s4996_s0 }
 0x1df   : > { %4621 = vmatmul.mubr.msk.bf16.gmra.mrb[36].mxu0 %vm1340_vm0, %v4761_v11 }
 0x1e0   : > { %1697 = vperm.xlu0 %4750, %v1659_v36   ;;  %2006 = vmatprep.mubr.bf16.mxu0 %v4991_v5 }
 0x1e1   : > { %1525 = vrot.lane.b32.xlu1 %v4995_v51, %s4993_s18 }
 0x1e4   : > { %1942 = vrot.lane.b32.xlu0 %v4995_v51, %s4992_s27 }
 0x1e5   : > { %1529 = vrot.lane.b32.xlu1 %v4995_v51, %s4993_s18 }
 0x1e8   : > { %1946 = vrot.lane.b32.xlu0 %v4995_v51, %s4992_s27 }
 0x1e9   : > { %1531 = vrot.lane.b32.xlu1 %v1264_v24, %s4993_s18 }
 0x1ec   : > { %1950 = vrot.lane.b32.xlu0 %v4995_v51, %s4992_s27 }
 0x1ed   : > { %1535 = vrot.lane.b32.xlu1 %v1266_v16, %s4993_s18 }
 0x1f0   : > { %1954 = vrot.lane.b32.xlu0 %v4995_v51, %s4992_s27 }
 0x1f1   : > { %1662 = vperm.xlu1 %4751, %v1652_v52  }
 0x1f4   : > { %2094 = vrot.lane.b32.xlu0 %v4995_v51, %s4993_s18 }
 0x1f5   : > { %1672 = vperm.xlu1 %4751, %v1654_v38  }
 0x1f9   : > { %1682 = vperm.xlu1 %4751, %v1656_v40  }
 0x1fd   : > { %1692 = vperm.xlu1 %4751, %v1658_v41  }
 0x22f   : > { %v1313_v42 = vpop.permute.xlu1 %1312 }
 0x230   : > { %v1328_v44 = vsel %vm696_vm3, %v1313_v42, %v5227_v37  ;;  %v1524_v37 = vpop.permute.xlu0 %1523 }
 0x231   : > { %1354 = vmatpush1.bf16.msra.mxu1 %v1328_v44 }
 0x232   : > { %1355 = vmatprep.subr.bf16.mxu1 %v1319_v45 }
 0x236   : > { %v1528_v57 = vpop.permute.xlu0 %1527 }
 0x237   : > { %v1317_v47 = vpop.permute.xlu1 %1316 }
 0x238   : > { %v1329_v23 = vsel %vm696_vm3, %v1317_v47, %v1319_v45 }
 0x239   : > { %1356 = vmatpush1.bf16.msra.mxu1 %v1329_v23 }
 0x23a   : > { %1357 = vmatprep.subr.bf16.mxu1 %v1323_v46  ;;  %v1303_v59 = vpop.permute.xlu0 %1302 }
 0x23e   : > { %v1534_v63 = vpop.permute.xlu0 %1533 }
 0x23f   : > { %v1321_v49 = vpop.permute.xlu1 %1320 }
 0x240   : > { %v1330_v50 = vsel %vm696_vm3, %v1321_v49, %v1323_v46 }
 0x241   : > { %1358 = vmatpush1.bf16.msra.mxu1 %v1330_v50 }
 0x242   : > { %1359 = vmatprep.subr.bf16.mxu1 %v1327_v48  ;;  %v1538_v4 = vpop.permute.xlu0 %1537 }
 0x247   : > { %v1325_v53 = vpop.permute.xlu1 %1324 }
 0x248   : > { %v1331_v54 = vsel %vm696_vm3, %v1325_v53, %v1327_v48 }
 0x249   : > { %1360 = vmatpush1.bf16.msra.mxu1 %v1331_v54 }
 0x24b   : > { %v1297_v55 = vpop.permute.xlu1 %1296 }
 0x24c   : > { %4406 = vmatmul.mubr.msk.bf16.vlgmr.msra.gmra.mrb[16].mxu1 %vm1340_vm0, %v1297_v55 }
 0x24d   : > { %1395 = vmatprep.mubr.bf16.mxu1 %v4991_v5 }
 0x24f   : > { %v1301_v58 = vpop.permute.xlu1 %1300 }
 0x253   : > { %v1526_v60 = vpop.permute.xlu1 %1525  ;;  %v1668_v41 = vpop.permute.xlu0 %1667 }
 0x254   : > { %4407 = vmatmul.mubr.msk.bf16.gmra.mrb[20].mxu1 %vm1340_vm0, %v1299_v26  ;;  %1563 = vmatprep.subr.bf16.mxu1 %v1526_v60  ;;  %v1539_v62 = vsel %vm894_vm4, %v1524_v37, %v1526_v60 }
 0x255   : > { %1564 = vmatpush1.bf16.msra.mxu1 %v1539_v62  ;;  %1405 = vmatprep.mubr.bf16.mxu1 %v4991_v5 }
 0x257   : > { %v1530_v0 = vpop.permute.xlu1 %1529  ;;  %v1678_v46 = vpop.permute.xlu0 %1677 }
 0x258   : > { %1565 = vmatprep.subr.bf16.mxu1 %v1530_v0  ;;  %v1540_v1 = vsel %vm894_vm4, %v1528_v57, %v1530_v0 }
 0x259   : > { %1566 = vmatpush1.bf16.msra.mxu1 %v1540_v1 }
 0x25a   : > { %1567 = vmatprep.subr.bf16.mxu1 %v1534_v63 }
 0x25b   : > { %v1532_v2 = vpop.permute.xlu1 %1531  ;;  %v1688_v57 = vpop.permute.xlu0 %1687 }
 0x25c   : > { %v1541_v3 = vsel %vm894_vm4, %v1532_v2, %v1534_v63  ;;  %4408 = vmatmul.mubr.msk.bf16.gmra.mrb[24].mxu1 %vm1340_vm0, %v1301_v58 }
 0x25d   : > { %1568 = vmatpush1.bf16.msra.mxu1 %v1541_v3  ;;  %1415 = vmatprep.mubr.bf16.mxu1 %v4991_v5 }
 0x25e   : > { %1569 = vmatprep.subr.bf16.mxu1 %v1538_v4 }
 0x25f   : > { %v1536_v7 = vpop.permute.xlu1 %1535 }
 0x260   : > { %v1542_v39 = vsel %vm894_vm4, %v1536_v7, %v1538_v4 }
 0x261   : > { %1570 = vmatpush1.bf16.msra.mxu1 %v1542_v39 }
 0x264   : > { %4409 = vmatmul.mubr.msk.bf16.gmra.mrb[28].mxu1 %vm1340_vm0, %v1303_v59 }
 0x265   : > { %1595 = vmatprep.mubr.bf16.mxu1 %v4991_v5 }
 0x26c   : > { %4430 = vmatmul.mubr.msk.bf16.vlgmr.msra.gmra.mrb[32].mxu1 %vm1340_vm0, %v4766_v8 }
 0x26d   : > { %1605 = vmatprep.mubr.bf16.mxu1 %v4991_v5 }
 0x270   : > { %v1663_v49 = vpop.permute.xlu1 %1662 }
 0x274   : > { %4431 = vmatmul.mubr.msk.bf16.gmra.mrb[36].mxu1 %vm1340_vm0, %v4760_v6  ;;  %v1673_v2 = vpop.permute.xlu1 %1672  ;;  %v1698_v6 = vpop.permute.xlu0 %1697 }
 0x275   : > { %1615 = vmatprep.mubr.bf16.mxu1 %v4991_v5 }
 0x27c   : > { %4432 = vmatmul.mubr.msk.bf16.gmra.mrb[40].mxu1 %vm1340_vm0, %v4769_v43 }
 0x27d   : > { %1625 = vmatprep.mubr.bf16.mxu1 %v4991_v5 }
 0x284   : > { %4433 = vmatmul.mubr.msk.bf16.gmra.mrb[44].mxu1 %vm1340_vm0, %v4763_v9 }
 0x285   : > { %2158 = vmatprep.mubr.bf16.mxu1 %v4991_v5 }
 0x2aa   : > { %v4618_v11 = vpop.f32.mrb[32].mxu0 }
 0x2ab   : > { %v1472_v12 = vpop.f32.mrb[33].mxu0 }
 0x2ac   : > { %v4619_v15 = vpop.f32.mrb[34].mxu0 }
 0x2ad   : > { %v1476_v17 = vpop.f32.mrb[35].mxu0 }
 0x2b2   : > { %v4622_v18 = vpop.f32.mrb[36].mxu0 }
 0x2b3   : > { %v1492_v19 = vpop.f32.mrb[37].mxu0 }
 0x2b4   : > { %v4623_v20 = vpop.f32.mrb[38].mxu0 }
 0x2b5   : > { %v1496_v56 = vpop.f32.mrb[39].mxu0 }
 0x31f   : > { %v1387_v10 = vpop.f32.mrb[16].mxu1 }
 0x320   : > { %v1473_v22 = vadd.f32 %v1472_v12, %v1387_v10  ;;  %v1389_v24 = vpop.f32.mrb[17].mxu1  ;;  %v1683_v10 = vpop.permute.xlu1 %1682 }
 0x321   : > { %v1391_v61 = vpop.f32.mrb[18].mxu1 }
 0x322   : > { %v1477_v25 = vadd.f32 %v1476_v17, %v1391_v61  ;;  %v1393_v28 = vpop.f32.mrb[19].mxu1  ;;  %v5433_v17 = vpop.permute.xlu0 %1942 }
 0x323   : > { %1974 = vmatprep.subr.bf16.mxu0 %v5433_v17 }
 0x327   : > { %v1397_v29 = vpop.f32.mrb[20].mxu1 }
 0x328   : > { %v1483_v30 = vadd.f32 %v4618_v11, %v1397_v29  ;;  %v1399_v14 = vpop.f32.mrb[21].mxu1  ;;  %v5438_v29 = vpop.permute.xlu0 %1946 }
 0x329   : > { %v1401_v31 = vpop.f32.mrb[22].mxu1 }
 0x32a   : > { %v1487_v32 = vadd.f32 %v4619_v15, %v1401_v31  ;;  %v1403_v27 = vpop.f32.mrb[23].mxu1 }
 0x32f   : > { %v1407_v33 = vpop.f32.mrb[24].mxu1 }
 0x330   : > { %v1493_v16 = vadd.f32 %v1492_v19, %v1407_v33  ;;  %v1409_v21 = vpop.f32.mrb[25].mxu1 }
 0x331   : > { %v1411_v34 = vpop.f32.mrb[26].mxu1 }
 0x332   : > { %v1497_v35 = vadd.f32 %v1496_v56, %v1411_v34  ;;  %v1413_v36 = vpop.f32.mrb[27].mxu1 }
 0x333   : > { %v5444_v36 = vpop.permute.xlu0 %1950 }
 0x337   : > { %v1417_v52 = vpop.f32.mrb[28].mxu1 }
 0x338   : > { %v5417_v38 = vadd.f32 %v4622_v18, %v1417_v52  ;;  %v1419_v40 = vpop.f32.mrb[29].mxu1 }
 0x339   : > { %v1421_v42 = vpop.f32.mrb[30].mxu1 }
 0x33a   : > { %v5419_v44 = vadd.f32 %v4623_v20, %v1421_v42  ;;  %v1423_v45 = vpop.f32.mrb[31].mxu1  ;;  %v1693_v42 = vpop.permute.xlu1 %1692 }
 0x33f   : > { %v1597_v47 = vpop.f32.mrb[32].mxu1 }
 0x340   : > { %v1636_v23 = vadd.f32 %v1597_v47, %v1473_v22  ;;  %v1599_v48 = vpop.f32.mrb[33].mxu1 }
 0x341   : > { %v1601_v50 = vpop.f32.mrb[34].mxu1 }
 0x342   : > { %v5421_v26 = vadd.f32 %v1663_v49, %v1636_v23  ;;  %v1638_v53 = vadd.f32 %v1601_v50, %v1477_v25  ;;  %v1603_v54 = vpop.f32.mrb[35].mxu1  ;;  %v5450_v49 = vpop.permute.xlu0 %1954 }
 0x344   : > { %v1716_v37 = vand.u32 2147483647, %v5421_v26  ;;  %v5424_v55 = vadd.f32 %v1668_v41, %v1638_v53  ;;  %vm1780_vm2 = vcmp.ge.f32.partialorder %v5421_v26, 0.0 }
 0x346   : > { %v1732_v58 = vsub.f32 0.0, %v1716_v37  ;;  %v1718_v59 = vand.u32 2147483647, %v5424_v55  ;;  %v1878_v37 = vadd.s32 4294967291, %v5243_v13  ;;  %vm1782_vm7 = vcmp.ge.f32.partialorder %v5424_v55, 0.0 }
 0x347   : > { %v1607_v60 = vpop.f32.mrb[36].mxu1 }
 0x348   : > { %v1748_v62 = vmul.f32 1.442695, %v1732_v58  ;;  %v1734_v63 = vsub.f32 0.0, %v1718_v59  ;;  %v1640_v0 = vadd.f32 %v1607_v60, %v1483_v30  ;;  %v1609_v1 = vpop.f32.mrb[37].mxu1  ;;  %vm1880_vm5 = vcmp.ge.s32.totalorder %v1878_v37, 0 }
 0x349   : > { %v1611_v3 = vpop.f32.mrb[38].mxu1  ;;  %vm1882_vm6 = vcmp.lt.s32.totalorder %v1878_v37, 16 }
 0x34a   : > { %4830 = vpow2.f32 %v1748_v62  ;;  %v1752_v4 = vmul.f32 1.442695, %v1734_v63  ;;  %v5427_v7 = vadd.f32 %v1673_v2, %v1640_v0  ;;  %v1642_v39 = vadd.f32 %v1611_v3, %v1487_v32  ;;  %v1613_v8 = vpop.f32.mrb[39].mxu1  ;;  %v5457_v62 = vpop.permute.xlu0 %2094  ;;  %vm5463_vm8 = vmand %vm1880_vm5, %vm1882_vm6 }
 0x34b   : > { %2126 = vmatprep.subr.bf16.mxu1 %v5457_v62  ;;  %vm5654_vm15 = vmpackc.low %vm5463_vm8, %vm5463_vm8 }
 0x34c   : > { %4832 = vpow2.f32 %v1752_v4  ;;  %v1720_v43 = vand.u32 2147483647, %v5427_v7  ;;  %v5430_v9 = vadd.f32 %v1678_v46, %v1642_v39  ;;  %vm1784_vm9 = vcmp.ge.f32.partialorder %v5427_v7, 0.0 }
 0x34e   : > { %v1736_v11 = vsub.f32 0.0, %v1720_v43  ;;  %v1722_v12 = vand.u32 2147483647, %v5430_v9  ;;  %vm1786_vm10 = vcmp.ge.f32.partialorder %v5430_v9, 0.0 }
 0x34f   : > { %v1617_v15 = vpop.f32.mrb[40].mxu1 }
 0x350   : > { %v1756_v18 = vmul.f32 1.442695, %v1736_v11  ;;  %v1738_v19 = vsub.f32 0.0, %v1722_v12  ;;  %v1644_v20 = vadd.f32 %v1617_v15, %v1493_v16  ;;  %v1619_v56 = vpop.f32.mrb[41].mxu1 }
 0x351   : > { %v1621_v22 = vpop.f32.mrb[42].mxu1 }
 0x352   : > { %4834 = vpow2.f32 %v1756_v18  ;;  %v1760_v24 = vmul.f32 1.442695, %v1738_v19  ;;  %v5436_v61 = vadd.f32 %v1683_v10, %v1644_v20  ;;  %v1646_v25 = vadd.f32 %v1621_v22, %v1497_v35  ;;  %v1623_v28 = vpop.f32.mrb[43].mxu1 }
 0x354   : > { %v4831_v30 = vpop.eup %4830  ;;  %4836 = vpow2.f32 %v1760_v24  ;;  %v1724_v14 = vand.u32 2147483647, %v5436_v61  ;;  %v5441_v31 = vadd.f32 %v1688_v57, %v1646_v25  ;;  %vm1788_vm11 = vcmp.ge.f32.partialorder %v5436_v61, 0.0 }
 0x355   : > { %v1812_v32 = vadd.f32 1.0, %v4831_v30  ;;  %v1796_v1 = vsel %vm1780_vm2, 1.0, %v4831_v30 }
 0x356   : > { %v4833_v27 = vpop.eup %4832  ;;  %v1740_v33 = vsub.f32 0.0, %v1724_v14  ;;  %v1726_v16 = vand.u32 2147483647, %v5441_v31  ;;  %vm1790_vm12 = vcmp.ge.f32.partialorder %v5441_v31, 0.0 }
 0x357   : > { %v1814_v21 = vadd.f32 1.0, %v4833_v27  ;;  %v1627_v34 = vpop.f32.mrb[44].mxu1  ;;  %4838 = vrcp.f32 %v1812_v32  ;;  %v1798_v39 = vsel %vm1782_vm7, 1.0, %v4833_v27 }
 0x358   : > { %v1764_v35 = vmul.f32 1.442695, %v1740_v33  ;;  %v1742_v52 = vsub.f32 0.0, %v1726_v16  ;;  %v1648_v40 = vadd.f32 %v1627_v34, %v5417_v38  ;;  %v1629_v41 = vpop.f32.mrb[45].mxu1 }
 0x359   : > { %v1631_v45 = vpop.f32.mrb[46].mxu1  ;;  %4840 = vrcp.f32 %v1814_v21 }
 0x35a   : > { %4842 = vpow2.f32 %v1764_v35  ;;  %v1768_v46 = vmul.f32 1.442695, %v1742_v52  ;;  %v5447_v47 = vadd.f32 %v1693_v42, %v1648_v40  ;;  %v1650_v23 = vadd.f32 %v1631_v45, %v5419_v44  ;;  %v1633_v48 = vpop.f32.mrb[47].mxu1 }
 0x35c   : > { %v4835_v50 = vpop.eup %4834  ;;  %4844 = vpow2.f32 %v1768_v46  ;;  %v1728_v53 = vand.u32 2147483647, %v5447_v47  ;;  %v5453_v54 = vadd.f32 %v1698_v6, %v1650_v23  ;;  %vm1792_vm13 = vcmp.ge.f32.partialorder %v5447_v47, 0.0 }
 0x35d   : > { %v1816_v38 = vadd.f32 1.0, %v4835_v50  ;;  %v1800_v22 = vsel %vm1784_vm9, 1.0, %v4835_v50 }
 0x35e   : > { %v4837_v57 = vpop.eup %4836  ;;  %v1744_v58 = vsub.f32 0.0, %v1728_v53  ;;  %v1730_v59 = vand.u32 2147483647, %v5453_v54  ;;  %vm1794_vm14 = vcmp.ge.f32.partialorder %v5453_v54, 0.0 }
 0x35f   : > { %v1818_v60 = vadd.f32 1.0, %v4837_v57  ;;  %4846 = vrcp.f32 %v1816_v38  ;;  %v1802_v28 = vsel %vm1786_vm10, 1.0, %v4837_v57 }
 0x360   : > { %v1772_v44 = vmul.f32 1.442695, %v1744_v58  ;;  %v1746_v63 = vsub.f32 0.0, %v1730_v59 }
 0x361   : > { %v4839_v0 = vpop.eup %4838  ;;  %4848 = vrcp.f32 %v1818_v60 }
 0x362   : > { %4850 = vpow2.f32 %v1772_v44  ;;  %v1776_v2 = vmul.f32 1.442695, %v1746_v63  ;;  %v1844_v3 = vmul.f32 %v4839_v0, %v1796_v1 }
 0x363   : > { %v4841_v4 = vpop.eup %4840 }
 0x364   : > { %v4843_v8 = vpop.eup %4842  ;;  %4852 = vpow2.f32 %v1776_v2  ;;  %v1846_v6 = vmul.f32 %v4841_v4, %v1798_v39  ;;  %v1860_v43 = vmul.f32 %v1844_v3, %v5421_v26  ;;  %v2190_v39 = vld [vmem:[%s6267_s7 + $0x18] sm:$0xff] }
 0x365   : > { %v1820_v11 = vadd.f32 1.0, %v4843_v8 }
 0x366   : > { %v4845_v15 = vpop.eup %4844  ;;  %v1862_v18 = vmul.f32 %v1846_v6, %v5424_v55  ;;  %v1890_v20 = vsel %vm5463_vm8, %v1860_v43, 0.0  ;;  %v2332_v6 = vld [vmem:[%s6269_s9 + $0x18] sm:$0xff] }
 0x367   : > { %v1822_v19 = vadd.f32 1.0, %v4845_v15  ;;  %4854 = vrcp.f32 %v1820_v11  ;;  %v1806_v45 = vsel %vm1790_vm12, 1.0, %v4845_v15  ;;  %v2189_v11 = vld [vmem:[%s6267_s7 + $0x10] sm:$0xff]  ;;  %v2329_v15 = vld [vmem:[%s6269_s9] sm:$0xff] }
 0x368   : > { %v1892_v56 = vsel %vm5463_vm8, %v1862_v18, 0.0  ;;  %v5473_v10 = vpack.c.bf16 %v1862_v18, %v1860_v43  ;;  %v2187_v43 = vld [vmem:[%s6267_s7] sm:$0xff]  ;;  %v2331_v18 = vld [vmem:[%s6269_s9 + $0x10] sm:$0xff] }
 0x369   : > { %v4847_v26 = vpop.eup %4846  ;;  %v1906_v24 = vpack.c.bf16 %v1892_v56, %v1890_v20  ;;  %4856 = vrcp.f32 %v1822_v19  ;;  %v5567_v19 = vld [vmem:[%s6270_s10] sm:$0xff]   ;;  %v5574_v20 = vld [vmem:[%s6270_s10 + $0x8] sm:$0xff]  }
 0x36a   : > { %v1848_v25 = vmul.f32 %v4847_v26, %v1800_v22  ;;  %v2683_v56 = vld [vmem:[%s6271_s11 + $0x8] sm:$0xff]  ;;  %v2685_v26 = vld [vmem:[%s6271_s11 + $0x18] sm:$0xff]  ;;  %v5595_v22 = vld [vmem:[%s6272_s12] sm:$0xff]  }
 0x36b   : > { %v4849_v55 = vpop.eup %4848  ;;  %1940 = vrot.lane.b32.xlu1 %v1906_v24, %s4992_s27 }
 0x36c   : > { %v4851_v30 = vpop.eup %4850  ;;  %v1850_v14 = vmul.f32 %v4849_v55, %v1802_v28  ;;  %v1864_v32 = vmul.f32 %v1848_v25, %v5427_v7  ;;  %v1804_v7 = vsel %vm1788_vm11, 1.0, %v4843_v8  ;;  %v2330_v8 = vld [vmem:[%s6269_s9 + $0x8] sm:$0xff]  ;;  %v5609_v25 = vld [vmem:[%s6272_s12 + $0x10] sm:$0xff]   ;;  %v5616_v55 = vld [vmem:[%s6272_s12 + $0x18] sm:$0xff]  }
 0x36d   : > { %v1824_v27 = vadd.f32 1.0, %v4851_v30  ;;  %v1808_v57 = vsel %vm1792_vm13, 1.0, %v4851_v30  ;;  %v3168_v28 = vld [vmem:[%s6273_s13 + $0x8] sm:$0xff]  ;;  %v3170_v30 = vld [vmem:[%s6273_s13 + $0x18] sm:$0xff] }
 0x36e   : > { %v4853_v33 = vpop.eup %4852  ;;  %v1866_v16 = vmul.f32 %v1850_v14, %v5430_v9  ;;  %v1894_v34 = vsel %vm5463_vm8, %v1864_v32, 0.0  ;;  %v3172_v14 = vld [vmem:[%s6273_s13 + $0x28] sm:$0xff] }
 0x36f   : > { %v1826_v21 = vadd.f32 1.0, %v4853_v33  ;;  %2092 = vrot.lane.b32.xlu1 %v1906_v24, %s4993_s18  ;;  %4858 = vrcp.f32 %v1824_v27  ;;  %v5602_v24 = vld [vmem:[%s6272_s12 + $0x8] sm:$0xff]  }
 0x370   : > { %v1896_v35 = vsel %vm5463_vm8, %v1866_v16, 0.0  ;;  %v5485_v52 = vpack.c.bf16 %v1866_v16, %v1864_v32 }
 0x371   : > { %v4855_v40 = vpop.eup %4854  ;;  %v1908_v41 = vpack.c.bf16 %v1896_v35, %v1894_v34  ;;  %4860 = vrcp.f32 %v1826_v21 }
 0x372   : > { %v1852_v9 = vmul.f32 %v4855_v40, %v1804_v7 }
 0x373   : > { %v4857_v42 = vpop.eup %4856  ;;  %2096 = vrot.lane.b32.xlu0 %v1908_v41, %s4993_s18  ;;  %1944 = vrot.lane.b32.xlu1 %v1908_v41, %s4992_s27 }
 0x374   : > { %v1854_v46 = vmul.f32 %v4857_v42, %v1806_v45  ;;  %v1868_v23 = vmul.f32 %v1852_v9, %v5436_v61  ;;  %v1810_v61 = vsel %vm1794_vm14, 1.0, %v4853_v33  ;;  %v3174_v33 = vld [vmem:[%s6273_s13 + $0x38] sm:$0xff] }
 0x376   : > { %v1870_v48 = vmul.f32 %v1854_v46, %v5441_v31  ;;  %v1898_v50 = vsel %vm5463_vm8, %v1868_v23, 0.0  ;;  %v5505_v31 = vld [vmem:[%s6266_s6 + $0x10] ss:$8 sps:$4 sm:$0xff]  }
 0x378   : > { %v1900_v53 = vsel %vm5463_vm8, %v1870_v48, 0.0  ;;  %v5497_v38 = vpack.c.bf16 %v1870_v48, %v1868_v23  ;;  %v4775_v23 = vld [vmem:[%s6266_s6 + $0x4] ss:$8 sps:$4 sm:$0xff]  }
 0x379   : > { %v4859_v37 = vpop.eup %4858  ;;  %v1910_v58 = vpack.c.bf16 %v1900_v53, %v1898_v50  ;;  %v4772_v50 = vld [vmem:[%s6266_s6 + $0x14] ss:$8 sps:$4 sm:$0xff]   ;;  %v4782_v53 = vld [vmem:[%s6268_s8] sm:$0xff]  }
 0x37a   : > { %v1856_v59 = vmul.f32 %v4859_v37, %v1808_v57 }
 0x37b   : > { %v4861_v60 = vpop.eup %4860  ;;  %2100 = vrot.lane.b32.xlu0 %v1910_v58, %s4993_s18  ;;  %1948 = vrot.lane.b32.xlu1 %v1910_v58, %s4992_s27 }
 0x37c   : > { %v1858_v44 = vmul.f32 %v4861_v60, %v1810_v61  ;;  %v1872_v63 = vmul.f32 %v1856_v59, %v5447_v47  ;;  %v5523_v47 = vld [vmem:[%s6266_s6] ss:$8 sps:$4 sm:$0xff]  }
 0x37e   : > { %v1874_v0 = vmul.f32 %v1858_v44, %v5453_v54  ;;  %v1902_v1 = vsel %vm5463_vm8, %v1872_v63, 0.0  ;;  %v2188_v54 = vld [vmem:[%s6267_s7 + $0x8] sm:$0xff] }
 0x37f   : > { %1930 = vrot.lane.b32.xlu0 %v5505_v31, %s4996_s0 }
 0x380   : > { %v1904_v2 = vsel %vm5463_vm8, %v1874_v0, 0.0  ;;  %v5515_v3 = vpack.c.bf16 %v1874_v0, %v1872_v63 }
 0x381   : > { %v1912_v4 = vpack.c.bf16 %v1904_v2, %v1902_v1 }
 0x383   : > { %2106 = vrot.lane.b32.xlu0 %v4995_v51, %s4993_s18  ;;  %1952 = vrot.lane.b32.xlu1 %v1912_v4, %s4992_s27 }
 0x387   : > { %2198 = vperm.xlu0 %4750, %v2188_v54   ;;  %1928 = vrot.lane.b32.xlu1 %v5523_v47, %s4996_s0 }
 0x38b   : > { %2208 = vperm.xlu0 %4750, %v2190_v39   ;;  %2098 = vrot.lane.b32.xlu1 %v4995_v51, %s4993_s18 }
 0x38f   : > { %2340 = vperm.xlu0 %4750, %v2330_v8   ;;  %2102 = vrot.lane.b32.xlu1 %v4995_v51, %s4993_s18 }
 0x393   : > { %2350 = vperm.xlu0 %4750, %v2332_v6   ;;  %2104 = vrot.lane.b32.xlu1 %v1912_v4, %s4993_s18 }
 0x397   : > { %2467 = vrot.lane.b32.xlu0 %v4995_v51, %s4992_s27  ;;  %2193 = vperm.xlu1 %4751, %v2187_v43  }
 0x39b   : > { %2603 = vrot.lane.b32.xlu0 %v4995_v51, %s4993_s18  ;;  %2203 = vperm.xlu1 %4751, %v2189_v11  }
 0x39f   : > { %2471 = vrot.lane.b32.xlu0 %v4995_v51, %s4992_s27  ;;  %2335 = vperm.xlu1 %4751, %v2329_v15  }
 0x3a3   : > { %2607 = vrot.lane.b32.xlu0 %v4995_v51, %s4993_s18  ;;  %2345 = vperm.xlu1 %4751, %v2331_v18  }
 0x3a7   : > { %2597 = vrot.lane.b32.xlu0 %v5567_v19, %s4996_s0 }
 0x3ab   : > { %2599 = vrot.lane.b32.xlu0 %v5574_v20, %s4996_s0 }
 0x3af   : > { %2693 = vperm.xlu0 %4750, %v2683_v56  }
 0x3b3   : > { %2703 = vperm.xlu0 %4750, %v2685_v26  }
 0x3b7   : > { %2862 = vrot.lane.b32.xlu0 %v4995_v51, %s4992_s27 }
 0x3bb   : > { %3054 = vrot.lane.b32.xlu0 %v4995_v51, %s4993_s18 }
 0x3bf   : > { %2866 = vrot.lane.b32.xlu0 %v4995_v51, %s4992_s27 }
 0x3c3   : > { %3058 = vrot.lane.b32.xlu0 %v4995_v51, %s4993_s18 }
 0x3c7   : > { %3044 = vrot.lane.b32.xlu0 %v5595_v22, %s4996_s0 }
 0x3cb   : > { %3046 = vrot.lane.b32.xlu0 %v5602_v24, %s4996_s0 }
 0x3cf   : > { %3048 = vrot.lane.b32.xlu0 %v5609_v25, %s4996_s0 }
 0x3d3   : > { %3050 = vrot.lane.b32.xlu0 %v5616_v55, %s4996_s0 }
 0x3d7   : > { %3182 = vperm.xlu0 %4750, %v3168_v28  }
 0x3db   : > { %3192 = vperm.xlu0 %4750, %v3170_v30  }
 0x3dd   : > { %v1941_v32 = vpop.permute.xlu1 %1940 }
 0x3de   : > { %v1956_v27 = vsel %vm696_vm3, %v1941_v32, %v5433_v17 }
 0x3df   : > { %3202 = vperm.xlu0 %4750, %v3172_v14   ;;  %1975 = vmatpush1.bf16.msra.mxu0 %v1956_v27 }
 0x3e0   : > { %1976 = vmatprep.subr.bf16.mxu0 %v5438_v29 }
 0x3e1   : > { %v2093_v16 = vpop.permute.xlu1 %2092 }
 0x3e2   : > { %v2108_v21 = vsel %vm894_vm4, %v2093_v16, %v5457_v62 }
 0x3e3   : > { %3212 = vperm.xlu0 %4750, %v3174_v33   ;;  %2127 = vmatpush1.bf16.msra.mxu1 %v2108_v21 }
 0x3e5   : > { %v1945_v34 = vpop.permute.xlu1 %1944 }
 0x3e6   : > { %v1957_v35 = vsel %vm696_vm3, %v1945_v34, %v5438_v29  ;;  %v2097_v29 = vpop.permute.xlu0 %2096 }
 0x3e7   : > { %1977 = vmatpush1.bf16.msra.mxu0 %v1957_v35  ;;  %3475 = vrot.lane.b32.xlu0 %v4995_v51, %s4992_s27 }
 0x3e8   : > { %1978 = vmatprep.subr.bf16.mxu0 %v5444_v36 }
 0x3eb   : > { %3479 = vrot.lane.b32.xlu0 %v4995_v51, %s4992_s27 }
 0x3ed   : > { %v1949_v17 = vpop.permute.xlu1 %1948  ;;  %v2101_v41 = vpop.permute.xlu0 %2100 }
 0x3ee   : > { %v1958_v40 = vsel %vm696_vm3, %v1949_v17, %v5444_v36 }
 0x3ef   : > { %1979 = vmatpush1.bf16.msra.mxu0 %v1958_v40  ;;  %3483 = vrot.lane.b32.xlu0 %v4995_v51, %s4992_s27 }
 0x3f0   : > { %1980 = vmatprep.subr.bf16.mxu0 %v5450_v49 }
 0x3f1   : > { %v1931_v12 = vpop.permute.xlu0 %1930 }
 0x3f3   : > { %3487 = vrot.lane.b32.xlu0 %v4995_v51, %s4992_s27 }
 0x3f5   : > { %v1953_v62 = vpop.permute.xlu1 %1952  ;;  %v2107_v46 = vpop.permute.xlu0 %2106 }
 0x3f6   : > { %v1959_v36 = vsel %vm696_vm3, %v1953_v62, %v5450_v49 }
 0x3f7   : > { %1981 = vmatpush1.bf16.msra.mxu0 %v1959_v36 }
 0x3f8   : > { %4624 = vmatprep.subr.msk.bf16.mxu0 %vm5654_vm15, %v5473_v10 }
 0x3f9   : > { %v1929_v9 = vpop.permute.xlu1 %1928 }
 0x3fa   : > { %4436 = vmatmul.mubr.msk.bf16.vlgmr.msra.gmra.mrb[40].mxu0 %vm1340_vm0, %v1929_v9 }
 0x3fb   : > { %4625 = vmatpush3.bf16.msk.msra.mxu0 %vm5654_vm15, %v5473_v10  ;;  %2016 = vmatprep.mubr.bf16.mxu0 %v4991_v5 }
 0x3fc   : > { %4626 = vmatprep.subr.msk.bf16.mxu0 %vm5654_vm15, %v5485_v52 }
 0x3fd   : > { %v2099_v49 = vpop.permute.xlu1 %2098 }
 0x3fe   : > { %2128 = vmatprep.subr.bf16.mxu1 %v2099_v49  ;;  %v2109_v42 = vsel %vm894_vm4, %v2097_v29, %v2099_v49 }
 0x3ff   : > { %4627 = vmatpush3.bf16.msk.msra.mxu0 %vm5654_vm15, %v5485_v52  ;;  %2129 = vmatpush1.bf16.msra.mxu1 %v2109_v42 }
 0x400   : > { %4628 = vmatprep.subr.msk.bf16.mxu0 %vm5654_vm15, %v5497_v38 }
 0x401   : > { %v2103_v10 = vpop.permute.xlu1 %2102 }
 0x402   : > { %v2110_v45 = vsel %vm894_vm4, %v2101_v41, %v2103_v10  ;;  %4437 = vmatmul.mubr.msk.bf16.gmra.mrb[44].mxu0 %vm1340_vm0, %v1931_v12  ;;  %2130 = vmatprep.subr.bf16.mxu1 %v2103_v10 }
 0x403   : > { %4629 = vmatpush3.bf16.msk.msra.mxu0 %vm5654_vm15, %v5497_v38  ;;  %2131 = vmatpush1.bf16.msra.mxu1 %v2110_v45 }
 0x404   : > { %4630 = vmatprep.subr.msk.bf16.mxu0 %vm5654_vm15, %v5515_v3  ;;  %2132 = vmatprep.subr.bf16.mxu1 %v2107_v46 }
 0x405   : > { %v2105_v52 = vpop.permute.xlu1 %2104  ;;  %4632 = vmatprep.mubr.msk.bf16.mxu0 %vm1340_vm0, %v5523_v47 }
 0x406   : > { %v2111_v48 = vsel %vm894_vm4, %v2105_v52, %v2107_v46  ;;  %v2199_v15 = vpop.permute.xlu0 %2198 }
 0x407   : > { %4631 = vmatpush3.bf16.msk.msra.mxu0 %vm5654_vm15, %v5515_v3  ;;  %2133 = vmatpush1.bf16.msra.mxu1 %v2111_v48 }
 0x40a   : > { %4633 = vmatmul.mubr.msk.bf16.vlgmr.msra.gmra.mrb[48].mxu0 %vm1340_vm0, %v5505_v31  ;;  %4454 = vmatmul.mubr.msk.bf16.vlgmr.msra.gmra.mrb[48].mxu1 %vm1340_vm0, %v4775_v23  ;;  %v2209_v40 = vpop.permute.xlu0 %2208 }
 0x40b   : > { %2168 = vmatprep.mubr.bf16.mxu1 %v4991_v5  ;;  %4640 = vmatprep.mubr.msk.bf16.mxu0 %vm2363_vm1, %v4782_v53 }
 0x412   : > { %4455 = vmatmul.mubr.msk.bf16.gmra.mrb[52].mxu1 %vm1340_vm0, %v4772_v50 }
 0x413   : > { %4648 = vmatprep.mubr.msk.bf16.mxu1 %vm2363_vm1, %v5567_v19 }
 0x416   : > { %v2194_v6 = vpop.permute.xlu1 %2193 }
 0x41a   : > { %v2204_v27 = vpop.permute.xlu1 %2203 }
 0x4cd   : > { %v2008_v38 = vpop.f32.mrb[40].mxu0 }
 0x4ce   : > { %v2010_v37 = vpop.f32.mrb[41].mxu0 }
 0x4cf   : > { %v2012_v57 = vpop.f32.mrb[42].mxu0  ;;  %v2301_v37 = vadd.s32 4294967292, %v5243_v13 }
 0x4d0   : > { %v2014_v58 = vpop.f32.mrb[43].mxu0 }
 0x4d1   : > { %vm2303_vm5 = vcmp.ge.s32.totalorder %v2301_v37, 0  ;;  %vm2305_vm6 = vcmp.lt.s32.totalorder %v2301_v37, 16 }
 0x4d2   : > { %vm5710_vm8 = vmand %vm2303_vm5, %vm2305_vm6 }
 0x4d3   : > { %vm5717_vm11 = vmpackc.low %vm5710_vm8, %vm5710_vm8 }
 0x4d5   : > { %v2018_v59 = vpop.f32.mrb[44].mxu0 }
 0x4d6   : > { %v2020_v60 = vpop.f32.mrb[45].mxu0 }
 0x4d7   : > { %v2022_v61 = vpop.f32.mrb[46].mxu0 }
 0x4d8   : > { %v2024_v31 = vpop.f32.mrb[47].mxu0 }
 0x4d9   : > { %v2341_v31 = vpop.permute.xlu0 %2340 }
 0x4dd   : > { %v4634_v44 = vpop.f32.mrb[48].mxu0  ;;  %v2160_v63 = vpop.f32.mrb[48].mxu1 }
 0x4de   : > { %v2078_v0 = vadd.f32 %v4634_v44, %v2018_v59  ;;  %v2067_v1 = vpop.f32.mrb[49].mxu0  ;;  %v2162_v2 = vpop.f32.mrb[49].mxu1 }
 0x4df   : > { %v2068_v3 = vadd.f32 %v2067_v1, %v2008_v38  ;;  %v4635_v4 = vpop.f32.mrb[50].mxu0  ;;  %v2164_v47 = vpop.f32.mrb[50].mxu1 }
 0x4e0   : > { %v2082_v54 = vadd.f32 %v4635_v4, %v2022_v61  ;;  %v2071_v39 = vpop.f32.mrb[51].mxu0  ;;  %v2166_v8 = vpop.f32.mrb[51].mxu1 }
 0x4e1   : > { %v2179_v43 = vadd.f32 %v2160_v63, %v2068_v3  ;;  %v2072_v11 = vadd.f32 %v2071_v39, %v2012_v57 }
 0x4e3   : > { %v2211_v18 = vadd.f32 %v2194_v6, %v2179_v43  ;;  %v2181_v56 = vadd.f32 %v2164_v47, %v2072_v11  ;;  %v2351_v43 = vpop.permute.xlu0 %2350 }
 0x4e5   : > { %v2219_v26 = vand.u32 2147483647, %v2211_v18  ;;  %v2213_v28 = vadd.f32 %v2199_v15, %v2181_v56  ;;  %v2170_v30 = vpop.f32.mrb[52].mxu1  ;;  %vm2251_vm2 = vcmp.ge.f32.partialorder %v2211_v18, 0.0  ;;  %v4783_v56 = vld [vmem:[%s6268_s8 + $0x8] sm:$0xff]  }
 0x4e6   : > { %v2183_v14 = vadd.f32 %v2170_v30, %v2078_v0  ;;  %v2172_v32 = vpop.f32.mrb[53].mxu1 }
 0x4e7   : > { %v2227_v33 = vsub.f32 0.0, %v2219_v26  ;;  %v2221_v16 = vand.u32 2147483647, %v2213_v28  ;;  %v2174_v21 = vpop.f32.mrb[54].mxu1  ;;  %vm2253_vm7 = vcmp.ge.f32.partialorder %v2213_v28, 0.0  ;;  %v2468_v26 = vpop.permute.xlu0 %2467 }
 0x4e8   : > { %v2215_v34 = vadd.f32 %v2204_v27, %v2183_v14  ;;  %v2185_v35 = vadd.f32 %v2174_v21, %v2082_v54  ;;  %v2176_v17 = vpop.f32.mrb[55].mxu1 }
 0x4e9   : > { %v2235_v29 = vmul.f32 1.442695, %v2227_v33  ;;  %v2229_v62 = vsub.f32 0.0, %v2221_v16 }
 0x4ea   : > { %v2223_v7 = vand.u32 2147483647, %v2215_v34  ;;  %v2217_v36 = vadd.f32 %v2209_v40, %v2185_v35  ;;  %vm2255_vm9 = vcmp.ge.f32.partialorder %v2215_v34, 0.0 }
 0x4eb   : > { %4862 = vpow2.f32 %v2235_v29  ;;  %v2239_v41 = vmul.f32 1.442695, %v2229_v62 }
 0x4ec   : > { %v2231_v9 = vsub.f32 0.0, %v2223_v7  ;;  %v2225_v49 = vand.u32 2147483647, %v2217_v36  ;;  %vm2257_vm10 = vcmp.ge.f32.partialorder %v2217_v36, 0.0 }
 0x4ed   : > { %4864 = vpow2.f32 %v2239_v41 }
 0x4ee   : > { %v2243_v12 = vmul.f32 1.442695, %v2231_v9  ;;  %v2233_v42 = vsub.f32 0.0, %v2225_v49 }
 0x4f0   : > { %4866 = vpow2.f32 %v2243_v12  ;;  %v2247_v10 = vmul.f32 1.442695, %v2233_v42 }
 0x4f2   : > { %4868 = vpow2.f32 %v2247_v10 }
 0x4f5   : > { %v4863_v45 = vpop.eup %4862 }
 0x4f6   : > { %v2267_v46 = vadd.f32 1.0, %v4863_v45  ;;  %v2259_v58 = vsel %vm2251_vm2, 1.0, %v4863_v45  ;;  %v2604_v45 = vpop.permute.xlu0 %2603 }
 0x4f7   : > { %v4865_v52 = vpop.eup %4864 }
 0x4f8   : > { %4870 = vrcp.f32 %v2267_v46  ;;  %v2269_v23 = vadd.f32 1.0, %v4865_v52  ;;  %v2261_v61 = vsel %vm2253_vm7, 1.0, %v4865_v52  ;;  %v2682_v46 = vld [vmem:[%s6271_s11] sm:$0xff]  ;;  %v2684_v52 = vld [vmem:[%s6271_s11 + $0x10] sm:$0xff] }
 0x4fa   : > { %v4867_v48 = vpop.eup %4866  ;;  %4872 = vrcp.f32 %v2269_v23  ;;  %v2472_v23 = vpop.permute.xlu0 %2471 }
 0x4fb   : > { %v2271_v50 = vadd.f32 1.0, %v4867_v48  ;;  %v2263_v3 = vsel %vm2255_vm9, 1.0, %v4867_v48 }
 0x4fc   : > { %v4869_v53 = vpop.eup %4868 }
 0x4fd   : > { %4874 = vrcp.f32 %v2271_v50  ;;  %v2273_v38 = vadd.f32 1.0, %v4869_v53  ;;  %v2265_v39 = vsel %vm2257_vm10, 1.0, %v4869_v53 }
 0x4fe   : > { %v2608_v48 = vpop.permute.xlu0 %2607 }
 0x4ff   : > { %4876 = vrcp.f32 %v2273_v38 }
 0x502   : > { %v4871_v57 = vpop.eup %4870  ;;  %v2598_v50 = vpop.permute.xlu0 %2597 }
 0x503   : > { %v2283_v59 = vmul.f32 %v4871_v57, %v2259_v58 }
 0x504   : > { %v4873_v60 = vpop.eup %4872 }
 0x505   : > { %v2285_v44 = vmul.f32 %v4873_v60, %v2261_v61  ;;  %v2291_v1 = vmul.f32 %v2283_v59, %v2211_v18 }
 0x506   : > { %v2600_v53 = vpop.permute.xlu0 %2599 }
 0x507   : > { %v4875_v0 = vpop.eup %4874  ;;  %v2293_v2 = vmul.f32 %v2285_v44, %v2213_v28  ;;  %v2336_v28 = vpop.permute.xlu1 %2335 }
 0x508   : > { %v2287_v4 = vmul.f32 %v4875_v0, %v2263_v3 }
 0x509   : > { %v4877_v54 = vpop.eup %4876  ;;  %v4459_v8 = vpack.c.bf16 %v2293_v2, %v2291_v1 }
 0x50a   : > { %v2289_v6 = vmul.f32 %v4877_v54, %v2265_v39  ;;  %v2295_v11 = vmul.f32 %v2287_v4, %v2215_v34  ;;  %v2694_v38 = vpop.permute.xlu0 %2693 }
 0x50b   : > { %4636 = vmatprep.subr.msk.bf16.mxu0 %vm5717_vm11, %v4459_v8  ;;  %v2346_v30 = vpop.permute.xlu1 %2345 }
 0x50c   : > { %v2297_v15 = vmul.f32 %v2289_v6, %v2217_v36  ;;  %4637 = vmatpush3.bf16.msk.msra.mxu0 %vm5717_vm11, %v4459_v8 }
 0x50e   : > { %v4462_v18 = vpack.c.bf16 %v2297_v15, %v2295_v11 }
 0x510   : > { %4638 = vmatprep.subr.msk.bf16.mxu0 %vm5717_vm11, %v4462_v18 }
 0x511   : > { %4639 = vmatpush3.bf16.msk.msra.mxu0 %vm5717_vm11, %v4462_v18 }
 0x512   : > { %2485 = vmatprep.subr.bf16.mxu0 %v2468_v26 }
 0x514   : > { %4641 = vmatmul.mubr.msk.bf16.vlgmr.msra.gmra.mrb[52].mxu0 %vm2363_vm1, %v4783_v56 }
 0x515   : > { %2517 = vmatprep.mubr.bf16.mxu0 %v4991_v5 }
 0x5e7   : > { %v4642_v14 = vpop.f32.mrb[52].mxu0 }
 0x5e8   : > { %v2415_v32 = vadd.f32 %v4642_v14, %v2346_v30  ;;  %v2404_v27 = vpop.f32.mrb[53].mxu0 }
 0x5e9   : > { %v2405_v33 = vadd.f32 %v2404_v27, %v2336_v28  ;;  %v4643_v16 = vpop.f32.mrb[54].mxu0 }
 0x5ea   : > { %4878 = vtanh.f32 %v2415_v32  ;;  %v2419_v21 = vadd.f32 %v4643_v16, %v2351_v43  ;;  %v2408_v34 = vpop.f32.mrb[55].mxu0 }
 0x5eb   : > { %4880 = vtanh.f32 %v2405_v33  ;;  %v2409_v35 = vadd.f32 %v2408_v34, %v2341_v31 }
 0x5ec   : > { %4882 = vtanh.f32 %v2419_v21 }
 0x5ed   : > { %4884 = vtanh.f32 %v2409_v35 }
 0x5f4   : > { %v4879_v17 = vpop.eup %4878 }
 0x5f5   : > { %v4881_v40 = vpop.eup %4880  ;;  %v2435_v7 = vsel %vm5710_vm8, %v4879_v17, 0.0 }
 0x5f6   : > { %v4883_v29 = vpop.eup %4882  ;;  %v2431_v12 = vsel %vm5710_vm8, %v4881_v40, 0.0 }
 0x5f7   : > { %v4885_v62 = vpop.eup %4884  ;;  %v2437_v36 = vsel %vm5710_vm8, %v4883_v29, 0.0  ;;  %v4474_v41 = vpack.c.bf16 %v4883_v29, %v4879_v17 }
 0x5f8   : > { %v4471_v9 = vpack.c.bf16 %v4885_v62, %v4881_v40  ;;  %v2441_v49 = vpack.c.bf16 %v2437_v36, %v2435_v7  ;;  %v2433_v42 = vsel %vm5710_vm8, %v4885_v62, 0.0 }
 0x5f9   : > { %v2439_v10 = vpack.c.bf16 %v2433_v42, %v2431_v12 }
 0x5fa   : > { %4644 = vmatprep.subr.msk.bf16.mxu1 %vm5717_vm11, %v4471_v9  ;;  %2469 = vrot.lane.b32.xlu1 %v2441_v49, %s4992_s27 }
 0x5fb   : > { %4645 = vmatpush3.bf16.msk.msra.mxu1 %vm5717_vm11, %v4471_v9 }
 0x5fc   : > { %4646 = vmatprep.subr.msk.bf16.mxu1 %vm5717_vm11, %v4474_v41 }
 0x5fe   : > { %2465 = vrot.lane.b32.xlu1 %v2439_v10, %s4992_s27 }
 0x5ff   : > { %4647 = vmatpush3.bf16.msk.msra.mxu1 %vm5717_vm11, %v4474_v41 }
 0x600   : > { %2621 = vmatprep.subr.bf16.mxu1 %v2604_v45 }
 0x602   : > { %2601 = vrot.lane.b32.xlu1 %v2439_v10, %s4993_s18  ;;  %4649 = vmatmul.mubr.msk.bf16.vlgmr.msra.gmra.mrb[56].mxu1 %vm2363_vm1, %v5574_v20 }
 0x603   : > { %2653 = vmatprep.mubr.bf16.mxu1 %v4991_v5 }
 0x606   : > { %2605 = vrot.lane.b32.xlu1 %v2441_v49, %s4993_s18 }
 0x60a   : > { %2457 = vrot.lane.b32.xlu1 %v5567_v19, %s4997_s20  ;;  %v5767_v19 = vpop.permute.xlu0 %2703 }
 0x60e   : > { %2459 = vrot.lane.b32.xlu1 %v5574_v20, %s4997_s20  ;;  %v5772_v61 = vpop.permute.xlu0 %2862 }
 0x612   : > { %2688 = vperm.xlu1 %4751, %v2682_v46  }
 0x616   : > { %2698 = vperm.xlu1 %4751, %v2684_v52  }
 0x66c   : > { %v2470_v37 = vpop.permute.xlu1 %2469 }
 0x66d   : > { %v2474_v59 = vsel %vm696_vm3, %v2470_v37, %v2472_v23 }
 0x670   : > { %v2466_v57 = vpop.permute.xlu1 %2465 }
 0x671   : > { %v2473_v20 = vsel %vm696_vm3, %v2466_v57, %v2468_v26 }
 0x672   : > { %2486 = vmatpush1.bf16.msra.mxu0 %v2473_v20 }
 0x673   : > { %2487 = vmatprep.subr.bf16.mxu0 %v2472_v23 }
 0x674   : > { %v2602_v58 = vpop.permute.xlu1 %2601 }
 0x675   : > { %v2609_v60 = vsel %vm894_vm4, %v2602_v58, %v2604_v45 }
 0x676   : > { %2488 = vmatpush1.bf16.msra.mxu0 %v2474_v59  ;;  %2622 = vmatpush1.bf16.msra.mxu1 %v2609_v60 }
 0x677   : > { %2623 = vmatprep.subr.bf16.mxu1 %v2608_v48  ;;  %2886 = vmatprep.subr.bf16.mxu0 %v5772_v61 }
 0x678   : > { %v2606_v31 = vpop.permute.xlu1 %2605 }
 0x679   : > { %v2610_v44 = vsel %vm894_vm4, %v2606_v31, %v2608_v48 }
 0x67a   : > { %2624 = vmatpush1.bf16.msra.mxu1 %v2610_v44 }
 0x67c   : > { %v2458_v63 = vpop.permute.xlu1 %2457 }
 0x67d   : > { %4468 = vmatmul.mubr.msk.bf16.vlgmr.msra.gmra.mrb[56].mxu0 %vm2363_vm1, %v2458_v63  ;;  %4478 = vmatmul.mubr.msk.bf16.vlgmr.msra.gmra.mrb[60].mxu1 %vm2363_vm1, %v2598_v50  ;;  %v2796_v63 = vadd.s32 4294967293, %v5243_v13 }
 0x67e   : > { %2527 = vmatprep.mubr.bf16.mxu0 %v4991_v5  ;;  %2663 = vmatprep.mubr.bf16.mxu1 %v4991_v5 }
 0x67f   : > { %vm2798_vm14 = vcmp.ge.s32.totalorder %v2796_v63, 0  ;;  %vm2800_vm15 = vcmp.lt.s32.totalorder %v2796_v63, 16 }
 0x680   : > { %v2460_v0 = vpop.permute.xlu1 %2459  ;;  %vm5787_vm2 = vmand %vm2798_vm14, %vm2800_vm15 }
 0x681   : > { %vm5794_vm5 = vmpackc.low %vm5787_vm2, %vm5787_vm2 }
 0x685   : > { %4469 = vmatmul.mubr.msk.bf16.gmra.mrb[60].mxu0 %vm2363_vm1, %v2460_v0  ;;  %4479 = vmatmul.mubr.msk.bf16.gmra.mrb[64].mxu1 %vm2363_vm1, %v2600_v53 }
 0x686   : > { %4656 = vmatprep.mubr.msk.bf16.mxu1 %vm2363_vm1, %v5595_v22  ;;  %2918 = vmatprep.mubr.bf16.mxu0 %v4991_v5 }
 0x691   : > { %v2689_v28 = vpop.permute.xlu1 %2688 }
 0x695   : > { %v2699_v42 = vpop.permute.xlu1 %2698 }
 0x6d5   : > { %v4650_v1 = vpop.f32.mrb[56].mxu1 }
 0x6d6   : > { %v2578_v2 = vpop.f32.mrb[57].mxu1 }
 0x6d7   : > { %v4651_v3 = vpop.f32.mrb[58].mxu1 }
 0x6d8   : > { %v2582_v4 = vpop.f32.mrb[59].mxu1 }
 0x750   : > { %v2519_v47 = vpop.f32.mrb[56].mxu0  ;;  %v2655_v54 = vpop.f32.mrb[60].mxu1 }
 0x751   : > { %v2579_v39 = vadd.f32 %v2578_v2, %v2519_v47  ;;  %v2521_v8 = vpop.f32.mrb[57].mxu0  ;;  %v2657_v6 = vpop.f32.mrb[61].mxu1 }
 0x752   : > { %v2523_v43 = vpop.f32.mrb[58].mxu0  ;;  %v2659_v11 = vpop.f32.mrb[62].mxu1 }
 0x753   : > { %v2674_v15 = vadd.f32 %v2655_v54, %v2579_v39  ;;  %v2583_v18 = vadd.f32 %v2582_v4, %v2523_v43  ;;  %v2525_v56 = vpop.f32.mrb[59].mxu0  ;;  %v2661_v26 = vpop.f32.mrb[63].mxu1 }
 0x755   : > { %v2706_v30 = vadd.f32 %v2689_v28, %v2674_v15  ;;  %v2676_v14 = vadd.f32 %v2659_v11, %v2583_v18 }
 0x757   : > { %v2714_v32 = vand.u32 2147483647, %v2706_v30  ;;  %v2708_v27 = vadd.f32 %v2694_v38, %v2676_v14  ;;  %vm2746_vm12 = vcmp.ge.f32.partialorder %v2706_v30, 0.0 }
 0x758   : > { %v2529_v33 = vpop.f32.mrb[60].mxu0  ;;  %v2665_v16 = vpop.f32.mrb[64].mxu1 }
 0x759   : > { %v2722_v21 = vsub.f32 0.0, %v2714_v32  ;;  %v2716_v34 = vand.u32 2147483647, %v2708_v27  ;;  %v2589_v35 = vadd.f32 %v4650_v1, %v2529_v33  ;;  %v2531_v17 = vpop.f32.mrb[61].mxu0  ;;  %v2667_v40 = vpop.f32.mrb[65].mxu1  ;;  %vm2748_vm13 = vcmp.ge.f32.partialorder %v2708_v27, 0.0 }
 0x75a   : > { %v2533_v29 = vpop.f32.mrb[62].mxu0  ;;  %v2669_v62 = vpop.f32.mrb[66].mxu1  ;;  %v3167_v40 = vld [vmem:[%s6273_s13] sm:$0xff] }
 0x75b   : > { %v2730_v7 = vmul.f32 1.442695, %v2722_v21  ;;  %v2724_v36 = vsub.f32 0.0, %v2716_v34  ;;  %v2678_v41 = vadd.f32 %v2665_v16, %v2589_v35  ;;  %v2593_v9 = vadd.f32 %v4651_v3, %v2533_v29  ;;  %v2535_v49 = vpop.f32.mrb[63].mxu0  ;;  %v2671_v12 = vpop.f32.mrb[67].mxu1 }
 0x75c   : > { %v3055_v17 = vpop.permute.xlu0 %3054 }
 0x75d   : > { %4886 = vpow2.f32 %v2730_v7  ;;  %v2734_v10 = vmul.f32 1.442695, %v2724_v36  ;;  %v2710_v45 = vadd.f32 %v2699_v42, %v2678_v41  ;;  %v2680_v46 = vadd.f32 %v2669_v62, %v2593_v9 }
 0x75f   : > { %4888 = vpow2.f32 %v2734_v10  ;;  %v2718_v52 = vand.u32 2147483647, %v2710_v45  ;;  %v2712_v23 = vadd.f32 %v5767_v19, %v2680_v46  ;;  %vm2750_vm6 = vcmp.ge.f32.partialorder %v2710_v45, 0.0 }
 0x761   : > { %v2726_v48 = vsub.f32 0.0, %v2718_v52  ;;  %v2720_v50 = vand.u32 2147483647, %v2712_v23  ;;  %vm2752_vm7 = vcmp.ge.f32.partialorder %v2712_v23, 0.0 }
 0x763   : > { %v2738_v53 = vmul.f32 1.442695, %v2726_v48  ;;  %v2728_v38 = vsub.f32 0.0, %v2720_v50 }
 0x765   : > { %4890 = vpow2.f32 %v2738_v53  ;;  %v2742_v37 = vmul.f32 1.442695, %v2728_v38 }
 0x767   : > { %v4887_v57 = vpop.eup %4886  ;;  %4892 = vpow2.f32 %v2742_v37 }
 0x768   : > { %v2762_v20 = vadd.f32 1.0, %v4887_v57  ;;  %v2754_v1 = vsel %vm2746_vm12, 1.0, %v4887_v57 }
 0x769   : > { %v4889_v58 = vpop.eup %4888 }
 0x76a   : > { %4894 = vrcp.f32 %v2762_v20  ;;  %v2764_v59 = vadd.f32 1.0, %v4889_v58  ;;  %v2756_v4 = vsel %vm2748_vm13, 1.0, %v4889_v58 }
 0x76c   : > { %4896 = vrcp.f32 %v2764_v59 }
 0x76f   : > { %v4891_v60 = vpop.eup %4890 }
 0x770   : > { %v2766_v31 = vadd.f32 1.0, %v4891_v60  ;;  %v2758_v56 = vsel %vm2750_vm6, 1.0, %v4891_v60 }
 0x771   : > { %v4893_v44 = vpop.eup %4892 }
 0x772   : > { %4898 = vrcp.f32 %v2766_v31  ;;  %v2768_v19 = vadd.f32 1.0, %v4893_v44  ;;  %v2760_v14 = vsel %vm2752_vm7, 1.0, %v4893_v44  ;;  %v5872_v31 = vld [vmem:[%s6274_s14 + $0x10] ss:$8 sps:$4 sm:$0xff]   ;;  %v5879_v44 = vld [vmem:[%s6274_s14] ss:$8 sps:$4 sm:$0xff]  }
 0x773   : > { %3459 = vrot.lane.b32.xlu0 %v5872_v31, %s4996_s0 }
 0x774   : > { %v4895_v0 = vpop.eup %4894  ;;  %4900 = vrcp.f32 %v2768_v19 }
 0x775   : > { %v2778_v2 = vmul.f32 %v4895_v0, %v2754_v1 }
 0x776   : > { %v4897_v3 = vpop.eup %4896 }
 0x777   : > { %v2786_v47 = vmul.f32 %v2778_v2, %v2706_v30  ;;  %v2780_v54 = vmul.f32 %v4897_v3, %v2756_v4 }
 0x779   : > { %v2788_v8 = vmul.f32 %v2780_v54, %v2708_v27  ;;  %v2808_v11 = vsel %vm5787_vm2, %v2786_v47, 0.0 }
 0x77b   : > { %v4489_v43 = vpack.c.bf16 %v2788_v8, %v2786_v47  ;;  %v2810_v15 = vsel %vm5787_vm2, %v2788_v8, 0.0 }
 0x77c   : > { %v4899_v18 = vpop.eup %4898  ;;  %v2816_v26 = vpack.c.bf16 %v2810_v15, %v2808_v11 }
 0x77d   : > { %v2782_v28 = vmul.f32 %v4899_v18, %v2758_v56  ;;  %4652 = vmatprep.subr.msk.bf16.mxu1 %vm5794_vm5, %v4489_v43 }
 0x77e   : > { %v4901_v30 = vpop.eup %4900  ;;  %4653 = vmatpush3.bf16.msk.msra.mxu1 %vm5794_vm5, %v4489_v43  ;;  %2860 = vrot.lane.b32.xlu1 %v2816_v26, %s4992_s27 }
 0x77f   : > { %v2790_v32 = vmul.f32 %v2782_v28, %v2710_v45  ;;  %v2784_v27 = vmul.f32 %v4901_v30, %v2760_v14 }
 0x781   : > { %v2792_v33 = vmul.f32 %v2784_v27, %v2712_v23  ;;  %v2812_v21 = vsel %vm5787_vm2, %v2790_v32, 0.0 }
 0x782   : > { %3052 = vrot.lane.b32.xlu1 %v2816_v26, %s4993_s18 }
 0x783   : > { %v4492_v16 = vpack.c.bf16 %v2792_v33, %v2790_v32  ;;  %v2814_v34 = vsel %vm5787_vm2, %v2792_v33, 0.0 }
 0x784   : > { %v2818_v35 = vpack.c.bf16 %v2814_v34, %v2812_v21 }
 0x785   : > { %4654 = vmatprep.subr.msk.bf16.mxu1 %vm5794_vm5, %v4492_v16 }
 0x786   : > { %4655 = vmatpush3.bf16.msk.msra.mxu1 %vm5794_vm5, %v4492_v16  ;;  %2864 = vrot.lane.b32.xlu1 %v2818_v35, %s4992_s27 }
 0x787   : > { %3078 = vmatprep.subr.bf16.mxu1 %v3055_v17 }
 0x789   : > { %4657 = vmatmul.mubr.msk.bf16.vlgmr.msra.gmra.mrb[68].mxu1 %vm2363_vm1, %v5602_v24 }
 0x78a   : > { %3056 = vrot.lane.b32.xlu1 %v2818_v35, %s4993_s18  ;;  %4660 = vmatprep.mubr.msk.bf16.mxu1 %vm2363_vm1, %v5609_v25 }
 0x78e   : > { %2848 = vrot.lane.b32.xlu1 %v5595_v22, %s4997_s20  ;;  %v3169_v22 = vld [vmem:[%s6273_s13 + $0x10] sm:$0xff] }
 0x791   : > { %4661 = vmatmul.mubr.msk.bf16.gmra.mrb[72].mxu1 %vm2363_vm1, %v5616_v55 }
 0x792   : > { %2850 = vrot.lane.b32.xlu1 %v5602_v24, %s4997_s20  ;;  %3110 = vmatprep.mubr.bf16.mxu1 %v4991_v5  ;;  %v3171_v24 = vld [vmem:[%s6273_s13 + $0x20] sm:$0xff] }
 0x796   : > { %2852 = vrot.lane.b32.xlu1 %v5609_v25, %s4997_s20  ;;  %v3173_v25 = vld [vmem:[%s6273_s13 + $0x30] sm:$0xff] }
 0x79a   : > { %2854 = vrot.lane.b32.xlu1 %v5616_v55, %s4997_s20  ;;  %v2867_v55 = vpop.permute.xlu0 %2866 }
 0x79e   : > { %3177 = vperm.xlu1 %4751, %v3167_v40   ;;  %v3059_v41 = vpop.permute.xlu0 %3058 }
 0x7a2   : > { %3187 = vperm.xlu1 %4751, %v3169_v22   ;;  %v3045_v10 = vpop.permute.xlu0 %3044 }
 0x7a6   : > { %3197 = vperm.xlu1 %4751, %v3171_v24   ;;  %v3047_v46 = vpop.permute.xlu0 %3046 }
 0x7aa   : > { %3207 = vperm.xlu1 %4751, %v3173_v25   ;;  %v3049_v23 = vpop.permute.xlu0 %3048 }
 0x7ae   : > { %v3051_v50 = vpop.permute.xlu0 %3050 }
 0x7b2   : > { %v3183_v63 = vpop.permute.xlu0 %3182 }
 0x7b6   : > { %v3193_v19 = vpop.permute.xlu0 %3192 }
 0x7ba   : > { %v5883_v0 = vpop.permute.xlu0 %3202 }
 0x7be   : > { %v5885_v1 = vpop.permute.xlu0 %3212 }
 0x7c2   : > { %v5887_v2 = vpop.permute.xlu0 %3475 }
 0x7f0   : > { %v2861_v29 = vpop.permute.xlu1 %2860 }
 0x7f1   : > { %v2868_v62 = vsel %vm696_vm3, %v2861_v29, %v5772_v61 }
 0x7f2   : > { %2887 = vmatpush1.bf16.msra.mxu0 %v2868_v62 }
 0x7f3   : > { %2888 = vmatprep.subr.bf16.mxu0 %v2867_v55 }
 0x7f4   : > { %v3053_v7 = vpop.permute.xlu1 %3052 }
 0x7f5   : > { %v3060_v36 = vsel %vm894_vm4, %v3053_v7, %v3055_v17 }
 0x7f6   : > { %3079 = vmatpush1.bf16.msra.mxu1 %v3060_v36 }
 0x7f7   : > { %3080 = vmatprep.subr.bf16.mxu1 %v3059_v41 }
 0x7f8   : > { %v2865_v9 = vpop.permute.xlu1 %2864 }
 0x7f9   : > { %v2869_v49 = vsel %vm696_vm3, %v2865_v9, %v2867_v55 }
 0x7fa   : > { %2889 = vmatpush1.bf16.msra.mxu0 %v2869_v49 }
 0x7fb   : > { %3513 = vmatprep.subr.bf16.mxu0 %v5887_v2 }
 0x7fc   : > { %v3057_v12 = vpop.permute.xlu1 %3056 }
 0x7fd   : > { %v3061_v42 = vsel %vm894_vm4, %v3057_v12, %v3059_v41 }
 0x7fe   : > { %3081 = vmatpush1.bf16.msra.mxu1 %v3061_v42 }
 0x800   : > { %v2849_v45 = vpop.permute.xlu1 %2848 }
 0x801   : > { %4484 = vmatmul.mubr.msk.bf16.vlgmr.msra.gmra.mrb[64].mxu0 %vm2363_vm1, %v2849_v45  ;;  %4498 = vmatmul.mubr.msk.bf16.vlgmr.msra.gmra.mrb[76].mxu1 %vm2363_vm1, %v3045_v10 }
 0x802   : > { %2928 = vmatprep.mubr.bf16.mxu0 %v4991_v5  ;;  %3120 = vmatprep.mubr.bf16.mxu1 %v4991_v5 }
 0x804   : > { %v2851_v61 = vpop.permute.xlu1 %2850 }
 0x808   : > { %v2853_v52 = vpop.permute.xlu1 %2852 }
 0x809   : > { %4485 = vmatmul.mubr.msk.bf16.gmra.mrb[68].mxu0 %vm2363_vm1, %v2851_v61  ;;  %4499 = vmatmul.mubr.msk.bf16.gmra.mrb[80].mxu1 %vm2363_vm1, %v3047_v46 }
 0x80a   : > { %2938 = vmatprep.mubr.bf16.mxu0 %v4991_v5  ;;  %3130 = vmatprep.mubr.bf16.mxu1 %v4991_v5 }
 0x80c   : > { %v2855_v48 = vpop.permute.xlu1 %2854 }
 0x811   : > { %4486 = vmatmul.mubr.msk.bf16.gmra.mrb[72].mxu0 %vm2363_vm1, %v2853_v52  ;;  %4500 = vmatmul.mubr.msk.bf16.gmra.mrb[84].mxu1 %vm2363_vm1, %v3049_v23 }
 0x812   : > { %2948 = vmatprep.mubr.bf16.mxu0 %v4991_v5  ;;  %3140 = vmatprep.mubr.bf16.mxu1 %v4991_v5 }
 0x819   : > { %4487 = vmatmul.mubr.msk.bf16.gmra.mrb[76].mxu0 %vm2363_vm1, %v2855_v48  ;;  %4501 = vmatmul.mubr.msk.bf16.gmra.mrb[88].mxu1 %vm2363_vm1, %v3051_v50 }
 0x81a   : > { %3545 = vmatprep.mubr.bf16.mxu0 %v4991_v5  ;;  %4672 = vmatprep.mubr.msk.bf16.mxu1 %vm1340_vm0, %v5879_v44 }
 0x81d   : > { %v3178_v56 = vpop.permute.xlu1 %3177 }
 0x821   : > { %v3188_v7 = vpop.permute.xlu1 %3187 }
 0x85c   : > { %v4658_v53 = vpop.f32.mrb[68].mxu1 }
 0x85d   : > { %v3005_v38 = vpop.f32.mrb[69].mxu1 }
 0x85e   : > { %v4659_v37 = vpop.f32.mrb[70].mxu1 }
 0x85f   : > { %v3009_v57 = vpop.f32.mrb[71].mxu1 }
 0x864   : > { %v5865_v20 = vpop.f32.mrb[72].mxu1 }
 0x865   : > { %v3025_v58 = vpop.f32.mrb[73].mxu1 }
 0x866   : > { %v5867_v59 = vpop.f32.mrb[74].mxu1 }
 0x867   : > { %v3029_v60 = vpop.f32.mrb[75].mxu1 }
 0x8d4   : > { %v2920_v3 = vpop.f32.mrb[64].mxu0  ;;  %v3112_v4 = vpop.f32.mrb[76].mxu1 }
 0x8d5   : > { %v3006_v47 = vadd.f32 %v3005_v38, %v2920_v3  ;;  %v2922_v54 = vpop.f32.mrb[65].mxu0  ;;  %v3114_v39 = vpop.f32.mrb[77].mxu1 }
 0x8d6   : > { %v2924_v8 = vpop.f32.mrb[66].mxu0  ;;  %v3116_v6 = vpop.f32.mrb[78].mxu1 }
 0x8d7   : > { %v3151_v43 = vadd.f32 %v3112_v4, %v3006_v47  ;;  %v3010_v11 = vadd.f32 %v3009_v57, %v2924_v8  ;;  %v2926_v15 = vpop.f32.mrb[67].mxu0  ;;  %v3118_v18 = vpop.f32.mrb[79].mxu1 }
 0x8d8   : > { %v3198_v4 = vpop.permute.xlu1 %3197 }
 0x8d9   : > { %v5890_v26 = vadd.f32 %v3178_v56, %v3151_v43  ;;  %v3153_v28 = vadd.f32 %v3116_v6, %v3010_v11 }
 0x8db   : > { %v3231_v30 = vand.u32 2147483647, %v5890_v26  ;;  %v5893_v14 = vadd.f32 %v3183_v63, %v3153_v28  ;;  %vm3295_vm1 = vcmp.ge.f32.partialorder %v5890_v26, 0.0 }
 0x8dc   : > { %v2930_v32 = vpop.f32.mrb[68].mxu0  ;;  %v3122_v27 = vpop.f32.mrb[80].mxu1 }
 0x8dd   : > { %v3247_v33 = vsub.f32 0.0, %v3231_v30  ;;  %v3233_v16 = vand.u32 2147483647, %v5893_v14  ;;  %v3016_v21 = vadd.f32 %v4658_v53, %v2930_v32  ;;  %v2932_v34 = vpop.f32.mrb[69].mxu0  ;;  %v3124_v35 = vpop.f32.mrb[81].mxu1  ;;  %vm3297_vm10 = vcmp.ge.f32.partialorder %v5893_v14, 0.0 }
 0x8de   : > { %v2934_v17 = vpop.f32.mrb[70].mxu0  ;;  %v3126_v40 = vpop.f32.mrb[82].mxu1 }
 0x8df   : > { %v3263_v22 = vmul.f32 1.442695, %v3247_v33  ;;  %v3249_v24 = vsub.f32 0.0, %v3233_v16  ;;  %v3155_v25 = vadd.f32 %v3122_v27, %v3016_v21  ;;  %v3020_v55 = vadd.f32 %v4659_v37, %v2934_v17  ;;  %v2936_v29 = vpop.f32.mrb[71].mxu0  ;;  %v3128_v62 = vpop.f32.mrb[83].mxu1 }
 0x8e1   : > { %4902 = vpow2.f32 %v3263_v22  ;;  %v3267_v36 = vmul.f32 1.442695, %v3249_v24  ;;  %v5896_v41 = vadd.f32 %v3188_v7, %v3155_v25  ;;  %v3157_v9 = vadd.f32 %v3126_v40, %v3020_v55  ;;  %v3208_v40 = vpop.permute.xlu1 %3207 }
 0x8e2   : > { %v3393_v7 = vadd.s32 4294967294, %v5243_v13 }
 0x8e3   : > { %4904 = vpow2.f32 %v3267_v36  ;;  %v3235_v49 = vand.u32 2147483647, %v5896_v41  ;;  %v5899_v12 = vadd.f32 %v3193_v19, %v3157_v9  ;;  %vm3299_vm13 = vcmp.ge.f32.partialorder %v5896_v41, 0.0 }
 0x8e4   : > { %v2940_v42 = vpop.f32.mrb[72].mxu0  ;;  %v3132_v10 = vpop.f32.mrb[84].mxu1  ;;  %vm3395_vm8 = vcmp.ge.s32.totalorder %v3393_v7, 0  ;;  %vm3397_vm9 = vcmp.lt.s32.totalorder %v3393_v7, 16 }
 0x8e5   : > { %v3251_v45 = vsub.f32 0.0, %v3235_v49  ;;  %v3237_v61 = vand.u32 2147483647, %v5899_v12  ;;  %v3026_v46 = vadd.f32 %v3025_v58, %v2940_v42  ;;  %v2942_v52 = vpop.f32.mrb[73].mxu0  ;;  %v3134_v23 = vpop.f32.mrb[85].mxu1  ;;  %vm5922_vm11 = vmand %vm3395_vm8, %vm3397_vm9  ;;  %vm3301_vm14 = vcmp.ge.f32.partialorder %v5899_v12, 0.0 }
 0x8e6   : > { %v2944_v48 = vpop.f32.mrb[74].mxu0  ;;  %v3136_v50 = vpop.f32.mrb[86].mxu1  ;;  %vm5930_vm12 = vmpackc.low %vm5922_vm11, %vm5922_vm11 }
 0x8e7   : > { %v3271_v53 = vmul.f32 1.442695, %v3251_v45  ;;  %v3253_v38 = vsub.f32 0.0, %v3237_v61  ;;  %v3159_v37 = vadd.f32 %v3132_v10, %v3026_v46  ;;  %v3030_v57 = vadd.f32 %v3029_v60, %v2944_v48  ;;  %v2946_v63 = vpop.f32.mrb[75].mxu0  ;;  %v3138_v3 = vpop.f32.mrb[87].mxu1 }
 0x8e9   : > { %4906 = vpow2.f32 %v3271_v53  ;;  %v3275_v19 = vmul.f32 1.442695, %v3253_v38  ;;  %v5902_v47 = vadd.f32 %v3198_v4, %v3159_v37  ;;  %v3161_v54 = vadd.f32 %v3136_v50, %v3030_v57 }
 0x8eb   : > { %v4903_v39 = vpop.eup %4902  ;;  %4908 = vpow2.f32 %v3275_v19  ;;  %v3239_v58 = vand.u32 2147483647, %v5902_v47  ;;  %v5906_v8 = vadd.f32 %v5883_v0, %v3161_v54  ;;  %vm3303_vm15 = vcmp.ge.f32.partialorder %v5902_v47, 0.0 }
 0x8ec   : > { %v3327_v6 = vadd.f32 1.0, %v4903_v39  ;;  %v2950_v43 = vpop.f32.mrb[76].mxu0  ;;  %v3142_v11 = vpop.f32.mrb[88].mxu1  ;;  %v3311_v61 = vsel %vm3295_vm1, 1.0, %v4903_v39 }
 0x8ed   : > { %v4905_v15 = vpop.eup %4904  ;;  %v3255_v60 = vsub.f32 0.0, %v3239_v58  ;;  %v3241_v18 = vand.u32 2147483647, %v5906_v8  ;;  %v3036_v56 = vadd.f32 %v5865_v20, %v2950_v43  ;;  %v2952_v28 = vpop.f32.mrb[77].mxu0  ;;  %vm3305_vm2 = vcmp.ge.f32.partialorder %v5906_v8, 0.0 }
 0x8ee   : > { %v3144_v30 = vpop.f32.mrb[89].mxu1  ;;  %4910 = vrcp.f32 %v3327_v6  ;;  %v3329_v32 = vadd.f32 1.0, %v4905_v15  ;;  %v2954_v27 = vpop.f32.mrb[78].mxu0  ;;  %v3313_v23 = vsel %vm3297_vm10, 1.0, %v4905_v15 }
 0x8ef   : > { %v3146_v33 = vpop.f32.mrb[90].mxu1  ;;  %v3279_v16 = vmul.f32 1.442695, %v3255_v60  ;;  %v3257_v21 = vsub.f32 0.0, %v3241_v18  ;;  %v3163_v34 = vadd.f32 %v3142_v11, %v3036_v56  ;;  %v3040_v0 = vadd.f32 %v5867_v59, %v2954_v27  ;;  %v2956_v35 = vpop.f32.mrb[79].mxu0 }
 0x8f0   : > { %v3148_v17 = vpop.f32.mrb[91].mxu1  ;;  %4912 = vrcp.f32 %v3329_v32 }
 0x8f1   : > { %4914 = vpow2.f32 %v3279_v16  ;;  %v3283_v22 = vmul.f32 1.442695, %v3257_v21  ;;  %v5911_v24 = vadd.f32 %v3208_v40, %v3163_v34  ;;  %v3165_v20 = vadd.f32 %v3146_v33, %v3040_v0  ;;  %v4786_v17 = vld [vmem:[%s6274_s14 + $0x30] ss:$8 sps:$4 sm:$0xff]  }
 0x8f3   : > { %v4907_v25 = vpop.eup %4906  ;;  %4916 = vpow2.f32 %v3283_v22  ;;  %v3243_v55 = vand.u32 2147483647, %v5911_v24  ;;  %v5915_v29 = vadd.f32 %v5885_v1, %v3165_v20  ;;  %vm3307_vm5 = vcmp.ge.f32.partialorder %v5911_v24, 0.0 }
 0x8f4   : > { %v3331_v62 = vadd.f32 1.0, %v4907_v25 }
 0x8f5   : > { %v4909_v59 = vpop.eup %4908  ;;  %v3259_v36 = vsub.f32 0.0, %v3243_v55  ;;  %v3245_v9 = vand.u32 2147483647, %v5915_v29  ;;  %vm3309_vm6 = vcmp.ge.f32.partialorder %v5915_v29, 0.0 }
 0x8f6   : > { %4918 = vrcp.f32 %v3331_v62  ;;  %v3333_v49 = vadd.f32 1.0, %v4909_v59  ;;  %v3317_v11 = vsel %vm3301_vm14, 1.0, %v4909_v59 }
 0x8f7   : > { %v3287_v42 = vmul.f32 1.442695, %v3259_v36  ;;  %v3261_v10 = vsub.f32 0.0, %v3245_v9 }
 0x8f8   : > { %v4911_v45 = vpop.eup %4910  ;;  %4920 = vrcp.f32 %v3333_v49 }
 0x8f9   : > { %v3359_v1 = vmul.f32 %v4911_v45, %v3311_v61  ;;  %4922 = vpow2.f32 %v3287_v42  ;;  %v3291_v46 = vmul.f32 1.442695, %v3261_v10  ;;  %v3813_v61 = vld [vmem:[%s6275_s15 + $0x8] sm:$0xff] }
 0x8fa   : > { %v4913_v52 = vpop.eup %4912 }
 0x8fb   : > { %v4915_v48 = vpop.eup %4914  ;;  %v3375_v50 = vmul.f32 %v3359_v1, %v5890_v26  ;;  %v3361_v53 = vmul.f32 %v4913_v52, %v3313_v23  ;;  %4924 = vpow2.f32 %v3291_v46  ;;  %v4791_v52 = vld [vmem:[%s6274_s14 + $0x20] ss:$8 sps:$4 sm:$0xff]  }
 0x8fc   : > { %v3335_v38 = vadd.f32 1.0, %v4915_v48  ;;  %v3817_v23 = vld [vmem:[%s6275_s15 + $0x28] sm:$0xff] }
 0x8fd   : > { %v4917_v57 = vpop.eup %4916  ;;  %v3377_v63 = vmul.f32 %v3361_v53, %v5893_v14  ;;  %v3405_v19 = vsel %vm5922_vm11, %v3375_v50, 0.0  ;;  %v3315_v14 = vsel %vm3299_vm13, 1.0, %v4907_v25  ;;  %v3818_v53 = vld [vmem:[%s6275_s15 + $0x30] sm:$0xff] }
 0x8fe   : > { %4926 = vrcp.f32 %v3335_v38  ;;  %v3337_v3 = vadd.f32 1.0, %v4917_v57  ;;  %v3321_v35 = vsel %vm3305_vm2, 1.0, %v4917_v57  ;;  %v3480_v57 = vpop.permute.xlu0 %3479  ;;  %vm4999_vm2 = vmmov 0  }
 0x8ff   : > { %v4511_v26 = vpack.c.bf16 %v3377_v63, %v3375_v50  ;;  %v3407_v54 = vsel %vm5922_vm11, %v3377_v63, 0.0  ;;  %v3816_v50 = vld [vmem:[%s6275_s15 + $0x20] sm:$0xff] }
 0x900   : > { %v4919_v39 = vpop.eup %4918  ;;  %4928 = vrcp.f32 %v3337_v3  ;;  %v3421_v58 = vpack.c.bf16 %v3407_v54, %v3405_v19 }
 0x901   : > { %v3363_v6 = vmul.f32 %v4919_v39, %v3315_v14  ;;  %4664 = vmatprep.subr.msk.bf16.mxu1 %vm5930_vm12, %v4511_v26 }
 0x902   : > { %v4921_v43 = vpop.eup %4920  ;;  %4665 = vmatpush3.bf16.msk.msra.mxu1 %vm5930_vm12, %v4511_v26  ;;  %3683 = vrot.lane.b32.xlu0 %v3421_v58, %s4993_s18  ;;  %v3484_v63 = vpop.permute.xlu0 %3483 }
 0x903   : > { %v4923_v15 = vpop.eup %4922  ;;  %v3379_v60 = vmul.f32 %v3363_v6, %v5896_v41  ;;  %v3365_v18 = vmul.f32 %v4921_v43, %v3317_v11  ;;  %3473 = vrot.lane.b32.xlu1 %v3421_v58, %s4992_s27  ;;  %v3319_v41 = vsel %vm3303_vm15, 1.0, %v4915_v48  ;;  %v3819_v48 = vld [vmem:[%s6275_s15 + $0x38] sm:$0xff] }
 0x904   : > { %v3339_v56 = vadd.f32 1.0, %v4923_v15  ;;  %v3323_v59 = vsel %vm3307_vm5, 1.0, %v4923_v15 }
 0x905   : > { %v4925_v28 = vpop.eup %4924  ;;  %v3381_v30 = vmul.f32 %v3365_v18, %v5899_v12  ;;  %v3409_v33 = vsel %vm5922_vm11, %v3379_v60, 0.0 }
 0x906   : > { %4930 = vrcp.f32 %v3339_v56  ;;  %v3341_v32 = vadd.f32 1.0, %v4925_v28  ;;  %v3325_v9 = vsel %vm3309_vm6, 1.0, %v4925_v28  ;;  %v3488_v26 = vpop.permute.xlu0 %3487 }
 0x907   : > { %v4514_v27 = vpack.c.bf16 %v3381_v30, %v3379_v60  ;;  %v3411_v16 = vsel %vm5922_vm11, %v3381_v30, 0.0 }
 0x908   : > { %v4927_v21 = vpop.eup %4926  ;;  %4932 = vrcp.f32 %v3341_v32  ;;  %v3423_v34 = vpack.c.bf16 %v3411_v16, %v3409_v33 }
 0x909   : > { %v3367_v0 = vmul.f32 %v4927_v21, %v3319_v41  ;;  %4666 = vmatprep.subr.msk.bf16.mxu1 %vm5930_vm12, %v4514_v27  ;;  %v4790_v41 = vld [vmem:[%s6274_s14 + $0x4] ss:$8 sps:$4 sm:$0xff]  }
 0x90a   : > { %v4929_v12 = vpop.eup %4928  ;;  %4667 = vmatpush3.bf16.msk.msra.mxu1 %vm5930_vm12, %v4514_v27  ;;  %3687 = vrot.lane.b32.xlu0 %v3423_v34, %s4993_s18  ;;  %v3460_v39 = vpop.permute.xlu0 %3459 }
 0x90b   : > { %v3383_v40 = vmul.f32 %v3367_v0, %v5902_v47  ;;  %v3369_v22 = vmul.f32 %v4929_v12, %v3321_v35  ;;  %3477 = vrot.lane.b32.xlu1 %v3423_v34, %s4992_s27  ;;  %v4793_v34 = vld [vmem:[%s6274_s14 + $0x14] ss:$8 sps:$4 sm:$0xff]   ;;  %v4794_v0 = vld [vmem:[%s6274_s14 + $0x24] ss:$8 sps:$4 sm:$0xff]  }
 0x90c   : > { %v4795_v12 = vld [vmem:[%s6274_s14 + $0x34] ss:$8 sps:$4 sm:$0xff]  }
 0x90d   : > { %v3385_v20 = vmul.f32 %v3369_v22, %v5906_v8  ;;  %v3413_v55 = vsel %vm5922_vm11, %v3383_v40, 0.0 }
 0x90e   : > { %3463 = vrot.lane.b32.xlu0 %v4786_v17, %s4996_s0 }
 0x90f   : > { %v4517_v25 = vpack.c.bf16 %v3385_v20, %v3383_v40  ;;  %v3415_v62 = vsel %vm5922_vm11, %v3385_v20, 0.0 }
 0x910   : > { %v4931_v7 = vpop.eup %4930  ;;  %v3425_v36 = vpack.c.bf16 %v3415_v62, %v3413_v55 }
 0x911   : > { %v3371_v47 = vmul.f32 %v4931_v7, %v3323_v59  ;;  %4668 = vmatprep.subr.msk.bf16.mxu1 %vm5930_vm12, %v4517_v25 }
 0x912   : > { %v4933_v8 = vpop.eup %4932  ;;  %3693 = vrot.lane.b32.xlu0 %v4995_v51, %s4993_s18  ;;  %4669 = vmatpush3.bf16.msk.msra.mxu1 %vm5930_vm12, %v4517_v25 }
 0x913   : > { %v3387_v49 = vmul.f32 %v3371_v47, %v5911_v24  ;;  %v3373_v42 = vmul.f32 %v4933_v8, %v3325_v9  ;;  %3481 = vrot.lane.b32.xlu1 %v3425_v36, %s4992_s27 }
 0x915   : > { %v3389_v10 = vmul.f32 %v3373_v42, %v5915_v29  ;;  %v3417_v1 = vsel %vm5922_vm11, %v3387_v49, 0.0  ;;  %v3815_v29 = vld [vmem:[%s6275_s15 + $0x18] sm:$0xff] }
 0x916   : > { %3697 = vrot.lane.b32.xlu0 %v4995_v51, %s4993_s18 }
 0x917   : > { %v4520_v45 = vpack.c.bf16 %v3389_v10, %v3387_v49  ;;  %v3419_v46 = vsel %vm5922_vm11, %v3389_v10, 0.0 }
 0x918   : > { %v3427_v24 = vpack.c.bf16 %v3419_v46, %v3417_v1 }
 0x919   : > { %4670 = vmatprep.subr.msk.bf16.mxu1 %vm5930_vm12, %v4520_v45 }
 0x91a   : > { %3827 = vperm.xlu0 %4750, %v3813_v61   ;;  %4671 = vmatpush3.bf16.msk.msra.mxu1 %vm5930_vm12, %v4520_v45 }
 0x91b   : > { %3485 = vrot.lane.b32.xlu1 %v3427_v24, %s4992_s27 }
 0x91d   : > { %4673 = vmatmul.mubr.msk.bf16.vlgmr.msra.gmra.mrb[92].mxu1 %vm1340_vm0, %v5872_v31  ;;  %v3812_v31 = vld [vmem:[%s6275_s15] sm:$0xff] }
 0x91e   : > { %3837 = vperm.xlu0 %4750, %v3815_v29   ;;  %4676 = vmatprep.mubr.msk.bf16.mxu1 %vm1340_vm0, %v4791_v52 }
 0x91f   : > { %3457 = vrot.lane.b32.xlu1 %v5879_v44, %s4996_s0  ;;  %v3814_v44 = vld [vmem:[%s6275_s15 + $0x10] sm:$0xff] }
 0x922   : > { %3847 = vperm.xlu0 %4750, %v3817_v23  }
 0x923   : > { %3461 = vrot.lane.b32.xlu1 %v4791_v52, %s4996_s0 }
 0x925   : > { %4677 = vmatmul.mubr.msk.bf16.gmra.mrb[96].mxu1 %vm1340_vm0, %v4786_v17 }
 0x926   : > { %3857 = vperm.xlu0 %4750, %v3819_v48  }
 0x927   : > { %3685 = vrot.lane.b32.xlu1 %v4995_v51, %s4993_s18 }
 0x92a   : > { %4090 = vrot.lane.b32.xlu0 %v4995_v51, %s4992_s27 }
 0x92b   : > { %3689 = vrot.lane.b32.xlu1 %v4995_v51, %s4993_s18 }
 0x92e   : > { %4094 = vrot.lane.b32.xlu0 %v4995_v51, %s4992_s27 }
 0x92f   : > { %3691 = vrot.lane.b32.xlu1 %v3425_v36, %s4993_s18 }
 0x932   : > { %4098 = vrot.lane.b32.xlu0 %v4995_v51, %s4992_s27 }
 0x933   : > { %3695 = vrot.lane.b32.xlu1 %v3427_v24, %s4993_s18 }
 0x936   : > { %4102 = vrot.lane.b32.xlu0 %v4995_v51, %s4992_s27 }
 0x937   : > { %3822 = vperm.xlu1 %4751, %v3812_v31  }
 0x93b   : > { %3832 = vperm.xlu1 %4751, %v3814_v44  }
 0x93f   : > { %3842 = vperm.xlu1 %4751, %v3816_v50  }
 0x943   : > { %3852 = vperm.xlu1 %4751, %v3818_v53  }
 0x975   : > { %v3474_v38 = vpop.permute.xlu1 %3473 }
 0x976   : > { %v3489_v37 = vsel %vm696_vm3, %v3474_v38, %v5887_v2  ;;  %v3684_v2 = vpop.permute.xlu0 %3683 }
 0x977   : > { %3514 = vmatpush1.bf16.msra.mxu0 %v3489_v37 }
 0x978   : > { %3515 = vmatprep.subr.bf16.mxu0 %v3480_v57 }
 0x97c   : > { %v3688_v43 = vpop.permute.xlu0 %3687 }
 0x97d   : > { %v3478_v3 = vpop.permute.xlu1 %3477 }
 0x97e   : > { %v3490_v4 = vsel %vm696_vm3, %v3478_v3, %v3480_v57 }
 0x97f   : > { %3516 = vmatpush1.bf16.msra.mxu0 %v3490_v4 }
 0x980   : > { %3517 = vmatprep.subr.bf16.mxu0 %v3484_v63  ;;  %v3464_v15 = vpop.permute.xlu0 %3463 }
 0x984   : > { %v3694_v56 = vpop.permute.xlu0 %3693 }
 0x985   : > { %v3482_v19 = vpop.permute.xlu1 %3481 }
 0x986   : > { %v3491_v54 = vsel %vm696_vm3, %v3482_v19, %v3484_v63 }
 0x987   : > { %3518 = vmatpush1.bf16.msra.mxu0 %v3491_v54 }
 0x988   : > { %3519 = vmatprep.subr.bf16.mxu0 %v3488_v26  ;;  %v3698_v33 = vpop.permute.xlu0 %3697 }
 0x98d   : > { %v3486_v14 = vpop.permute.xlu1 %3485 }
 0x98e   : > { %v3492_v58 = vsel %vm696_vm3, %v3486_v14, %v3488_v26 }
 0x98f   : > { %3520 = vmatpush1.bf16.msra.mxu0 %v3492_v58 }
 0x991   : > { %v3458_v6 = vpop.permute.xlu1 %3457 }
 0x992   : > { %4506 = vmatmul.mubr.msk.bf16.vlgmr.msra.gmra.mrb[80].mxu0 %vm1340_vm0, %v3458_v6 }
 0x993   : > { %3555 = vmatprep.mubr.bf16.mxu0 %v4991_v5 }
 0x995   : > { %v3462_v11 = vpop.permute.xlu1 %3461 }
 0x999   : > { %v3686_v60 = vpop.permute.xlu1 %3685 }
 0x99a   : > { %v3699_v18 = vsel %vm894_vm4, %v3684_v2, %v3686_v60  ;;  %4507 = vmatmul.mubr.msk.bf16.gmra.mrb[84].mxu0 %vm1340_vm0, %v3460_v39  ;;  %3723 = vmatprep.subr.bf16.mxu0 %v3686_v60  ;;  %v3828_v39 = vpop.permute.xlu0 %3827 }
 0x99b   : > { %3724 = vmatpush1.bf16.msra.mxu0 %v3699_v18  ;;  %3565 = vmatprep.mubr.bf16.mxu0 %v4991_v5 }
 0x99d   : > { %v3690_v28 = vpop.permute.xlu1 %3689 }
 0x99e   : > { %v3700_v30 = vsel %vm894_vm4, %v3688_v43, %v3690_v28  ;;  %3725 = vmatprep.subr.bf16.mxu0 %v3690_v28 }
 0x99f   : > { %3726 = vmatpush1.bf16.msra.mxu0 %v3700_v30 }
 0x9a0   : > { %3727 = vmatprep.subr.bf16.mxu0 %v3694_v56 }
 0x9a1   : > { %v3692_v32 = vpop.permute.xlu1 %3691 }
 0x9a2   : > { %v3701_v27 = vsel %vm894_vm4, %v3692_v32, %v3694_v56  ;;  %4508 = vmatmul.mubr.msk.bf16.gmra.mrb[88].mxu0 %vm1340_vm0, %v3462_v11 }
 0x9a3   : > { %3728 = vmatpush1.bf16.msra.mxu0 %v3701_v27  ;;  %3575 = vmatprep.mubr.bf16.mxu0 %v4991_v5 }
 0x9a4   : > { %3729 = vmatprep.subr.bf16.mxu0 %v3698_v33 }
 0x9a5   : > { %v3696_v16 = vpop.permute.xlu1 %3695 }
 0x9a6   : > { %v3702_v21 = vsel %vm894_vm4, %v3696_v16, %v3698_v33  ;;  %v3838_v16 = vpop.permute.xlu0 %3837 }
 0x9a7   : > { %3730 = vmatpush1.bf16.msra.mxu0 %v3702_v21 }
 0x9aa   : > { %4509 = vmatmul.mubr.msk.bf16.gmra.mrb[92].mxu0 %vm1340_vm0, %v3464_v15 }
 0x9ab   : > { %3755 = vmatprep.mubr.bf16.mxu0 %v4991_v5 }
 0x9b2   : > { %4530 = vmatmul.mubr.msk.bf16.vlgmr.msra.gmra.mrb[96].mxu0 %vm1340_vm0, %v4790_v41 }
 0x9b3   : > { %3765 = vmatprep.mubr.bf16.mxu0 %v4991_v5 }
 0x9b6   : > { %v3823_v3 = vpop.permute.xlu1 %3822 }
 0x9ba   : > { %4531 = vmatmul.mubr.msk.bf16.gmra.mrb[100].mxu0 %vm1340_vm0, %v4793_v34  ;;  %v3833_v56 = vpop.permute.xlu1 %3832 }
 0x9bb   : > { %3775 = vmatprep.mubr.bf16.mxu0 %v4991_v5 }
 0x9c2   : > { %4532 = vmatmul.mubr.msk.bf16.gmra.mrb[104].mxu0 %vm1340_vm0, %v4794_v0 }
 0x9c3   : > { %3785 = vmatprep.mubr.bf16.mxu0 %v4991_v5 }
 0x9ca   : > { %4533 = vmatmul.mubr.msk.bf16.gmra.mrb[108].mxu0 %vm1340_vm0, %v4795_v12 }
 0x9f0   : > { %v4674_v35 = vpop.f32.mrb[92].mxu1 }
 0x9f1   : > { %v3632_v17 = vpop.f32.mrb[93].mxu1 }
 0x9f2   : > { %v4675_v40 = vpop.f32.mrb[94].mxu1 }
 0x9f3   : > { %v3636_v22 = vpop.f32.mrb[95].mxu1 }
 0x9f8   : > { %v4678_v20 = vpop.f32.mrb[96].mxu1 }
 0x9f9   : > { %v3652_v25 = vpop.f32.mrb[97].mxu1 }
 0x9fa   : > { %v4679_v55 = vpop.f32.mrb[98].mxu1 }
 0x9fb   : > { %v3656_v62 = vpop.f32.mrb[99].mxu1 }
 0xa65   : > { %v3547_v7 = vpop.f32.mrb[80].mxu0 }
 0xa66   : > { %v3633_v59 = vadd.f32 %v3632_v17, %v3547_v7  ;;  %v3549_v36 = vpop.f32.mrb[81].mxu0 }
 0xa67   : > { %v3551_v47 = vpop.f32.mrb[82].mxu0  ;;  %v3848_v36 = vpop.permute.xlu0 %3847 }
 0xa68   : > { %v3637_v8 = vadd.f32 %v3636_v22, %v3551_v47  ;;  %v3553_v5 = vpop.f32.mrb[83].mxu0 }
 0xa6d   : > { %v3557_v9 = vpop.f32.mrb[84].mxu0 }
 0xa6e   : > { %v3643_v49 = vadd.f32 %v4674_v35, %v3557_v9  ;;  %v3559_v42 = vpop.f32.mrb[85].mxu0 }
 0xa6f   : > { %v3561_v10 = vpop.f32.mrb[86].mxu0 }
 0xa70   : > { %v3647_v45 = vadd.f32 %v4675_v40, %v3561_v10  ;;  %v3563_v61 = vpop.f32.mrb[87].mxu0 }
 0xa75   : > { %v3567_v1 = vpop.f32.mrb[88].mxu0 }
 0xa76   : > { %v3653_v46 = vadd.f32 %v3652_v25, %v3567_v1  ;;  %v3569_v24 = vpop.f32.mrb[89].mxu0 }
 0xa77   : > { %v3571_v29 = vpop.f32.mrb[90].mxu0 }
 0xa78   : > { %v3657_v52 = vadd.f32 %v3656_v62, %v3571_v29  ;;  %v3573_v23 = vpop.f32.mrb[91].mxu0 }
 0xa7d   : > { %v3577_v48 = vpop.f32.mrb[92].mxu0 }
 0xa7e   : > { %v3663_v31 = vadd.f32 %v4678_v20, %v3577_v48  ;;  %v3579_v44 = vpop.f32.mrb[93].mxu0  ;;  %v3843_v20 = vpop.permute.xlu1 %3842 }
 0xa7f   : > { %v3581_v50 = vpop.f32.mrb[94].mxu0 }
 0xa80   : > { %v6076_v53 = vadd.f32 %v4679_v55, %v3581_v50  ;;  %v3583_v38 = vpop.f32.mrb[95].mxu0 }
 0xa85   : > { %v3757_v37 = vpop.f32.mrb[96].mxu0 }
 0xa86   : > { %v3796_v57 = vadd.f32 %v3757_v37, %v3633_v59  ;;  %v3759_v63 = vpop.f32.mrb[97].mxu0  ;;  %v3858_v37 = vpop.permute.xlu0 %3857 }
 0xa87   : > { %v3761_v4 = vpop.f32.mrb[98].mxu0 }
 0xa88   : > { %v6078_v26 = vadd.f32 %v3823_v3, %v3796_v57  ;;  %v3798_v19 = vadd.f32 %v3761_v4, %v3637_v8  ;;  %v3763_v54 = vpop.f32.mrb[99].mxu0 }
 0xa8a   : > { %v3876_v14 = vand.u32 2147483647, %v6078_v26  ;;  %v6081_v58 = vadd.f32 %v3828_v39, %v3798_v19  ;;  %vm3940_vm7 = vcmp.ge.f32.partialorder %v6078_v26, 0.0 }
 0xa8c   : > { %v3892_v2 = vsub.f32 0.0, %v3876_v14  ;;  %v3878_v6 = vand.u32 2147483647, %v6081_v58  ;;  %v4998_v14 = vmov 0.0   ;;  %vm3942_vm9 = vcmp.ge.f32.partialorder %v6081_v58, 0.0 }
 0xa8d   : > { %v3767_v43 = vpop.f32.mrb[100].mxu0  ;;  %4680 = vmatprep.subr.bf16.mxu1 %v4998_v14  ;;  %4704 = vmatprep.subr.bf16.mxu0 %v4998_v14 }
 0xa8e   : > { %v3908_v11 = vmul.f32 1.442695, %v3892_v2  ;;  %v3894_v15 = vsub.f32 0.0, %v3878_v6  ;;  %v3800_v60 = vadd.f32 %v3767_v43, %v3643_v49  ;;  %v3769_v18 = vpop.f32.mrb[101].mxu0  ;;  %4688 = vmatprep.mubr.msk.bf16.mxu1 %vm4999_vm2, %v4998_v14  ;;  %4712 = vmatprep.mubr.msk.bf16.mxu0 %vm4999_vm2, %v4998_v14 }
 0xa8f   : > { %v3771_v28 = vpop.f32.mrb[102].mxu0 }
 0xa90   : > { %4934 = vpow2.f32 %v3908_v11  ;;  %v3912_v30 = vmul.f32 1.442695, %v3894_v15  ;;  %v6084_v32 = vadd.f32 %v3833_v56, %v3800_v60  ;;  %v3802_v27 = vadd.f32 %v3771_v28, %v3647_v45  ;;  %v3773_v33 = vpop.f32.mrb[103].mxu0 }
 0xa92   : > { %4936 = vpow2.f32 %v3912_v30  ;;  %v3880_v21 = vand.u32 2147483647, %v6084_v32  ;;  %v6087_v41 = vadd.f32 %v3838_v16, %v3802_v27  ;;  %vm3944_vm11 = vcmp.ge.f32.partialorder %v6084_v32, 0.0 }
 0xa94   : > { %v3896_v34 = vsub.f32 0.0, %v3880_v21  ;;  %v3882_v0 = vand.u32 2147483647, %v6087_v41  ;;  %vm3946_vm12 = vcmp.ge.f32.partialorder %v6087_v41, 0.0 }
 0xa95   : > { %v3777_v12 = vpop.f32.mrb[104].mxu0 }
 0xa96   : > { %v3916_v35 = vmul.f32 1.442695, %v3896_v34  ;;  %v3898_v17 = vsub.f32 0.0, %v3882_v0  ;;  %v3804_v40 = vadd.f32 %v3777_v12, %v3653_v46  ;;  %v3779_v22 = vpop.f32.mrb[105].mxu0 }
 0xa97   : > { %v3781_v25 = vpop.f32.mrb[106].mxu0 }
 0xa98   : > { %4938 = vpow2.f32 %v3916_v35  ;;  %v3920_v55 = vmul.f32 1.442695, %v3898_v17  ;;  %v6090_v62 = vadd.f32 %v3843_v20, %v3804_v40  ;;  %v3806_v7 = vadd.f32 %v3781_v25, %v3657_v52  ;;  %v3783_v59 = vpop.f32.mrb[107].mxu0  ;;  %v3853_v52 = vpop.permute.xlu1 %3852 }
 0xa9a   : > { %v4935_v47 = vpop.eup %4934  ;;  %4940 = vpow2.f32 %v3920_v55  ;;  %v3884_v8 = vand.u32 2147483647, %v6090_v62  ;;  %v6093_v5 = vadd.f32 %v3848_v36, %v3806_v7  ;;  %vm3948_vm13 = vcmp.ge.f32.partialorder %v6090_v62, 0.0 }
 0xa9b   : > { %v3972_v9 = vadd.f32 1.0, %v4935_v47  ;;  %v3956_v11 = vsel %vm3940_vm7, 1.0, %v4935_v47 }
 0xa9c   : > { %v4937_v49 = vpop.eup %4936  ;;  %v3900_v42 = vsub.f32 0.0, %v3884_v8  ;;  %v3886_v10 = vand.u32 2147483647, %v6093_v5  ;;  %vm3950_vm14 = vcmp.ge.f32.partialorder %v6093_v5, 0.0 }
 0xa9d   : > { %4942 = vrcp.f32 %v3972_v9  ;;  %v3974_v45 = vadd.f32 1.0, %v4937_v49  ;;  %v3787_v61 = vpop.f32.mrb[108].mxu0  ;;  %v3958_v18 = vsel %vm3942_vm9, 1.0, %v4937_v49 }
 0xa9e   : > { %v3924_v1 = vmul.f32 1.442695, %v3900_v42  ;;  %v3902_v46 = vsub.f32 0.0, %v3886_v10  ;;  %v3808_v24 = vadd.f32 %v3787_v61, %v3663_v31  ;;  %v3789_v29 = vpop.f32.mrb[109].mxu0  ;;  %v4038_v31 = vadd.s32 4294967295, %v5243_v13 }
 0xa9f   : > { %4944 = vrcp.f32 %v3974_v45  ;;  %v3791_v23 = vpop.f32.mrb[110].mxu0 }
 0xaa0   : > { %4946 = vpow2.f32 %v3924_v1  ;;  %v3928_v48 = vmul.f32 1.442695, %v3902_v46  ;;  %v6096_v44 = vadd.f32 %v3853_v52, %v3808_v24  ;;  %v3810_v50 = vadd.f32 %v3791_v23, %v6076_v53  ;;  %v3793_v38 = vpop.f32.mrb[111].mxu0 }
 0xaa1   : > { %vm4040_vm1 = vcmp.ge.s32.totalorder %v4038_v31, 0  ;;  %vm4042_vm8 = vcmp.lt.s32.totalorder %v4038_v31, 16 }
 0xaa2   : > { %v4939_v57 = vpop.eup %4938  ;;  %4948 = vpow2.f32 %v3928_v48  ;;  %v3888_v63 = vand.u32 2147483647, %v6096_v44  ;;  %v6100_v3 = vadd.f32 %v3858_v37, %v3810_v50  ;;  %vm6111_vm10 = vmand %vm4040_vm1, %vm4042_vm8  ;;  %vm3952_vm15 = vcmp.ge.f32.partialorder %v6096_v44, 0.0 }
 0xaa3   : > { %v3976_v4 = vadd.f32 1.0, %v4939_v57  ;;  %v3960_v17 = vsel %vm3944_vm11, 1.0, %v4939_v57  ;;  %vm6208_vm6 = vmpackc.low %vm6111_vm10, %vm6111_vm10 }
 0xaa4   : > { %v4941_v19 = vpop.eup %4940  ;;  %v3904_v54 = vsub.f32 0.0, %v3888_v63  ;;  %v3890_v39 = vand.u32 2147483647, %v6100_v3  ;;  %vm3954_vm5 = vcmp.ge.f32.partialorder %v6100_v3, 0.0 }
 0xaa5   : > { %4950 = vrcp.f32 %v3976_v4  ;;  %v3978_v53 = vadd.f32 1.0, %v4941_v19  ;;  %v3962_v20 = vsel %vm3946_vm12, 1.0, %v4941_v19 }
 0xaa6   : > { %v3932_v2 = vmul.f32 1.442695, %v3904_v54  ;;  %v3906_v6 = vsub.f32 0.0, %v3890_v39 }
 0xaa7   : > { %v4943_v43 = vpop.eup %4942  ;;  %4952 = vrcp.f32 %v3978_v53  ;;  %v6179_v53 = vld [vmem:[%s6276_s16] sm:$0xff] }
 0xaa8   : > { %v4004_v13 = vmul.f32 %v4943_v43, %v3956_v11  ;;  %4954 = vpow2.f32 %v3932_v2  ;;  %v3936_v15 = vmul.f32 1.442695, %v3906_v6  ;;  %v4091_v6 = vpop.permute.xlu0 %4090 }
 0xaa9   : > { %v4945_v60 = vpop.eup %4944 }
 0xaaa   : > { %v4947_v56 = vpop.eup %4946  ;;  %v6109_v28 = vmul.f32 %v4004_v13, %v6078_v26  ;;  %v4006_v30 = vmul.f32 %v4945_v60, %v3958_v18  ;;  %4956 = vpow2.f32 %v3936_v15 }
 0xaab   : > { %v3980_v27 = vadd.f32 1.0, %v4947_v56  ;;  %v3964_v10 = vsel %vm3948_vm13, 1.0, %v4947_v56 }
 0xaac   : > { %v4949_v16 = vpop.eup %4948  ;;  %v6116_v21 = vmul.f32 %v4006_v30, %v6081_v58  ;;  %v4050_v26 = vsel %vm6111_vm10, %v6109_v28, 0.0  ;;  %v4095_v13 = vpop.permute.xlu0 %4094 }
 0xaad   : > { %4958 = vrcp.f32 %v3980_v27  ;;  %v3982_v34 = vadd.f32 1.0, %v4949_v16  ;;  %v3966_v1 = vsel %vm3950_vm14, 1.0, %v4949_v16 }
 0xaae   : > { %v4537_v0 = vpack.c.bf16 %v6116_v21, %v6109_v28  ;;  %v4052_v12 = vsel %vm6111_vm10, %v6116_v21, 0.0 }
 0xaaf   : > { %v4951_v35 = vpop.eup %4950  ;;  %4960 = vrcp.f32 %v3982_v34  ;;  %v4066_v58 = vpack.c.bf16 %v4052_v12, %v4050_v26 }
 0xab0   : > { %v4008_v40 = vmul.f32 %v4951_v35, %v3960_v17  ;;  %v4099_v18 = vpop.permute.xlu0 %4098 }
 0xab1   : > { %v4953_v22 = vpop.eup %4952  ;;  %4200 = vrot.lane.b32.xlu0 %v4066_v58, %s4993_s18  ;;  %4088 = vrot.lane.b32.xlu1 %v4066_v58, %s4992_s27 }
 0xab2   : > { %v4955_v25 = vpop.eup %4954  ;;  %v6131_v55 = vmul.f32 %v4008_v40, %v6084_v32  ;;  %v4010_v7 = vmul.f32 %v4953_v22, %v3962_v20 }
 0xab3   : > { %v3984_v59 = vadd.f32 1.0, %v4955_v25 }
 0xab4   : > { %v4957_v36 = vpop.eup %4956  ;;  %v6134_v47 = vmul.f32 %v4010_v7, %v6087_v41  ;;  %v4054_v49 = vsel %vm6111_vm10, %v6131_v55, 0.0 }
 0xab5   : > { %4962 = vrcp.f32 %v3984_v59  ;;  %v3986_v8 = vadd.f32 1.0, %v4957_v36  ;;  %v3970_v57 = vsel %vm3954_vm5, 1.0, %v4957_v36 }
 0xab6   : > { %v4540_v9 = vpack.c.bf16 %v6134_v47, %v6131_v55  ;;  %v4056_v32 = vsel %vm6111_vm10, %v6134_v47, 0.0 }
 0xab7   : > { %v4959_v42 = vpop.eup %4958  ;;  %4964 = vrcp.f32 %v3986_v8  ;;  %v4068_v41 = vpack.c.bf16 %v4056_v32, %v4054_v49 }
 0xab8   : > { %v4012_v45 = vmul.f32 %v4959_v42, %v3964_v10 }
 0xab9   : > { %v4961_v61 = vpop.eup %4960  ;;  %4204 = vrot.lane.b32.xlu0 %v4068_v41, %s4993_s18  ;;  %4092 = vrot.lane.b32.xlu1 %v4068_v41, %s4992_s27 }
 0xaba   : > { %v6149_v46 = vmul.f32 %v4012_v45, %v6090_v62  ;;  %v4014_v24 = vmul.f32 %v4961_v61, %v3966_v1 }
 0xabc   : > { %v6152_v29 = vmul.f32 %v4014_v24, %v6093_v5  ;;  %v4058_v23 = vsel %vm6111_vm10, %v6149_v46, 0.0  ;;  %v3968_v5 = vsel %vm3952_vm15, 1.0, %v4955_v25  ;;  %v4549_v25 = vcombine.high %v6179_v53, %v6179_v53 }
 0xabe   : > { %v4543_v52 = vpack.c.bf16 %v6152_v29, %v6149_v46  ;;  %v4060_v48 = vsel %vm6111_vm10, %v6152_v29, 0.0 }
 0xabf   : > { %v4963_v62 = vpop.eup %4962  ;;  %v4070_v50 = vpack.c.bf16 %v4060_v48, %v4058_v23 }
 0xac0   : > { %v4016_v38 = vmul.f32 %v4963_v62, %v3968_v5 }
 0xac1   : > { %v4965_v37 = vpop.eup %4964  ;;  %4208 = vrot.lane.b32.xlu0 %v4070_v50, %s4993_s18  ;;  %4096 = vrot.lane.b32.xlu1 %v4070_v50, %s4992_s27 }
 0xac2   : > { %v4032_v63 = vmul.f32 %v4016_v38, %v6096_v44  ;;  %v4018_v4 = vmul.f32 %v4965_v37, %v3970_v57  ;;  %v4534_v44 = vcombine.low %v6179_v53, %v6179_v53 }
 0xac4   : > { %v4034_v31 = vmul.f32 %v4018_v4, %v6100_v3  ;;  %v4062_v54 = vsel %vm6111_vm10, %v4032_v63, 0.0  ;;  %v4268_v3 = vld [vmem:[%s6277_s17] sm:$0xff] }
 0xac6   : > { %v4546_v19 = vpack.c.bf16 %v4034_v31, %v4032_v63  ;;  %v4064_v39 = vsel %vm6111_vm10, %v4034_v31, 0.0 }
 0xac7   : > { %v4072_v2 = vpack.c.bf16 %v4064_v39, %v4062_v54 }
 0xac9   : > { %4212 = vrot.lane.b32.xlu0 %v4072_v2, %s4993_s18  ;;  %4100 = vrot.lane.b32.xlu1 %v4072_v2, %s4992_s27 }
 0xacd   : > { %4271 = vperm.xlu0 %4750, %v4268_v3   ;;  %4078 = vrot.lane.b32.xlu1 %v4534_v44, %s4996_s0  ;;  %s6319_s0 = sld [smem:[#allocation9_spill]] }
 0xad1   : > { %4202 = vrot.lane.b32.xlu1 %v4995_v51, %s4993_s18 }
 0xad3   : > { %s642_s26 = scalar_lea.vmem %s6319_s0, %s5120_s2 }
 0xad5   : > { %4206 = vrot.lane.b32.xlu1 %v4995_v51, %s4993_s18 }
 0xad9   : > { %4210 = vrot.lane.b32.xlu1 %v4995_v51, %s4993_s18 }
 0xadd   : > { %4214 = vrot.lane.b32.xlu1 %v4995_v51, %s4993_s18  ;;  %v4103_v51 = vpop.permute.xlu0 %4102 }
 0xb23   : > { %v4089_v43 = vpop.permute.xlu1 %4088  ;;  %v4201_v33 = vpop.permute.xlu0 %4200 }
 0xb24   : > { %v4104_v11 = vsel %vm696_vm3, %v4089_v43, %v4091_v6 }
 0xb25   : > { %4681 = vmatpush3.bf16.msra.mxu1 %v4104_v11 }
 0xb26   : > { %4682 = vmatprep.subr.bf16.mxu1 %v4998_v14 }
 0xb2b   : > { %v4093_v15 = vpop.permute.xlu1 %4092  ;;  %v4205_v28 = vpop.permute.xlu0 %4204 }
 0xb2c   : > { %v4105_v60 = vsel %vm696_vm3, %v4093_v15, %v4095_v13 }
 0xb2d   : > { %4683 = vmatpush3.bf16.msra.mxu1 %v4105_v60 }
 0xb2e   : > { %4684 = vmatprep.subr.bf16.mxu1 %v4998_v14 }
 0xb33   : > { %v4097_v56 = vpop.permute.xlu1 %4096  ;;  %v4209_v17 = vpop.permute.xlu0 %4208 }
 0xb34   : > { %v4106_v30 = vsel %vm696_vm3, %v4097_v56, %v4099_v18 }
 0xb35   : > { %4685 = vmatpush3.bf16.msra.mxu1 %v4106_v30 }
 0xb36   : > { %4686 = vmatprep.subr.bf16.mxu1 %v4998_v14 }
 0xb3b   : > { %v4101_v27 = vpop.permute.xlu1 %4100  ;;  %v4213_v22 = vpop.permute.xlu0 %4212 }
 0xb3c   : > { %v4107_v16 = vsel %vm696_vm3, %v4101_v27, %v4103_v51 }
 0xb3d   : > { %4687 = vmatpush3.bf16.msra.mxu1 %v4107_v16 }
 0xb3e   : > { %4692 = vmatprep.subr.bf16.mxu1 %v4998_v14 }
 0xb3f   : > { %v4079_v26 = vpop.permute.xlu1 %4078 }
 0xb40   : > { %4689 = vmatmul.mubr.msk.bf16.vlgmr.msra.gmra.mrb[100].mxu1 %vm1340_vm0, %v4079_v26 }
 0xb41   : > { %4693 = vmatpush3.bf16.msk.msra.mxu1 %vm6208_vm6, %v4537_v0  ;;  %4700 = vmatprep.mubr.msk.bf16.mxu1 %vm4999_vm2, %v4998_v14 }
 0xb42   : > { %4694 = vmatprep.subr.bf16.mxu1 %v4998_v14 }
 0xb43   : > { %v4203_v12 = vpop.permute.xlu1 %4202 }
 0xb44   : > { %v4216_v35 = vsel %vm894_vm4, %v4201_v33, %v4203_v12 }
 0xb45   : > { %4695 = vmatpush3.bf16.msk.msra.mxu1 %vm6208_vm6, %v4540_v9  ;;  %4705 = vmatpush3.bf16.msra.mxu0 %v4216_v35 }
 0xb46   : > { %4696 = vmatprep.subr.bf16.mxu1 %v4998_v14  ;;  %4706 = vmatprep.subr.bf16.mxu0 %v4998_v14 }
 0xb47   : > { %v4207_v21 = vpop.permute.xlu1 %4206 }
 0xb48   : > { %v4217_v0 = vsel %vm894_vm4, %v4205_v28, %v4207_v21 }
 0xb49   : > { %4697 = vmatpush3.bf16.msk.msra.mxu1 %vm6208_vm6, %v4543_v52  ;;  %4707 = vmatpush3.bf16.msra.mxu0 %v4217_v0 }
 0xb4a   : > { %4698 = vmatprep.subr.bf16.mxu1 %v4998_v14  ;;  %4708 = vmatprep.subr.bf16.mxu0 %v4998_v14 }
 0xb4b   : > { %v4211_v58 = vpop.permute.xlu1 %4210 }
 0xb4c   : > { %v4218_v40 = vsel %vm894_vm4, %v4209_v17, %v4211_v58  ;;  %v4272_v45 = vpop.permute.xlu0 %4271 }
 0xb4d   : > { %4699 = vmatpush3.bf16.msk.msra.mxu1 %vm6208_vm6, %v4546_v19  ;;  %4709 = vmatpush3.bf16.msra.mxu0 %v4218_v40 }
 0xb4e   : > { %4710 = vmatprep.subr.bf16.mxu0 %v4998_v14 }
 0xb4f   : > { %v4215_v20 = vpop.permute.xlu1 %4214 }
 0xb50   : > { %v4219_v55 = vsel %vm894_vm4, %v4213_v22, %v4215_v20  ;;  %4701 = vmatmul.mubr.msk.bf16.vlgmr.msra.gmra.mrb[104].mxu1 %vm1340_vm0, %v6179_v53 }
 0xb51   : > { %4711 = vmatpush3.bf16.msra.mxu0 %v4219_v55 }
 0xb54   : > { %4713 = vmatmul.mubr.msk.bf16.vlgmr.msra.gmra.mrb[112].mxu0 %vm1340_vm0, %v4549_v25 }
 0xc13   : > { %v4149_v7 = vpop.f32.mrb[100].mxu1 }
 0xc14   : > { %v4690_v59 = vpop.f32.mrb[101].mxu1 }
 0xc15   : > { %v4152_v36 = vpop.f32.mrb[102].mxu1 }
 0xc16   : > { %v4691_v47 = vpop.f32.mrb[103].mxu1 }
 0xc23   : > { %v4192_v8 = vpop.f32.mrb[104].mxu1 }
 0xc24   : > { %v4193_v14 = vadd.f32 %v4192_v8, %v4149_v7  ;;  %v4702_v9 = vpop.f32.mrb[105].mxu1 }
 0xc25   : > { %v4195_v49 = vpop.f32.mrb[106].mxu1 }
 0xc26   : > { %v4703_v32 = vpop.f32.mrb[107].mxu1 }
 0xc27   : > { %v4261_v42 = vpop.f32.mrb[112].mxu0 }
 0xc28   : > { %v4267_v10 = vadd.f32 %v4261_v42, %v4193_v14  ;;  %v4714_v41 = vpop.f32.mrb[113].mxu0 }
 0xc29   : > { %v4264_v61 = vpop.f32.mrb[114].mxu0 }
 0xc2a   : > { %v4274_v1 = vadd.f32 %v4272_v45, %v4267_v10  ;;  %v4715_v46 = vpop.f32.mrb[115].mxu0 }
 0xc2c   : > { %4275 = vst [vmem:[%s642_s26] sm:$0xff] %v4274_v1 }
 0xc2d PF: > { %s6320_s19 = sld [smem:[#allocation4_spill]]  ;;  %s6321_s27 = sld [smem:[#allocation3_spill]] }
 0xc2e   : > { %s6322_s28 = sld [smem:[#allocation5_spill]] }
 0xc33   : > { %s28_s29 = sadd.s32 1, %s6320_s19  }
 0xc34   : > { %p25_p5 = scmp.ge.s32.totalorder %s28_s29, 4  }
 0xc36   :  { %27 = sbr.rel (!%p25_p5) target bundleno = 5 (0x5), region = 125 }

</bundles_post_ra>
